<compile_context>
chip_gen: v5e
topology: v5e:2x2
jax: 0.10.0
libtpu: 0.0.40
codegen_flags: <defaults>
</compile_context>

<pallas_src>
import jax
import jax.numpy as jnp
from jax import lax
from jax.experimental import pallas as pl
from jax.experimental.pallas import tpu as pltpu

INPUT_DIM = 64
HIDDEN_DIM = 256
OUTPUT_DIM = 64 * 64
NUM_RES_BLOCKS = 2
LN_EPS = 1e-5
N_TILE = 1024                     # output-column tile (1024 -> 4 grid steps; use 2048 on v7x)
OUTER = 2                         # megacore-parallel axis (2 TCs on v7x; loops elsewhere)


def _linear(x_bf16, w_ref, b_ref):
    # x: (B, in) bf16, w_ref: (in, out) bf16, b_ref: (1, out) f32 -> f32 via MXU accum.
    return jnp.dot(x_bf16, w_ref[...], preferred_element_type=jnp.float32) + b_ref[...]


def _layernorm(x, g_ref, b_ref):
    # Two-pass form (matches PyTorch / reference math); rsqrt goes to the EUP slot.
    mean = jnp.mean(x, axis=-1, keepdims=True)
    xc = x - mean
    var = jnp.mean(xc * xc, axis=-1, keepdims=True)
    return xc * lax.rsqrt(var + LN_EPS) * g_ref[...] + b_ref[...]


def final_mlp_kernel(x_ref,
                     wi_ref, bi_ref,
                     # residual block 0
                     w10_ref, b10_ref, g10_ref, be10_ref,
                     w20_ref, b20_ref, g20_ref, be20_ref,
                     # residual block 1
                     w11_ref, b11_ref, g11_ref, be11_ref,
                     w21_ref, b21_ref, g21_ref, be21_ref,
                     wo_ref, bo_ref,
                     out_ref,
                     h_scratch):
    # --- Trunk: computed once per TensorCore (first step of the inner axis) and
    # --- cached in VMEM scratch as bf16, ready to feed the MXU every step after.
    @pl.when(pl.program_id(1) == 0)
    def _compute_trunk():
        h = jnp.maximum(_linear(x_ref[...], wi_ref, bi_ref), 0.0)

        blocks = (
            (w10_ref, b10_ref, g10_ref, be10_ref, w20_ref, b20_ref, g20_ref, be20_ref),
            (w11_ref, b11_ref, g11_ref, be11_ref, w21_ref, b21_ref, g21_ref, be21_ref),
        )
        for (w1, b1, g1, be1, w2, b2, g2, be2) in blocks:
            identity = h
            out = _linear(h.astype(jnp.bfloat16), w1, b1)
            out = _layernorm(out, g1, be1)
            out = jnp.maximum(out, 0.0)
            # dropout: identity in eval mode
            out = _linear(out.astype(jnp.bfloat16), w2, b2)
            out = _layernorm(out, g2, be2)
            h = jnp.maximum(out + identity, 0.0)

        h_scratch[...] = h.astype(jnp.bfloat16)

    # --- Per-step work: one output_fc tile (B, 256) @ (256, N_TILE).
    out_ref[...] = (jnp.dot(h_scratch[...], wo_ref[...],
                            preferred_element_type=jnp.float32)
                    + bo_ref[...]).astype(out_ref.dtype)


def _resident_spec(shape):
    nd = len(shape)
    return pl.BlockSpec(shape, lambda i, j, _nd=nd: (0,) * _nd)


def final_mlp_forward(x, params, *, n_tile=N_TILE, out_dtype=jnp.float32):
    """x: (B, 64) f32; params: flat list of f32 arrays in kernel-arg order."""
    B = x.shape[0]
    B_pad = max(8, -(-B // 8) * 8)            # pad batch to a full f32 sublane group
    if B_pad != B:
        x = jnp.pad(x, ((0, B_pad - B), (0, 0)))

    # bf16 for everything that feeds the MXU; biases / LayerNorm params stay f32.
    def cast(p):
        return p.astype(jnp.bfloat16) if (p.ndim == 2 and p.shape[0] > 1) else p.astype(jnp.float32)

    cparams = [cast(p) for p in params]
    x_bf = x.astype(jnp.bfloat16)

    trunk = cparams[:-2]
    wo, bo = cparams[-2], cparams[-1]

    assert OUTPUT_DIM % (OUTER * n_tile) == 0
    inner = OUTPUT_DIM // (OUTER * n_tile)
    grid = (OUTER, inner)                     # (parallel, arbitrary)

    def _col_map(i, j, _inner=inner):
        return (0, i * _inner + j)

    in_specs = [_resident_spec(x_bf.shape)]
    in_specs += [_resident_spec(p.shape) for p in trunk]
    in_specs += [pl.BlockSpec((HIDDEN_DIM, n_tile), _col_map),   # wo tile (streamed)
                 pl.BlockSpec((1, n_tile), _col_map)]            # bo tile

    flops = 2 * B_pad * (INPUT_DIM * HIDDEN_DIM
                         + 2 * NUM_RES_BLOCKS * HIDDEN_DIM * HIDDEN_DIM
                         + HIDDEN_DIM * OUTPUT_DIM)
    bytes_accessed = (x_bf.size * x_bf.dtype.itemsize
                      + sum(int(p.size) * p.dtype.itemsize for p in cparams)
                      + B_pad * OUTPUT_DIM * jnp.dtype(out_dtype).itemsize)

    out = pl.pallas_call(
        final_mlp_kernel,
        out_shape=jax.ShapeDtypeStruct((B_pad, OUTPUT_DIM), out_dtype),
        grid=grid,
        in_specs=in_specs,
        out_specs=pl.BlockSpec((B_pad, n_tile), _col_map),
        scratch_shapes=[pltpu.VMEM((B_pad, HIDDEN_DIM), jnp.bfloat16)],  # cached trunk
        compiler_params=pltpu.CompilerParams(
            dimension_semantics=("parallel", "arbitrary"),  # v7x megacore on axis 0
            vmem_limit_bytes=32 * 1024 * 1024,              # fits v7x's 64 MiB; real need ~3 MiB
        ),
        cost_estimate=pl.CostEstimate(
            flops=flops, transcendentals=0, bytes_accessed=bytes_accessed),
    )(x_bf, *trunk, wo, bo)

    return out[:B]


def init_params(key):
    """Deterministic PyTorch-style init: Linear U(-1/sqrt(fan_in), 1/sqrt(fan_in)),
    LayerNorm gamma=1, beta=0. Weights stored as (in, out); 1-D params as (1, dim)."""
    params = []

    def linear_init(key, fan_in, fan_out):
        kw, kb = jax.random.split(key)
        bound = 1.0 / (fan_in ** 0.5)
        w = jax.random.uniform(kw, (fan_in, fan_out), jnp.float32, -bound, bound)
        b = jax.random.uniform(kb, (1, fan_out), jnp.float32, -bound, bound)
        return w, b

    keys = jax.random.split(key, 2 + NUM_RES_BLOCKS)

    w, b = linear_init(keys[0], INPUT_DIM, HIDDEN_DIM)
    params += [w, b]

    for i in range(NUM_RES_BLOCKS):
        k1, k2 = jax.random.split(keys[1 + i])
        w1, b1 = linear_init(k1, HIDDEN_DIM, HIDDEN_DIM)
        g1 = jnp.ones((1, HIDDEN_DIM), jnp.float32)
        be1 = jnp.zeros((1, HIDDEN_DIM), jnp.float32)
        w2, b2 = linear_init(k2, HIDDEN_DIM, HIDDEN_DIM)
        g2 = jnp.ones((1, HIDDEN_DIM), jnp.float32)
        be2 = jnp.zeros((1, HIDDEN_DIM), jnp.float32)
        params += [w1, b1, g1, be1, w2, b2, g2, be2]

    wo, bo = linear_init(keys[-1], HIDDEN_DIM, OUTPUT_DIM)
    params += [wo, bo]
    return params


def _ln_ref(x, g, b):
    mu = x.mean(-1, keepdims=True)
    var = ((x - mu) ** 2).mean(-1, keepdims=True)
    return (x - mu) / jnp.sqrt(var + LN_EPS) * g + b


def reference_forward(x, params, matmul_dtype=jnp.float32):
    """Pure-JAX reference. matmul_dtype=f32 gives PyTorch semantics; bf16 matches
    the kernel's mixed-precision scheme (f32 accumulation in both cases)."""
    def mm(a, w):
        return jnp.dot(a.astype(matmul_dtype), w.astype(matmul_dtype),
                       preferred_element_type=jnp.float32)

    it = iter(params)
    wi, bi = next(it), next(it)
    h = jnp.maximum(mm(x, wi) + bi, 0.0)
    for _ in range(NUM_RES_BLOCKS):
        w1, b1, g1, be1, w2, b2, g2, be2 = (next(it) for _ in range(8))
        identity = h
        out = _ln_ref(mm(h, w1) + b1, g1, be1)
        out = jnp.maximum(out, 0.0)
        out = _ln_ref(mm(out, w2) + b2, g2, be2)
        h = jnp.maximum(out + identity, 0.0)
    wo, bo = next(it), next(it)
    return mm(h, wo) + bo


if __name__ == "__main__":
    key = jax.random.PRNGKey(0)
    kx, kp = jax.random.split(key)

    batch = 2
    x = jax.random.normal(kx, (batch, INPUT_DIM), jnp.float32)
    params = init_params(kp)

    out = jax.block_until_ready(final_mlp_forward(x, params))
    assert out.shape == (batch, OUTPUT_DIM), out.shape

    # Tight check vs. a bf16-matched pure-JAX reference, looser check vs. the f32
    # (exact PyTorch-semantics) reference.
    ref_bf16 = reference_forward(x, params, matmul_dtype=jnp.bfloat16)
    ref_f32 = reference_forward(x, params, matmul_dtype=jnp.float32)
    err_bf16 = float(jnp.max(jnp.abs(out - ref_bf16)))
    err_f32 = float(jnp.max(jnp.abs(out - ref_f32)))
    assert jnp.allclose(out, ref_bf16, atol=1e-2, rtol=1e-2), err_bf16
    assert jnp.allclose(out, ref_f32, atol=5e-2, rtol=5e-2), err_f32

    print("KERNEL_OK")
</pallas_src>

<mosaic_0001>
module attributes {stable_mosaic.version = 11 : i64} {
  func.func @final_mlp_kernel(%arg0: i32, %arg1: i32, %arg2: memref<8x64xbf16, #tpu.memory_space<vmem>>, %arg3: memref<64x256xbf16, #tpu.memory_space<vmem>>, %arg4: memref<1x256xf32, #tpu.memory_space<vmem>>, %arg5: memref<256x256xbf16, #tpu.memory_space<vmem>>, %arg6: memref<1x256xf32, #tpu.memory_space<vmem>>, %arg7: memref<1x256xf32, #tpu.memory_space<vmem>>, %arg8: memref<1x256xf32, #tpu.memory_space<vmem>>, %arg9: memref<256x256xbf16, #tpu.memory_space<vmem>>, %arg10: memref<1x256xf32, #tpu.memory_space<vmem>>, %arg11: memref<1x256xf32, #tpu.memory_space<vmem>>, %arg12: memref<1x256xf32, #tpu.memory_space<vmem>>, %arg13: memref<256x256xbf16, #tpu.memory_space<vmem>>, %arg14: memref<1x256xf32, #tpu.memory_space<vmem>>, %arg15: memref<1x256xf32, #tpu.memory_space<vmem>>, %arg16: memref<1x256xf32, #tpu.memory_space<vmem>>, %arg17: memref<256x256xbf16, #tpu.memory_space<vmem>>, %arg18: memref<1x256xf32, #tpu.memory_space<vmem>>, %arg19: memref<1x256xf32, #tpu.memory_space<vmem>>, %arg20: memref<1x256xf32, #tpu.memory_space<vmem>>, %arg21: memref<256x1024xbf16, #tpu.memory_space<vmem>>, %arg22: memref<1x1024xf32, #tpu.memory_space<vmem>>, %arg23: memref<8x1024xf32, #tpu.memory_space<vmem>>, %arg24: memref<8x256xbf16, #tpu.memory_space<vmem>>) attributes {dimension_semantics = [#tpu.dimension_semantics<parallel>, #tpu.dimension_semantics<arbitrary>], iteration_bounds = array<i64: 2, 2>, scalar_prefetch = 0 : i64, scratch_operands = 1 : i64, tpu.core_type = #tpu.core_type<tc>, window_params = [{pipeline_mode = #tpu.pipeline_mode<synchronous>, transform_indices = @transform_0, window_bounds = array<i64: 8, 64>}, {pipeline_mode = #tpu.pipeline_mode<synchronous>, transform_indices = @transform_1, window_bounds = array<i64: 64, 256>}, {pipeline_mode = #tpu.pipeline_mode<synchronous>, transform_indices = @transform_2, window_bounds = array<i64: 1, 256>}, {pipeline_mode = #tpu.pipeline_mode<synchronous>, transform_indices = @transform_3, window_bounds = array<i64: 256, 256>}, {pipeline_mode = #tpu.pipeline_mode<synchronous>, transform_indices = @transform_4, window_bounds = array<i64: 1, 256>}, {pipeline_mode = #tpu.pipeline_mode<synchronous>, transform_indices = @transform_5, window_bounds = array<i64: 1, 256>}, {pipeline_mode = #tpu.pipeline_mode<synchronous>, transform_indices = @transform_6, window_bounds = array<i64: 1, 256>}, {pipeline_mode = #tpu.pipeline_mode<synchronous>, transform_indices = @transform_7, window_bounds = array<i64: 256, 256>}, {pipeline_mode = #tpu.pipeline_mode<synchronous>, transform_indices = @transform_8, window_bounds = array<i64: 1, 256>}, {pipeline_mode = #tpu.pipeline_mode<synchronous>, transform_indices = @transform_9, window_bounds = array<i64: 1, 256>}, {pipeline_mode = #tpu.pipeline_mode<synchronous>, transform_indices = @transform_10, window_bounds = array<i64: 1, 256>}, {pipeline_mode = #tpu.pipeline_mode<synchronous>, transform_indices = @transform_11, window_bounds = array<i64: 256, 256>}, {pipeline_mode = #tpu.pipeline_mode<synchronous>, transform_indices = @transform_12, window_bounds = array<i64: 1, 256>}, {pipeline_mode = #tpu.pipeline_mode<synchronous>, transform_indices = @transform_13, window_bounds = array<i64: 1, 256>}, {pipeline_mode = #tpu.pipeline_mode<synchronous>, transform_indices = @transform_14, window_bounds = array<i64: 1, 256>}, {pipeline_mode = #tpu.pipeline_mode<synchronous>, transform_indices = @transform_15, window_bounds = array<i64: 256, 256>}, {pipeline_mode = #tpu.pipeline_mode<synchronous>, transform_indices = @transform_16, window_bounds = array<i64: 1, 256>}, {pipeline_mode = #tpu.pipeline_mode<synchronous>, transform_indices = @transform_17, window_bounds = array<i64: 1, 256>}, {pipeline_mode = #tpu.pipeline_mode<synchronous>, transform_indices = @transform_18, window_bounds = array<i64: 1, 256>}, {transform_indices = @transform_19, window_bounds = array<i64: 256, 1024>}, {transform_indices = @transform_20, window_bounds = array<i64: 1, 1024>}, {transform_indices = @transform_21, window_bounds = array<i64: 8, 1024>}]} {
    %c0_i32 = arith.constant 0 : i32
    %0 = arith.cmpi eq, %arg1, %c0_i32 : i32
    %1 = arith.extui %0 : i1 to i32
    %c0_i32_0 = arith.constant 0 : i32
    %2 = arith.cmpi ne, %1, %c0_i32_0 : i32
    scf.if %2 {
      %c0_8 = arith.constant 0 : index
      %c0_9 = arith.constant 0 : index
      %10 = vector.load %arg2[%c0_8, %c0_9] : memref<8x64xbf16, #tpu.memory_space<vmem>>, vector<8x64xbf16>
      %c0_10 = arith.constant 0 : index
      %c0_11 = arith.constant 0 : index
      %11 = vector.load %arg3[%c0_10, %c0_11] : memref<64x256xbf16, #tpu.memory_space<vmem>>, vector<64x256xbf16>
      %cst_12 = arith.constant dense<0.000000e+00> : vector<8x256xf32>
      %12 = tpu.matmul %10, %11, %cst_12 {dimension_numbers = #tpu.dot_dimension_numbers<[1], [0], [0], [1], [0, 0, 1, 1], [], []>} : vector<8x64xbf16>, vector<64x256xbf16>, vector<8x256xf32> -> vector<8x256xf32>
      %c0_13 = arith.constant 0 : index
      %c0_14 = arith.constant 0 : index
      %13 = vector.load %arg4[%c0_13, %c0_14] : memref<1x256xf32, #tpu.memory_space<vmem>>, vector<1x256xf32>
      %14 = vector.broadcast %13 : vector<1x256xf32> to vector<8x256xf32>
      %15 = arith.addf %12, %14 : vector<8x256xf32>
      %cst_15 = arith.constant 0.000000e+00 : f32
      %16 = vector.broadcast %cst_15 : f32 to vector<8x256xf32>
      %17 = arith.maximumf %15, %16 : vector<8x256xf32>
      %18 = arith.truncf %17 : vector<8x256xf32> to vector<8x256xbf16>
      %c0_16 = arith.constant 0 : index
      %c0_17 = arith.constant 0 : index
      %19 = vector.load %arg5[%c0_16, %c0_17] : memref<256x256xbf16, #tpu.memory_space<vmem>>, vector<256x256xbf16>
      %cst_18 = arith.constant dense<0.000000e+00> : vector<8x256xf32>
      %20 = tpu.matmul %18, %19, %cst_18 {dimension_numbers = #tpu.dot_dimension_numbers<[1], [0], [0], [1], [0, 0, 1, 1], [], []>} : vector<8x256xbf16>, vector<256x256xbf16>, vector<8x256xf32> -> vector<8x256xf32>
      %c0_19 = arith.constant 0 : index
      %c0_20 = arith.constant 0 : index
      %21 = vector.load %arg6[%c0_19, %c0_20] : memref<1x256xf32, #tpu.memory_space<vmem>>, vector<1x256xf32>
      %22 = vector.broadcast %21 : vector<1x256xf32> to vector<8x256xf32>
      %23 = arith.addf %20, %22 : vector<8x256xf32>
      %cst_21 = arith.constant dense<0.000000e+00> : vector<8xf32>
      %24 = vector.multi_reduction <add>, %23, %cst_21 [1] : vector<8x256xf32> to vector<8xf32>
      %25 = vector.shape_cast %24 : vector<8xf32> to vector<8x1xf32>
      %cst_22 = arith.constant 2.560000e+02 : f32
      %26 = vector.broadcast %cst_22 : f32 to vector<8x1xf32>
      %27 = arith.divf %25, %26 : vector<8x1xf32>
      %28 = vector.broadcast %27 : vector<8x1xf32> to vector<8x256xf32>
      %29 = arith.subf %23, %28 : vector<8x256xf32>
      %30 = arith.mulf %29, %29 : vector<8x256xf32>
      %cst_23 = arith.constant dense<0.000000e+00> : vector<8xf32>
      %31 = vector.multi_reduction <add>, %30, %cst_23 [1] : vector<8x256xf32> to vector<8xf32>
      %32 = vector.shape_cast %31 : vector<8xf32> to vector<8x1xf32>
      %cst_24 = arith.constant 2.560000e+02 : f32
      %33 = vector.broadcast %cst_24 : f32 to vector<8x1xf32>
      %34 = arith.divf %32, %33 : vector<8x1xf32>
      %cst_25 = arith.constant 9.99999974E-6 : f32
      %35 = vector.broadcast %cst_25 : f32 to vector<8x1xf32>
      %36 = arith.addf %34, %35 : vector<8x1xf32>
      %37 = math.rsqrt %36 : vector<8x1xf32>
      %38 = vector.broadcast %37 : vector<8x1xf32> to vector<8x256xf32>
      %39 = arith.mulf %29, %38 : vector<8x256xf32>
      %c0_26 = arith.constant 0 : index
      %c0_27 = arith.constant 0 : index
      %40 = vector.load %arg7[%c0_26, %c0_27] : memref<1x256xf32, #tpu.memory_space<vmem>>, vector<1x256xf32>
      %41 = vector.broadcast %40 : vector<1x256xf32> to vector<8x256xf32>
      %42 = arith.mulf %39, %41 : vector<8x256xf32>
      %c0_28 = arith.constant 0 : index
      %c0_29 = arith.constant 0 : index
      %43 = vector.load %arg8[%c0_28, %c0_29] : memref<1x256xf32, #tpu.memory_space<vmem>>, vector<1x256xf32>
      %44 = vector.broadcast %43 : vector<1x256xf32> to vector<8x256xf32>
      %45 = arith.addf %42, %44 : vector<8x256xf32>
      %cst_30 = arith.constant 0.000000e+00 : f32
      %46 = vector.broadcast %cst_30 : f32 to vector<8x256xf32>
      %47 = arith.maximumf %45, %46 : vector<8x256xf32>
      %48 = arith.truncf %47 : vector<8x256xf32> to vector<8x256xbf16>
      %c0_31 = arith.constant 0 : index
      %c0_32 = arith.constant 0 : index
      %49 = vector.load %arg9[%c0_31, %c0_32] : memref<256x256xbf16, #tpu.memory_space<vmem>>, vector<256x256xbf16>
      %cst_33 = arith.constant dense<0.000000e+00> : vector<8x256xf32>
      %50 = tpu.matmul %48, %49, %cst_33 {dimension_numbers = #tpu.dot_dimension_numbers<[1], [0], [0], [1], [0, 0, 1, 1], [], []>} : vector<8x256xbf16>, vector<256x256xbf16>, vector<8x256xf32> -> vector<8x256xf32>
      %c0_34 = arith.constant 0 : index
      %c0_35 = arith.constant 0 : index
      %51 = vector.load %arg10[%c0_34, %c0_35] : memref<1x256xf32, #tpu.memory_space<vmem>>, vector<1x256xf32>
      %52 = vector.broadcast %51 : vector<1x256xf32> to vector<8x256xf32>
      %53 = arith.addf %50, %52 : vector<8x256xf32>
      %cst_36 = arith.constant dense<0.000000e+00> : vector<8xf32>
      %54 = vector.multi_reduction <add>, %53, %cst_36 [1] : vector<8x256xf32> to vector<8xf32>
      %55 = vector.shape_cast %54 : vector<8xf32> to vector<8x1xf32>
      %cst_37 = arith.constant 2.560000e+02 : f32
      %56 = vector.broadcast %cst_37 : f32 to vector<8x1xf32>
      %57 = arith.divf %55, %56 : vector<8x1xf32>
      %58 = vector.broadcast %57 : vector<8x1xf32> to vector<8x256xf32>
      %59 = arith.subf %53, %58 : vector<8x256xf32>
      %60 = arith.mulf %59, %59 : vector<8x256xf32>
      %cst_38 = arith.constant dense<0.000000e+00> : vector<8xf32>
      %61 = vector.multi_reduction <add>, %60, %cst_38 [1] : vector<8x256xf32> to vector<8xf32>
      %62 = vector.shape_cast %61 : vector<8xf32> to vector<8x1xf32>
      %cst_39 = arith.constant 2.560000e+02 : f32
      %63 = vector.broadcast %cst_39 : f32 to vector<8x1xf32>
      %64 = arith.divf %62, %63 : vector<8x1xf32>
      %cst_40 = arith.constant 9.99999974E-6 : f32
      %65 = vector.broadcast %cst_40 : f32 to vector<8x1xf32>
      %66 = arith.addf %64, %65 : vector<8x1xf32>
      %67 = math.rsqrt %66 : vector<8x1xf32>
      %68 = vector.broadcast %67 : vector<8x1xf32> to vector<8x256xf32>
      %69 = arith.mulf %59, %68 : vector<8x256xf32>
      %c0_41 = arith.constant 0 : index
      %c0_42 = arith.constant 0 : index
      %70 = vector.load %arg11[%c0_41, %c0_42] : memref<1x256xf32, #tpu.memory_space<vmem>>, vector<1x256xf32>
      %71 = vector.broadcast %70 : vector<1x256xf32> to vector<8x256xf32>
      %72 = arith.mulf %69, %71 : vector<8x256xf32>
      %c0_43 = arith.constant 0 : index
      %c0_44 = arith.constant 0 : index
      %73 = vector.load %arg12[%c0_43, %c0_44] : memref<1x256xf32, #tpu.memory_space<vmem>>, vector<1x256xf32>
      %74 = vector.broadcast %73 : vector<1x256xf32> to vector<8x256xf32>
      %75 = arith.addf %72, %74 : vector<8x256xf32>
      %76 = arith.addf %75, %17 : vector<8x256xf32>
      %cst_45 = arith.constant 0.000000e+00 : f32
      %77 = vector.broadcast %cst_45 : f32 to vector<8x256xf32>
      %78 = arith.maximumf %76, %77 : vector<8x256xf32>
      %79 = arith.truncf %78 : vector<8x256xf32> to vector<8x256xbf16>
      %c0_46 = arith.constant 0 : index
      %c0_47 = arith.constant 0 : index
      %80 = vector.load %arg13[%c0_46, %c0_47] : memref<256x256xbf16, #tpu.memory_space<vmem>>, vector<256x256xbf16>
      %cst_48 = arith.constant dense<0.000000e+00> : vector<8x256xf32>
      %81 = tpu.matmul %79, %80, %cst_48 {dimension_numbers = #tpu.dot_dimension_numbers<[1], [0], [0], [1], [0, 0, 1, 1], [], []>} : vector<8x256xbf16>, vector<256x256xbf16>, vector<8x256xf32> -> vector<8x256xf32>
      %c0_49 = arith.constant 0 : index
      %c0_50 = arith.constant 0 : index
      %82 = vector.load %arg14[%c0_49, %c0_50] : memref<1x256xf32, #tpu.memory_space<vmem>>, vector<1x256xf32>
      %83 = vector.broadcast %82 : vector<1x256xf32> to vector<8x256xf32>
      %84 = arith.addf %81, %83 : vector<8x256xf32>
      %cst_51 = arith.constant dense<0.000000e+00> : vector<8xf32>
      %85 = vector.multi_reduction <add>, %84, %cst_51 [1] : vector<8x256xf32> to vector<8xf32>
      %86 = vector.shape_cast %85 : vector<8xf32> to vector<8x1xf32>
      %cst_52 = arith.constant 2.560000e+02 : f32
      %87 = vector.broadcast %cst_52 : f32 to vector<8x1xf32>
      %88 = arith.divf %86, %87 : vector<8x1xf32>
      %89 = vector.broadcast %88 : vector<8x1xf32> to vector<8x256xf32>
      %90 = arith.subf %84, %89 : vector<8x256xf32>
      %91 = arith.mulf %90, %90 : vector<8x256xf32>
      %cst_53 = arith.constant dense<0.000000e+00> : vector<8xf32>
      %92 = vector.multi_reduction <add>, %91, %cst_53 [1] : vector<8x256xf32> to vector<8xf32>
      %93 = vector.shape_cast %92 : vector<8xf32> to vector<8x1xf32>
      %cst_54 = arith.constant 2.560000e+02 : f32
      %94 = vector.broadcast %cst_54 : f32 to vector<8x1xf32>
      %95 = arith.divf %93, %94 : vector<8x1xf32>
      %cst_55 = arith.constant 9.99999974E-6 : f32
      %96 = vector.broadcast %cst_55 : f32 to vector<8x1xf32>
      %97 = arith.addf %95, %96 : vector<8x1xf32>
      %98 = math.rsqrt %97 : vector<8x1xf32>
      %99 = vector.broadcast %98 : vector<8x1xf32> to vector<8x256xf32>
      %100 = arith.mulf %90, %99 : vector<8x256xf32>
      %c0_56 = arith.constant 0 : index
      %c0_57 = arith.constant 0 : index
      %101 = vector.load %arg15[%c0_56, %c0_57] : memref<1x256xf32, #tpu.memory_space<vmem>>, vector<1x256xf32>
      %102 = vector.broadcast %101 : vector<1x256xf32> to vector<8x256xf32>
      %103 = arith.mulf %100, %102 : vector<8x256xf32>
      %c0_58 = arith.constant 0 : index
      %c0_59 = arith.constant 0 : index
      %104 = vector.load %arg16[%c0_58, %c0_59] : memref<1x256xf32, #tpu.memory_space<vmem>>, vector<1x256xf32>
      %105 = vector.broadcast %104 : vector<1x256xf32> to vector<8x256xf32>
      %106 = arith.addf %103, %105 : vector<8x256xf32>
      %cst_60 = arith.constant 0.000000e+00 : f32
      %107 = vector.broadcast %cst_60 : f32 to vector<8x256xf32>
      %108 = arith.maximumf %106, %107 : vector<8x256xf32>
      %109 = arith.truncf %108 : vector<8x256xf32> to vector<8x256xbf16>
      %c0_61 = arith.constant 0 : index
      %c0_62 = arith.constant 0 : index
      %110 = vector.load %arg17[%c0_61, %c0_62] : memref<256x256xbf16, #tpu.memory_space<vmem>>, vector<256x256xbf16>
      %cst_63 = arith.constant dense<0.000000e+00> : vector<8x256xf32>
      %111 = tpu.matmul %109, %110, %cst_63 {dimension_numbers = #tpu.dot_dimension_numbers<[1], [0], [0], [1], [0, 0, 1, 1], [], []>} : vector<8x256xbf16>, vector<256x256xbf16>, vector<8x256xf32> -> vector<8x256xf32>
      %c0_64 = arith.constant 0 : index
      %c0_65 = arith.constant 0 : index
      %112 = vector.load %arg18[%c0_64, %c0_65] : memref<1x256xf32, #tpu.memory_space<vmem>>, vector<1x256xf32>
      %113 = vector.broadcast %112 : vector<1x256xf32> to vector<8x256xf32>
      %114 = arith.addf %111, %113 : vector<8x256xf32>
      %cst_66 = arith.constant dense<0.000000e+00> : vector<8xf32>
      %115 = vector.multi_reduction <add>, %114, %cst_66 [1] : vector<8x256xf32> to vector<8xf32>
      %116 = vector.shape_cast %115 : vector<8xf32> to vector<8x1xf32>
      %cst_67 = arith.constant 2.560000e+02 : f32
      %117 = vector.broadcast %cst_67 : f32 to vector<8x1xf32>
      %118 = arith.divf %116, %117 : vector<8x1xf32>
      %119 = vector.broadcast %118 : vector<8x1xf32> to vector<8x256xf32>
      %120 = arith.subf %114, %119 : vector<8x256xf32>
      %121 = arith.mulf %120, %120 : vector<8x256xf32>
      %cst_68 = arith.constant dense<0.000000e+00> : vector<8xf32>
      %122 = vector.multi_reduction <add>, %121, %cst_68 [1] : vector<8x256xf32> to vector<8xf32>
      %123 = vector.shape_cast %122 : vector<8xf32> to vector<8x1xf32>
      %cst_69 = arith.constant 2.560000e+02 : f32
      %124 = vector.broadcast %cst_69 : f32 to vector<8x1xf32>
      %125 = arith.divf %123, %124 : vector<8x1xf32>
      %cst_70 = arith.constant 9.99999974E-6 : f32
      %126 = vector.broadcast %cst_70 : f32 to vector<8x1xf32>
      %127 = arith.addf %125, %126 : vector<8x1xf32>
      %128 = math.rsqrt %127 : vector<8x1xf32>
      %129 = vector.broadcast %128 : vector<8x1xf32> to vector<8x256xf32>
      %130 = arith.mulf %120, %129 : vector<8x256xf32>
      %c0_71 = arith.constant 0 : index
      %c0_72 = arith.constant 0 : index
      %131 = vector.load %arg19[%c0_71, %c0_72] : memref<1x256xf32, #tpu.memory_space<vmem>>, vector<1x256xf32>
      %132 = vector.broadcast %131 : vector<1x256xf32> to vector<8x256xf32>
      %133 = arith.mulf %130, %132 : vector<8x256xf32>
      %c0_73 = arith.constant 0 : index
      %c0_74 = arith.constant 0 : index
      %134 = vector.load %arg20[%c0_73, %c0_74] : memref<1x256xf32, #tpu.memory_space<vmem>>, vector<1x256xf32>
      %135 = vector.broadcast %134 : vector<1x256xf32> to vector<8x256xf32>
      %136 = arith.addf %133, %135 : vector<8x256xf32>
      %137 = arith.addf %136, %78 : vector<8x256xf32>
      %cst_75 = arith.constant 0.000000e+00 : f32
      %138 = vector.broadcast %cst_75 : f32 to vector<8x256xf32>
      %139 = arith.maximumf %137, %138 : vector<8x256xf32>
      %140 = arith.truncf %139 : vector<8x256xf32> to vector<8x256xbf16>
      %c0_76 = arith.constant 0 : index
      %c0_77 = arith.constant 0 : index
      %141 = vector.load %arg24[%c0_76, %c0_77] : memref<8x256xbf16, #tpu.memory_space<vmem>>, vector<8x256xbf16>
      tpu.vector_store %arg24[%c0_76, %c0_77], %140 {strides = array<i32>} : memref<8x256xbf16, #tpu.memory_space<vmem>>, vector<8x256xbf16>,
    } else {
    }
    %c0 = arith.constant 0 : index
    %c0_1 = arith.constant 0 : index
    %3 = vector.load %arg24[%c0, %c0_1] : memref<8x256xbf16, #tpu.memory_space<vmem>>, vector<8x256xbf16>
    %c0_2 = arith.constant 0 : index
    %c0_3 = arith.constant 0 : index
    %4 = vector.load %arg21[%c0_2, %c0_3] : memref<256x1024xbf16, #tpu.memory_space<vmem>>, vector<256x1024xbf16>
    %cst = arith.constant dense<0.000000e+00> : vector<8x1024xf32>
    %5 = tpu.matmul %3, %4, %cst {dimension_numbers = #tpu.dot_dimension_numbers<[1], [0], [0], [1], [0, 0, 1, 1], [], []>} : vector<8x256xbf16>, vector<256x1024xbf16>, vector<8x1024xf32> -> vector<8x1024xf32>
    %c0_4 = arith.constant 0 : index
    %c0_5 = arith.constant 0 : index
    %6 = vector.load %arg22[%c0_4, %c0_5] : memref<1x1024xf32, #tpu.memory_space<vmem>>, vector<1x1024xf32>
    %7 = vector.broadcast %6 : vector<1x1024xf32> to vector<8x1024xf32>
    %8 = arith.addf %5, %7 : vector<8x1024xf32>
    %c0_6 = arith.constant 0 : index
    %c0_7 = arith.constant 0 : index
    %9 = vector.load %arg23[%c0_6, %c0_7] : memref<8x1024xf32, #tpu.memory_space<vmem>>, vector<8x1024xf32>
    tpu.vector_store %arg23[%c0_6, %c0_7], %8 {strides = array<i32>} : memref<8x1024xf32, #tpu.memory_space<vmem>>, vector<8x1024xf32>,
    return
  }
  func.func @transform_0(%arg0: i32, %arg1: i32) -> (i32, i32) {
    %c0_i32 = arith.constant 0 : i32
    %c0_i32_0 = arith.constant 0 : i32
    %c0_i32_1 = arith.constant 0 : i32
    return %c0_i32, %c0_i32_0 : i32, i32
  }
  func.func @transform_1(%arg0: i32, %arg1: i32) -> (i32, i32) {
    %c0_i32 = arith.constant 0 : i32
    %c0_i32_0 = arith.constant 0 : i32
    %c0_i32_1 = arith.constant 0 : i32
    return %c0_i32, %c0_i32_0 : i32, i32
  }
  func.func @transform_2(%arg0: i32, %arg1: i32) -> (i32, i32) {
    %c0_i32 = arith.constant 0 : i32
    %c0_i32_0 = arith.constant 0 : i32
    %c0_i32_1 = arith.constant 0 : i32
    return %c0_i32, %c0_i32_0 : i32, i32
  }
  func.func @transform_3(%arg0: i32, %arg1: i32) -> (i32, i32) {
    %c0_i32 = arith.constant 0 : i32
    %c0_i32_0 = arith.constant 0 : i32
    %c0_i32_1 = arith.constant 0 : i32
    return %c0_i32, %c0_i32_0 : i32, i32
  }
  func.func @transform_4(%arg0: i32, %arg1: i32) -> (i32, i32) {
    %c0_i32 = arith.constant 0 : i32
    %c0_i32_0 = arith.constant 0 : i32
    %c0_i32_1 = arith.constant 0 : i32
    return %c0_i32, %c0_i32_0 : i32, i32
  }
  func.func @transform_5(%arg0: i32, %arg1: i32) -> (i32, i32) {
    %c0_i32 = arith.constant 0 : i32
    %c0_i32_0 = arith.constant 0 : i32
    %c0_i32_1 = arith.constant 0 : i32
    return %c0_i32, %c0_i32_0 : i32, i32
  }
  func.func @transform_6(%arg0: i32, %arg1: i32) -> (i32, i32) {
    %c0_i32 = arith.constant 0 : i32
    %c0_i32_0 = arith.constant 0 : i32
    %c0_i32_1 = arith.constant 0 : i32
    return %c0_i32, %c0_i32_0 : i32, i32
  }
  func.func @transform_7(%arg0: i32, %arg1: i32) -> (i32, i32) {
    %c0_i32 = arith.constant 0 : i32
    %c0_i32_0 = arith.constant 0 : i32
    %c0_i32_1 = arith.constant 0 : i32
    return %c0_i32, %c0_i32_0 : i32, i32
  }
  func.func @transform_8(%arg0: i32, %arg1: i32) -> (i32, i32) {
    %c0_i32 = arith.constant 0 : i32
    %c0_i32_0 = arith.constant 0 : i32
    %c0_i32_1 = arith.constant 0 : i32
    return %c0_i32, %c0_i32_0 : i32, i32
  }
  func.func @transform_9(%arg0: i32, %arg1: i32) -> (i32, i32) {
    %c0_i32 = arith.constant 0 : i32
    %c0_i32_0 = arith.constant 0 : i32
    %c0_i32_1 = arith.constant 0 : i32
    return %c0_i32, %c0_i32_0 : i32, i32
  }
  func.func @transform_10(%arg0: i32, %arg1: i32) -> (i32, i32) {
    %c0_i32 = arith.constant 0 : i32
    %c0_i32_0 = arith.constant 0 : i32
    %c0_i32_1 = arith.constant 0 : i32
    return %c0_i32, %c0_i32_0 : i32, i32
  }
  func.func @transform_11(%arg0: i32, %arg1: i32) -> (i32, i32) {
    %c0_i32 = arith.constant 0 : i32
    %c0_i32_0 = arith.constant 0 : i32
    %c0_i32_1 = arith.constant 0 : i32
    return %c0_i32, %c0_i32_0 : i32, i32
  }
  func.func @transform_12(%arg0: i32, %arg1: i32) -> (i32, i32) {
    %c0_i32 = arith.constant 0 : i32
    %c0_i32_0 = arith.constant 0 : i32
    %c0_i32_1 = arith.constant 0 : i32
    return %c0_i32, %c0_i32_0 : i32, i32
  }
  func.func @transform_13(%arg0: i32, %arg1: i32) -> (i32, i32) {
    %c0_i32 = arith.constant 0 : i32
    %c0_i32_0 = arith.constant 0 : i32
    %c0_i32_1 = arith.constant 0 : i32
    return %c0_i32, %c0_i32_0 : i32, i32
  }
  func.func @transform_14(%arg0: i32, %arg1: i32) -> (i32, i32) {
    %c0_i32 = arith.constant 0 : i32
    %c0_i32_0 = arith.constant 0 : i32
    %c0_i32_1 = arith.constant 0 : i32
    return %c0_i32, %c0_i32_0 : i32, i32
  }
  func.func @transform_15(%arg0: i32, %arg1: i32) -> (i32, i32) {
    %c0_i32 = arith.constant 0 : i32
    %c0_i32_0 = arith.constant 0 : i32
    %c0_i32_1 = arith.constant 0 : i32
    return %c0_i32, %c0_i32_0 : i32, i32
  }
  func.func @transform_16(%arg0: i32, %arg1: i32) -> (i32, i32) {
    %c0_i32 = arith.constant 0 : i32
    %c0_i32_0 = arith.constant 0 : i32
    %c0_i32_1 = arith.constant 0 : i32
    return %c0_i32, %c0_i32_0 : i32, i32
  }
  func.func @transform_17(%arg0: i32, %arg1: i32) -> (i32, i32) {
    %c0_i32 = arith.constant 0 : i32
    %c0_i32_0 = arith.constant 0 : i32
    %c0_i32_1 = arith.constant 0 : i32
    return %c0_i32, %c0_i32_0 : i32, i32
  }
  func.func @transform_18(%arg0: i32, %arg1: i32) -> (i32, i32) {
    %c0_i32 = arith.constant 0 : i32
    %c0_i32_0 = arith.constant 0 : i32
    %c0_i32_1 = arith.constant 0 : i32
    return %c0_i32, %c0_i32_0 : i32, i32
  }
  func.func @transform_19(%arg0: i32, %arg1: i32) -> (i32, i32) {
    %c2_i32 = arith.constant 2 : i32
    %0 = arith.muli %arg0, %c2_i32 : i32
    %1 = arith.addi %0, %arg1 : i32
    %c0_i32 = arith.constant 0 : i32
    %c0_i32_0 = arith.constant 0 : i32
    return %c0_i32, %1 : i32, i32
  }
  func.func @transform_20(%arg0: i32, %arg1: i32) -> (i32, i32) {
    %c2_i32 = arith.constant 2 : i32
    %0 = arith.muli %arg0, %c2_i32 : i32
    %1 = arith.addi %0, %arg1 : i32
    %c0_i32 = arith.constant 0 : i32
    %c0_i32_0 = arith.constant 0 : i32
    return %c0_i32, %1 : i32, i32
  }
  func.func @transform_21(%arg0: i32, %arg1: i32) -> (i32, i32) {
    %c2_i32 = arith.constant 2 : i32
    %0 = arith.muli %arg0, %c2_i32 : i32
    %1 = arith.addi %0, %arg1 : i32
    %c0_i32 = arith.constant 0 : i32
    %c0_i32_0 = arith.constant 0 : i32
    return %c0_i32, %1 : i32, i32
  }
}

</mosaic_0001>

<bundles_post_ra>
// kernel: tpu_custom_call.1
= control target key start
LH: loop header
LB: loop body
LE: loop exit
PB: predicated region body
PF: predicated region fallthrough
CT: control target
= control target key end

     0   :  { %s6929_s0 = inlined_call_operand.hbm [shape: bf16[8,64], index: 0, kind: input, shape index: {}]   ;;  %s6930_s1 = inlined_call_operand.hbm [shape: bf16[64,256], index: 1, kind: input, shape index: {}]   ;;  %s6931_s2 = inlined_call_operand.hbm [shape: f32[1,256], index: 2, kind: input, shape index: {}]   ;;  %s6932_s3 = inlined_call_operand.hbm [shape: bf16[256,256], index: 3, kind: input, shape index: {}]   ;;  %s6933_s4 = inlined_call_operand.hbm [shape: f32[1,256], index: 4, kind: input, shape index: {}]   ;;  %s6934_s5 = inlined_call_operand.hbm [shape: f32[1,256], index: 5, kind: input, shape index: {}]   ;;  %s6935_s6 = inlined_call_operand.hbm [shape: f32[1,256], index: 6, kind: input, shape index: {}]   ;;  %s6936_s7 = inlined_call_operand.hbm [shape: bf16[256,256], index: 7, kind: input, shape index: {}]   ;;  %s6937_s8 = inlined_call_operand.hbm [shape: f32[1,256], index: 8, kind: input, shape index: {}]   ;;  %s6938_s9 = inlined_call_operand.hbm [shape: f32[1,256], index: 9, kind: input, shape index: {}]   ;;  %s6939_s10 = inlined_call_operand.hbm [shape: f32[1,256], index: 10, kind: input, shape index: {}]   ;;  %s6940_s11 = inlined_call_operand.hbm [shape: bf16[256,256], index: 11, kind: input, shape index: {}]   ;;  %s6941_s12 = inlined_call_operand.hbm [shape: f32[1,256], index: 12, kind: input, shape index: {}]   ;;  %s6942_s13 = inlined_call_operand.hbm [shape: f32[1,256], index: 13, kind: input, shape index: {}]   ;;  %s6943_s14 = inlined_call_operand.hbm [shape: f32[1,256], index: 14, kind: input, shape index: {}]   ;;  %s6944_s15 = inlined_call_operand.hbm [shape: bf16[256,256], index: 15, kind: input, shape index: {}]   ;;  %s6945_s16 = inlined_call_operand.hbm [shape: f32[1,256], index: 16, kind: input, shape index: {}]   ;;  %s6946_s17 = inlined_call_operand.hbm [shape: f32[1,256], index: 17, kind: input, shape index: {}]   ;;  %s6947_s18 = inlined_call_operand.hbm [shape: f32[1,256], index: 18, kind: input, shape index: {}]   ;;  %s6948_s19 = inlined_call_operand.hbm [shape: bf16[256,4096], index: 19, kind: input, shape index: {}]   ;;  %s6949_s20 = inlined_call_operand.hbm [shape: f32[1,4096], index: 20, kind: input, shape index: {}]   ;;  %s6950_s21 = inlined_call_operand.hbm [shape: f32[8,4096], index: 21, kind: output, shape index: {}]  }
   0x1   :  { %6958 = sst [smem:[#allocation57_spill]] %s6929_s0 }
   0x2   :  { %6959 = sst [smem:[#allocation58_spill]] %s6930_s1 }
   0x3   :  { %6960 = sst [smem:[#allocation59_spill]] %s6931_s2 }
   0x4   :  { %6961 = sst [smem:[#allocation60_spill]] %s6932_s3 }
   0x5   :  { %6962 = sst [smem:[#allocation61_spill]] %s6933_s4 }
   0x6   :  { %6963 = sst [smem:[#allocation62_spill]] %s6934_s5 }
   0x7   :  { %6964 = sst [smem:[#allocation63_spill]] %s6936_s7 }
   0x8   :  { %6965 = sst [smem:[#allocation64_spill]] %s6937_s8 }
   0x9   :  { %6966 = sst [smem:[#allocation65_spill]] %s6938_s9 }
   0xa   :  { %6967 = sst [smem:[#allocation66_spill]] %s6939_s10 }
   0xb   :  { %6968 = sst [smem:[#allocation67_spill]] %s6940_s11 }
   0xc   :  { %6969 = sst [smem:[#allocation68_spill]] %s6941_s12 }
   0xd   :  { %6970 = sst [smem:[#allocation69_spill]] %s6942_s13 }
   0xe   :  { %6971 = sst [smem:[#allocation70_spill]] %s6943_s14 }
   0xf   :  { %6972 = sst [smem:[#allocation71_spill]] %s6944_s15 }
  0x10   :  { %6973 = sst [smem:[#allocation72_spill]] %s6945_s16 }
  0x11   :  { %6974 = sst [smem:[#allocation73_spill]] %s6946_s17 }
  0x12   :  { %6975 = sst [smem:[#allocation74_spill]] %s6947_s18 }
  0x13   :  { %6976 = sst [smem:[#allocation75_spill]] %s6948_s19 }
  0x14   :  { %6977 = sst [smem:[#allocation76_spill]] %s6949_s20 }
  0x15   :  { %6978 = sst [smem:[#allocation77_spill]] %s6950_s21 }
  0x16   :  { %26 = vsyncpa [#allocation4], 0 }
  0x17   :  { %27 = vsyncpa [#allocation7], 0 }
  0x18   :  { %28 = vsyncpa [#allocation10], 0 }
  0x19   :  { %29 = vsyncpa [#allocation13], 0 }
  0x1a   :  { %30 = vsyncpa [#allocation16], 0 }
  0x1b   :  { %31 = vsyncpa [#allocation19], 0 }
  0x1c   :  { %32 = vsyncpa [#allocation22], 0 }
  0x1d   :  { %33 = vsyncpa [#allocation25], 0 }
  0x1e   :  { %34 = vsyncpa [#allocation28], 0 }
  0x1f   :  { %35 = vsyncpa [#allocation31], 0 }
  0x20   :  { %36 = vsyncpa [#allocation34], 0 }
  0x21   :  { %38 = vsyncpa [#allocation34 + $0x1], 0 }
  0x22   :  { %39 = vsyncpa [#allocation5], 0 }
  0x23   :  { %41 = vsyncpa [#allocation5 + $0x1], 0  ;;  %s6225_s2 = smov 0   ;;  %s6227_s25 = smov 0  }
  0x24   :  { %s6229_s26 = smov 0   ;;  %s6231_s27 = smov 0  }
  0x25   :  { %s6233_s3 = smov 0   ;;  %s6235_s28 = smov 0  }
  0x26   :  { %s6237_s29 = smov 0   ;;  %s6239_s0 = smov 0  }
  0x27 LB: > { %6979 = sst [smem:[#allocation49_spill]] %s6072_s27  ;;  %s6269_s23 = sadd.s32 4294967295, %s6088_s0   ;;  %s6088_s0 = sphi %s6239_s0, %s47_s0   ;;  %s6084_s29 = sphi %s6237_s29, %s7024_s29   ;;  %s6080_s28 = sphi %s6235_s28, %s7029_s28   ;;  %s6076_s3 = sphi %s6233_s3, %s7028_s3   ;;  %s6072_s27 = sphi %s6231_s27, %s7021_s27   ;;  %s6068_s26 = sphi %s6229_s26, %s7027_s26   ;;  %s6064_s25 = sphi %s6227_s25, %s7026_s25   ;;  %s6060_s2 = sphi %s6225_s2, %s7025_s2  }
  0x28   : > { %6980 = sst [smem:[#allocation50_spill]] %s6076_s3  ;;  %p3648_p0 = scmp.ge.s32.totalorder %s6088_s0, 1 }
  0x29   : > { %6981 = sst [smem:[#allocation51_spill]] %s6080_s28  ;;  %p483_p1 = scmp.eq.s32.totalorder %s6269_s23, 0 }
  0x2a   : > { %6982 = sst [smem:[#allocation52_spill]] %s6084_s29  ;;  %p553_p2 = scmp.lt.s32.totalorder %s6088_s0, 5 }
  0x2b   : > { %s6983_s5 = sld [smem:[#allocation58_spill]]  ;;  %s6090_s24 = smov [#allocation6]  }
  0x2c   : > { %p6274_p3 = pnand %p3648_p0, %p553_p2  ;;  %s578_s21 = sshll.u32 %s6090_s24, 4  ;;  %s579_s21 = int_to_ptr.vmem [resolvable:$true] %s578_s21 }
  0x2d   : > { %s6988_s16 = sld [smem:[#allocation62_spill]]  ;;  %s6091_s14 = smov [#allocation9]  }
  0x2e   : > { %s6984_s1 = scalar_select %p6274_p3, 1, 0 }
  0x2f   : > { %p5112_p4 = pneg %p6274_p3  ;;  %s6092_s12 = smov 128  }
  0x30   : > { %6985 = sst [smem:[#allocation53_spill]] %s6984_s1  ;;  %s604_s1 = sshll.u32 %s6091_s14, 4  ;;  %s605_s1 = int_to_ptr.vmem [resolvable:$true] %s604_s1 }
  0x31   : > { %s576_s22 = sshll.u32 %s6983_s5, 4  ;;  %s6986_s5 = sld [smem:[#allocation60_spill]]  ;;  %s577_s22 = int_to_ptr.hbm [resolvable:$true] %s576_s22 }
  0x32   : > { %p6285_p5 = pnand %p5112_p4, %p483_p1  ;;  %s6093_s10 = smov 8  }
  0x33   : > { %s629_s24 = sshll.u32 %s6988_s16, 4  ;;  %s6989_s7 = sld [smem:[#allocation63_spill]]  ;;  %s630_s24 = int_to_ptr.hbm [resolvable:$true] %s629_s24 }
  0x34   : > { %5118 = dma.hbm_to_vmem [thread:$0]  (!%p6285_p5), %s577_s22, 1024, %s579_s21, [#allocation7], %s6092_s12, %s6092_s12, %s6093_s10  }
  0x35   : > { %s6094_s14 = smov [#allocation12]   ;;  %s6095_s30 = smov [#allocation15]  }
  0x36   : > { %s631_s20 = sshll.u32 %s6094_s14, 4  ;;  %s654_s21 = sshll.u32 %s6095_s30, 4  ;;  %s632_s20 = int_to_ptr.vmem [resolvable:$true] %s631_s20  ;;  %s655_s21 = int_to_ptr.vmem [resolvable:$true] %s654_s21 }
  0x37   : > { %s602_s3 = sshll.u32 %s6986_s5, 4  ;;  %s6990_s9 = sld [smem:[#allocation65_spill]]  ;;  %s603_s3 = int_to_ptr.hbm [resolvable:$true] %s602_s3 }
  0x38   : > { %5124 = dma.hbm_to_vmem [thread:$0]  (!%p6285_p5), %s603_s3, 4096, %s605_s1, [#allocation10], %s6092_s12, %s6092_s12, %s6093_s10  }
  0x39   : > { %s652_s16 = sshll.u32 %s6989_s7, 4  ;;  %s6991_s11 = sld [smem:[#allocation67_spill]]  ;;  %s653_s16 = int_to_ptr.hbm [resolvable:$true] %s652_s16 }
  0x3a   : > { %5130 = dma.hbm_to_vmem [thread:$0]  (!%p6285_p5), %s630_s24, 32, %s632_s20, [#allocation13]  }
  0x3b   : > { %5136 = dma.hbm_to_vmem [thread:$0]  (!%p6285_p5), %s653_s16, 4096, %s655_s21, [#allocation16], %s6092_s12, %s6092_s12, %s6093_s10  }
  0x3c   : > { %s6096_s18 = smov [#allocation18]   ;;  %s6097_s14 = smov [#allocation21]  }
  0x3d   : > { %s679_s8 = sshll.u32 %s6990_s9, 4  ;;  %s681_s24 = sshll.u32 %s6096_s18, 4  ;;  %s680_s8 = int_to_ptr.hbm [resolvable:$true] %s679_s8  ;;  %s682_s24 = int_to_ptr.vmem [resolvable:$true] %s681_s24 }
  0x3e   : > { %5142 = dma.hbm_to_vmem [thread:$0]  (!%p6285_p5), %s680_s8, 32, %s682_s24, [#allocation19]  }
  0x3f   : > { %s702_s4 = sshll.u32 %s6991_s11, 4  ;;  %s704_s20 = sshll.u32 %s6097_s14, 4  ;;  %s703_s4 = int_to_ptr.hbm [resolvable:$true] %s702_s4  ;;  %s705_s20 = int_to_ptr.vmem [resolvable:$true] %s704_s20 }
  0x40   : > { %s6992_s13 = sld [smem:[#allocation69_spill]]  ;;  %s6098_s8 = smov [#allocation24]  }
  0x41   : > { %5148 = dma.hbm_to_vmem [thread:$0]  (!%p6285_p5), %s703_s4, 4096, %s705_s20, [#allocation22], %s6092_s12, %s6092_s12, %s6093_s10  }
  0x42   : > { %s6993_s15 = sld [smem:[#allocation71_spill]]  ;;  %s731_s1 = sshll.u32 %s6098_s8, 4  ;;  %s732_s1 = int_to_ptr.vmem [resolvable:$true] %s731_s1 }
  0x43   : > { %s6099_s18 = smov [#allocation27]   ;;  %s6994_s17 = sld [smem:[#allocation73_spill]] }
  0x44   : > { %s754_s24 = sshll.u32 %s6099_s18, 4  ;;  %s6100_s30 = smov [#allocation30]   ;;  %s755_s24 = int_to_ptr.vmem [resolvable:$true] %s754_s24 }
  0x45   : > { %s781_s22 = sshll.u32 %s6100_s30, 4  ;;  %s56_s16 = sadd.s32 1, %s6080_s28  ;;  %s782_s22 = int_to_ptr.vmem [resolvable:$true] %s781_s22 }
  0x46   : > { %s729_s5 = sshll.u32 %s6992_s13, 4  ;;  %s59_s21 = sadd.s32 1, %s6084_s29  ;;  %s730_s5 = int_to_ptr.hbm [resolvable:$true] %s729_s5 }
  0x47   : > { %5154 = dma.hbm_to_vmem [thread:$0]  (!%p6285_p5), %s730_s5, 32, %s732_s1, [#allocation25]  }
  0x48   : > { %s752_s3 = sshll.u32 %s6993_s15, 4  ;;  %s3641_s5 = sadd.s32 4294967294, %s6088_s0   ;;  %s753_s3 = int_to_ptr.hbm [resolvable:$true] %s752_s3 }
  0x49   : > { %s779_s20 = sshll.u32 %s6994_s17, 4  ;;  %p57_p6 = scmp.ge.s32.totalorder %s56_s16, 2  ;;  %s780_s20 = int_to_ptr.hbm [resolvable:$true] %s779_s20 }
  0x4a   : > { %5160 = dma.hbm_to_vmem [thread:$0]  (!%p6285_p5), %s753_s3, 4096, %s755_s24, [#allocation28], %s6092_s12, %s6092_s12, %s6093_s10  }
  0x4b   : > { %5166 = dma.hbm_to_vmem [thread:$0]  (!%p6285_p5), %s780_s20, 32, %s782_s22, [#allocation31]  }
  0x4c   : > { %s3642_s8 = sshll.u32 %s6084_s29, 1  ;;  %s469_s18 = sadd.s32 1, %s6068_s26 }
  0x4d   : > { %s6348_s1 = sadd.s32 %s6080_s28, %s3642_s8  ;;  %s7031_s16 = smov (%p57_p6, %s56_s16), 0 }
  0x4e   : > { %6995 = sst [smem:[#allocation54_spill]] %s7031_s16  ;;  %s7033_s21 = smov (!%p57_p6, %s59_s21), %s6084_s29 }
  0x4f   : > { %p476_p7 = scmp.ne.s32.totalorder %s6068_s26, %s6064_s25  ;;  %p477_p8 = scmp.eq.s32.totalorder %s6088_s0, 0 }
  0x50   : > { %p61_p9 = scmp.ge.s32.totalorder %s7033_s21, 2  ;;  %p482_p10 = scmp.ne.s32.totalorder %s6064_s25, %s6060_s2 }
  0x51   : > { %p6359_p11 = por %p477_p8, %p476_p7  ;;  %p540_p12 = scmp.eq.s32.totalorder %s6269_s23, 3 }
  0x52   : > { %s7035_s21 = smov (%p61_p9, %s7033_s21), 0  ;;  %p6368_p13 = por %p483_p1, %p482_p10 }
  0x53   : > { %6997 = sst [smem:[#allocation55_spill]] %s7035_s21  ;;  %p6372_p0 = por %p540_p12, %p476_p7 }
  0x54   : > { %s3643_s24 = sshll.u32 %s7035_s21, 1  ;;  %p546_p2 = scmp.eq.s32.totalorder %s3641_s5, 3 }
  0x55   : > { %s465_s4 = sadd.s32 %s3643_s24, %s7031_s16  ;;  %p5200_p4 = scmp.lt.s32.totalorder %s6088_s0, 4 }
  0x56   : > { %s466_s14 = ssub.s32 %s6348_s1, %s465_s4  ;;  %p6380_p6 = por %p546_p2, %p482_p10 }
  0x57   : > { %p467_p8 = scmp.eq.s32.totalorder %s466_s14, 0  ;;  %s804_s30 = sand.u32 1, %s6088_s0  }
  0x58   : > { %s6953_s22 = sand.u32 1, %s6068_s26   ;;  %s4764_s9 = sshll.u32 %s6348_s1, 5 }
  0x59   : > { %s6387_s8 = scalar_select %p467_p8, %s6068_s26, %s469_s18  }
  0x5a   : > { %s3669_s7 = sshll.u32 %s6953_s22, 10  ;;  %s7002_s19 = sld [smem:[#allocation75_spill]] }
  0x5b   : > { %7001 = sst [smem:[#allocation56_spill]] %s6387_s8  ;;  %s808_s15 = scalar_lea.vmem [#allocation33], %s3669_s7 }
  0x5c   : > { %s818_s17 = sshll.u32 %s808_s15, 4  ;;  %p6399_p7 = pnand %p5200_p4, %p6359_p11  ;;  %s819_s17 = int_to_ptr.vmem [resolvable:$true] %s818_s17 }
  0x5d   : > { %s6403_s18 = scalar_lea.sflag [#allocation34], %s804_s30  ;;  %s6101_s14 = smov 2048  }
  0x5e   : > { %s6102_s22 = smov 512   ;;  %s7004_s13 = sld [smem:[#allocation57_spill]] }
  0x5f   : > { %s6104_s10 = smov [#allocation3]   ;;  %s7005_s16 = sld [smem:[#allocation59_spill]] }
  0x60   : > { %s815_s5 = scalar_lea.hbm %s7002_s19, %s4764_s9  ;;  %s6103_s9 = smov 32  }
  0x61   : > { %s816_s24 = sshll.u32 %s815_s5, 4  ;;  %s567_s5 = sshll.u32 %s6104_s10, 4  ;;  %s817_s24 = int_to_ptr.hbm [resolvable:$true] %s816_s24  ;;  %s568_s5 = int_to_ptr.vmem [resolvable:$true] %s567_s5 }
  0x62   : > { %5173 = dma.hbm_to_vmem [thread:$0]  (!%p6399_p7), %s817_s24, 16384, %s819_s17, %s6403_s18, %s6101_s14, %s6102_s22, %s6103_s9  }
  0x63   : > { %s7006_s8 = sld [smem:[#allocation61_spill]]  ;;  %s6105_s22 = smov [#allocation8]  }
  0x64   : > { %s565_s15 = sshll.u32 %s7004_s13, 4  ;;  %s593_s24 = sshll.u32 %s6105_s22, 4  ;;  %s566_s15 = int_to_ptr.hbm [resolvable:$true] %s565_s15  ;;  %s594_s24 = int_to_ptr.vmem [resolvable:$true] %s593_s24 }
  0x65   : > { %s591_s30 = sshll.u32 %s7005_s16, 4  ;;  %s6106_s14 = smov [#allocation11]   ;;  %s592_s30 = int_to_ptr.hbm [resolvable:$true] %s591_s30 }
  0x66   : > { %5115 = dma.hbm_to_vmem [thread:$0]  (!%p6285_p5), %s566_s15, 64, %s568_s5, [#allocation4]  }
  0x67   : > { %5121 = dma.hbm_to_vmem [thread:$0]  (!%p6285_p5), %s592_s30, 32, %s594_s24, [#allocation7]  }
  0x68   : > { %s619_s9 = sshll.u32 %s6106_s14, 4  ;;  %s641_s16 = sshll.u32 %s6935_s6, 4  ;;  %s620_s9 = int_to_ptr.vmem [resolvable:$true] %s619_s9  ;;  %s642_s16 = int_to_ptr.hbm [resolvable:$true] %s641_s16 }
  0x69   : > { %s617_s17 = sshll.u32 %s7006_s8, 4  ;;  %s7007_s8 = sld [smem:[#allocation64_spill]]  ;;  %s618_s17 = int_to_ptr.hbm [resolvable:$true] %s617_s17 }
  0x6a   : > { %5127 = dma.hbm_to_vmem [thread:$0]  (!%p6285_p5), %s618_s17, 32, %s620_s9, [#allocation10]  }
  0x6b   : > { %s6107_s11 = smov [#allocation14]   ;;  %s6108_s15 = smov [#allocation17]  }
  0x6c   : > { %s643_s13 = sshll.u32 %s6107_s11, 4  ;;  %s669_s10 = sshll.u32 %s6108_s15, 4  ;;  %s644_s13 = int_to_ptr.vmem [resolvable:$true] %s643_s13  ;;  %s670_s10 = int_to_ptr.vmem [resolvable:$true] %s669_s10 }
  0x6d   : > { %5133 = dma.hbm_to_vmem [thread:$0]  (!%p6285_p5), %s642_s16, 32, %s644_s13, [#allocation13]  }
  0x6e   : > { %s7008_s22 = sld [smem:[#allocation66_spill]]  ;;  %s6109_s21 = smov [#allocation20]  }
  0x6f   : > { %s667_s7 = sshll.u32 %s7007_s8, 4  ;;  %s7009_s9 = sld [smem:[#allocation68_spill]]  ;;  %s668_s7 = int_to_ptr.hbm [resolvable:$true] %s667_s7 }
  0x70   : > { %5139 = dma.hbm_to_vmem [thread:$0]  (!%p6285_p5), %s668_s7, 32, %s670_s10, [#allocation16]  }
  0x71   : > { %s693_s28 = sshll.u32 %s6109_s21, 4  ;;  %s6110_s16 = smov [#allocation23]   ;;  %s694_s28 = int_to_ptr.vmem [resolvable:$true] %s693_s28 }
  0x72   : > { %s719_s29 = sshll.u32 %s6110_s16, 4  ;;  %s7010_s13 = sld [smem:[#allocation70_spill]]  ;;  %s720_s29 = int_to_ptr.vmem [resolvable:$true] %s719_s29 }
  0x73   : > { %s7011_s5 = sld [smem:[#allocation72_spill]]  ;;  %s6112_s17 = smov [#allocation29]  }
  0x74   : > { %s691_s24 = sshll.u32 %s7008_s22, 4  ;;  %s6111_s22 = smov [#allocation26]   ;;  %s692_s24 = int_to_ptr.hbm [resolvable:$true] %s691_s24 }
  0x75   : > { %s717_s19 = sshll.u32 %s7009_s9, 4  ;;  %s769_s14 = sshll.u32 %s6112_s17, 4  ;;  %s718_s19 = int_to_ptr.hbm [resolvable:$true] %s717_s19  ;;  %s770_s14 = int_to_ptr.vmem [resolvable:$true] %s769_s14 }
  0x76   : > { %5145 = dma.hbm_to_vmem [thread:$0]  (!%p6285_p5), %s692_s24, 32, %s694_s28, [#allocation19]  }
  0x77   : > { %5151 = dma.hbm_to_vmem [thread:$0]  (!%p6285_p5), %s718_s19, 32, %s720_s29, [#allocation22]  }
  0x78   : > { %s741_s15 = sshll.u32 %s7010_s13, 4  ;;  %s743_s24 = sshll.u32 %s6111_s22, 4  ;;  %s742_s15 = int_to_ptr.hbm [resolvable:$true] %s741_s15  ;;  %s744_s24 = int_to_ptr.vmem [resolvable:$true] %s743_s24 }
  0x79   : > { %s767_s30 = sshll.u32 %s7011_s5, 4  ;;  %s7012_s28 = sld [smem:[#allocation74_spill]]  ;;  %s768_s30 = int_to_ptr.hbm [resolvable:$true] %s767_s30 }
  0x7a   : > { %5157 = dma.hbm_to_vmem [thread:$0]  (!%p6285_p5), %s742_s15, 32, %s744_s24, [#allocation25]  }
  0x7b   : > { %5163 = dma.hbm_to_vmem [thread:$0]  (!%p6285_p5), %s768_s30, 32, %s770_s14, [#allocation28]  }
  0x7c   : > { %s7013_s19 = sand.u32 1, %s6068_s26   ;;  %s6113_s8 = smov [#allocation32]  }
  0x7d   : > { %s3673_s29 = sshll.u32 %s7013_s19, 3  ;;  %s793_s11 = sshll.u32 %s6113_s8, 4  ;;  %s794_s11 = int_to_ptr.vmem [resolvable:$true] %s793_s11 }
  0x7e   : > { %s3675_s13 = sshll.u32 %s6348_s1, 3  ;;  %s7014_s10 = sld [smem:[#allocation76_spill]] }
  0x7f   : > { %s791_s16 = sshll.u32 %s7012_s28, 4  ;;  %s832_s22 = scalar_lea.vmem [#allocation35], %s3673_s29  ;;  %s792_s16 = int_to_ptr.hbm [resolvable:$true] %s791_s16 }
  0x80   : > { %5169 = dma.hbm_to_vmem [thread:$0]  (!%p6285_p5), %s792_s16, 32, %s794_s11, [#allocation31]  }
  0x81   : > { %s842_s24 = sshll.u32 %s832_s22, 4  ;;  %s843_s24 = int_to_ptr.vmem [resolvable:$true] %s842_s24 }
  0x82   : > { %851 = sbr.rel (%p6274_p3) target bundleno = 2241 (0x8c1), region = 104 }
  0x84   : > { %s838_s5 = scalar_lea.hbm %s7014_s10, %s3675_s13 }
  0x85   : > { %s840_s17 = sshll.u32 %s838_s5, 4  ;;  %s841_s17 = int_to_ptr.hbm [resolvable:$true] %s840_s17 }
  0x86   : > { %5176 = dma.hbm_to_vmem [thread:$0]  (!%p6399_p7), %s841_s17, 128, %s843_s24, %s6403_s18  }
  0x87   : > { %6011 = dma.done.wait (%p483_p1), [#allocation4], 64  }
  0x88   : > { %6013 = vsyncadd (%p483_p1), [#allocation4], 4294967232 }
  0x89   : > { %6015 = dma.done.wait (%p483_p1), [#allocation7], 1056  }
  0x8a   : > { %6017 = vsyncadd (%p483_p1), [#allocation7], 4294966240 }
  0x8b   : > { %6019 = dma.done.wait (%p483_p1), [#allocation10], 4128  }
  0x8c   : > { %6021 = vsyncadd (%p483_p1), [#allocation10], 4294963168 }
  0x8d   : > { %6023 = dma.done.wait (%p483_p1), [#allocation13], 64  }
  0x8e   : > { %6025 = vsyncadd (%p483_p1), [#allocation13], 4294967232 }
  0x8f   : > { %6027 = dma.done.wait (%p483_p1), [#allocation16], 4128  }
  0x90   : > { %6029 = vsyncadd (%p483_p1), [#allocation16], 4294963168 }
  0x91   : > { %6031 = dma.done.wait (%p483_p1), [#allocation19], 64  }
  0x92   : > { %6033 = vsyncadd (%p483_p1), [#allocation19], 4294967232 }
  0x93   : > { %6035 = dma.done.wait (%p483_p1), [#allocation22], 4128  }
  0x94   : > { %6037 = vsyncadd (%p483_p1), [#allocation22], 4294963168 }
  0x95   : > { %6039 = dma.done.wait (%p483_p1), [#allocation25], 64  }
  0x96   : > { %6041 = vsyncadd (%p483_p1), [#allocation25], 4294967232 }
  0x97   : > { %6043 = dma.done.wait (%p483_p1), [#allocation28], 4128  }
  0x98   : > { %6045 = vsyncadd (%p483_p1), [#allocation28], 4294963168 }
  0x99   : > { %6047 = dma.done.wait (%p483_p1), [#allocation31], 64  }
  0x9a   : > { %6049 = vsyncadd (%p483_p1), [#allocation31], 4294967232  ;;  %s948_s27 = sand.u32 1, %s6269_s23   ;;  %s6511_s1 = sand.u32 1, %s6064_s25  }
  0x9b   : > { %s3696_s4 = sshll.u32 %s6511_s1, 10  ;;  %s949_s18 = scalar_lea.sflag [#allocation34], %s948_s27 }
  0x9c   : > { %s6514_s14 = scalar_lea.vmem [#allocation33], %s3696_s4 }
  0x9d   : > { %6051 = dma.done.wait (%p6368_p13), %s949_s18, 16512  }
  0x9e   : > { %6053 = vsyncadd (%p6368_p13), %s949_s18, 4294950784  ;;  %s3697_s9 = sshll.u32 %s6511_s1, 3  ;;  %s3698_s21 = sshll.u32 %s6511_s1, 6 }
  0x9f   : > { %s6522_s28 = scalar_lea.vmem [#allocation35], %s3697_s9  ;;  %s6524_s16 = scalar_lea.vmem [#allocation36], %s3698_s21 }
  0xa0   : > { %s7016_s23 = sld [smem:[#allocation49_spill]] }
  0xa6   : > { %p3699_p1 = scmp.ne.s32.totalorder %s7016_s23, 0 }
  0xa8   : > { %1040 = sbr.rel (%p3699_p1) target bundleno = 1968 (0x7b0), region = 192 }
  0xad   : > { %v3726_v0 = vld [vmem:[#allocation6 + $0x30] sm:$0xf]  ;;  %v4772_v1 = vld [vmem:[#allocation6 + $0x34] sm:$0xf0]  ;;  %v4771_v2 = vld [vmem:[#allocation6 + $0x34] sm:$0xf] }
  0xae   : > { %v3727_v3 = vor.u32 %v4772_v1, %v3726_v0  ;;  %v3728_v4 = vld [vmem:[#allocation6 + $0x38] sm:$0xf0]  ;;  %v3718_v5 = vld [vmem:[#allocation6 + $0x20] sm:$0xf]  ;;  %v4770_v6 = vld [vmem:[#allocation6 + $0x24] sm:$0xf0] }
  0xaf   : > { %v3731_v7 = vor.u32 %v4771_v2, %v3728_v4  ;;  %v4769_v8 = vld [vmem:[#allocation6 + $0x24] sm:$0xf]  ;;  %v3720_v9 = vld [vmem:[#allocation6 + $0x28] sm:$0xf0]  ;;  %v3719_v10 = vor.u32 %v4770_v6, %v3718_v5  ;;  %v3710_v12 = vld [vmem:[#allocation6 + $0x10] sm:$0xf] }
  0xb0   : > { %1104 = vmatpush.bf16.msra.mxu0 %v3727_v3  ;;  %v3723_v11 = vor.u32 %v4769_v8, %v3720_v9  ;;  %v4768_v13 = vld [vmem:[#allocation6 + $0x14] sm:$0xf0]  ;;  %v4767_v14 = vld [vmem:[#allocation6 + $0x14] sm:$0xf]  ;;  %v3712_v15 = vld [vmem:[#allocation6 + $0x18] sm:$0xf0] }
  0xb1   : > { %1117 = vmatpush.bf16.msra.mxu1 %v3731_v7  ;;  %v3702_v16 = vld [vmem:[#allocation6] sm:$0xf]  ;;  %v4766_v17 = vld [vmem:[#allocation6 + $0x4] sm:$0xf0]  ;;  %v3792_v18 = vld [vmem:[#allocation9 + $0x70] sm:$0xf]  ;;  %v3711_v21 = vor.u32 %v4768_v13, %v3710_v12  ;;  %v3715_v26 = vor.u32 %v4767_v14, %v3712_v15 }
  0xb2   : > { %v4788_v19 = vld [vmem:[#allocation9 + $0x74] sm:$0xf0]  ;;  %v3856_v20 = vld [vmem:[#allocation9 + $0xf0] sm:$0xf]  ;;  %v4765_v22 = vld [vmem:[#allocation6 + $0x4] sm:$0xf]  ;;  %v3703_v38 = vor.u32 %v4766_v17, %v3702_v16 }
  0xb3   : > { %v3704_v23 = vld [vmem:[#allocation6 + $0x8] sm:$0xf0]  ;;  %v3793_v24 = vor.u32 %v4788_v19, %v3792_v18  ;;  %v4804_v25 = vld [vmem:[#allocation9 + $0xf4] sm:$0xf0]  ;;  %v4787_v28 = vld [vmem:[#allocation9 + $0x74] sm:$0xf] }
  0xb4   : > { %1105 = vmatpush.bf16.msra.mxu0 %v3719_v10  ;;  %v3857_v27 = vor.u32 %v4804_v25, %v3856_v20  ;;  %v3794_v29 = vld [vmem:[#allocation9 + $0x78] sm:$0xf0]  ;;  %v3784_v30 = vld [vmem:[#allocation9 + $0x60] sm:$0xf]  ;;  %v4786_v31 = vld [vmem:[#allocation9 + $0x64] sm:$0xf0]  ;;  %v3707_v41 = vor.u32 %v4765_v22, %v3704_v23 }
  0xb5   : > { %1118 = vmatpush.bf16.msra.mxu1 %v3723_v11  ;;  %1328 = vmatpush.bf16.msra.mxu2 %v3793_v24  ;;  %v3848_v32 = vld [vmem:[#allocation9 + $0xe0] sm:$0xf]  ;;  %v4802_v33 = vld [vmem:[#allocation9 + $0xe4] sm:$0xf0]  ;;  %v4803_v34 = vld [vmem:[#allocation9 + $0xf4] sm:$0xf]  ;;  %v3785_v36 = vor.u32 %v4786_v31, %v3784_v30  ;;  %v3797_v42 = vor.u32 %v4787_v28, %v3794_v29 }
  0xb6   : > { %1341 = vmatpush.bf16.msra.mxu3 %v3857_v27  ;;  %v3858_v35 = vld [vmem:[#allocation9 + $0xf8] sm:$0xf0]  ;;  %v3849_v37 = vor.u32 %v4802_v33, %v3848_v32  ;;  %v3776_v39 = vld [vmem:[#allocation9 + $0x50] sm:$0xf]  ;;  %v4784_v40 = vld [vmem:[#allocation9 + $0x54] sm:$0xf0] }
  0xb7   : > { %v3840_v43 = vld [vmem:[#allocation9 + $0xd0] sm:$0xf]  ;;  %v4800_v44 = vld [vmem:[#allocation9 + $0xd4] sm:$0xf0]  ;;  %v3861_v46 = vor.u32 %v4803_v34, %v3858_v35  ;;  %v4785_v47 = vld [vmem:[#allocation9 + $0x64] sm:$0xf]  ;;  %v3777_v50 = vor.u32 %v4784_v40, %v3776_v39 }
  0xb8   : > { %1106 = vmatpush.bf16.msra.mxu0 %v3711_v21  ;;  %v1041_v45 = vld [vmem:[#allocation3] sm:$0xf]  ;;  %v3786_v48 = vld [vmem:[#allocation9 + $0x68] sm:$0xf0]  ;;  %v4801_v49 = vld [vmem:[#allocation9 + $0xe4] sm:$0xf]  ;;  %v3841_v52 = vor.u32 %v4800_v44, %v3840_v43 }
  0xb9   : > { %1119 = vmatpush.bf16.msra.mxu1 %v3715_v26  ;;  %1329 = vmatpush.bf16.msra.mxu2 %v3785_v36  ;;  %v3850_v51 = vld [vmem:[#allocation9 + $0xe8] sm:$0xf0]  ;;  %v3768_v53 = vld [vmem:[#allocation9 + $0x40] sm:$0xf]  ;;  %v4782_v54 = vld [vmem:[#allocation9 + $0x44] sm:$0xf0]  ;;  %v3789_v57 = vor.u32 %v4785_v47, %v3786_v48 }
  0xba   : > { %1342 = vmatpush.bf16.msra.mxu3 %v3849_v37  ;;  %vm1096_vm0 = vcmask 523264   ;;  %v3832_v55 = vld [vmem:[#allocation9 + $0xc0] sm:$0xf]  ;;  %v4798_v56 = vld [vmem:[#allocation9 + $0xc4] sm:$0xf0]  ;;  %v3853_v58 = vor.u32 %v4801_v49, %v3850_v51  ;;  %v3769_v62 = vor.u32 %v4782_v54, %v3768_v53 }
  0xbb   : > { %v4783_v59 = vld [vmem:[#allocation9 + $0x54] sm:$0xf]  ;;  %v3778_v60 = vld [vmem:[#allocation9 + $0x58] sm:$0xf0]  ;;  %v3833_v0 = vor.u32 %v4798_v56, %v3832_v55  ;;  %v3760_v1 = vld [vmem:[#allocation9 + $0x30] sm:$0xf] }
  0xbc   : > { %1107 = vmatpush.bf16.msra.mxu0 %v3703_v38  ;;  %v4799_v61 = vld [vmem:[#allocation9 + $0xd4] sm:$0xf]  ;;  %v3842_v63 = vld [vmem:[#allocation9 + $0xd8] sm:$0xf0]  ;;  %v4780_v2 = vld [vmem:[#allocation9 + $0x34] sm:$0xf0]  ;;  %v3781_v5 = vor.u32 %v4783_v59, %v3778_v60 }
  0xbd   : > { %1120 = vmatpush.bf16.msra.mxu1 %v3707_v41  ;;  %1330 = vmatpush.bf16.msra.mxu2 %v3777_v50  ;;  %v3824_v3 = vld [vmem:[#allocation9 + $0xb0] sm:$0xf]  ;;  %v4796_v4 = vld [vmem:[#allocation9 + $0xb4] sm:$0xf0]  ;;  %v3845_v6 = vor.u32 %v4799_v61, %v3842_v63  ;;  %v4781_v7 = vld [vmem:[#allocation9 + $0x44] sm:$0xf]  ;;  %v3761_v10 = vor.u32 %v4780_v2, %v3760_v1 }
  0xbe   : > { %1343 = vmatpush.bf16.msra.mxu3 %v3841_v52  ;;  %v3770_v8 = vld [vmem:[#allocation9 + $0x48] sm:$0xf0]  ;;  %v4797_v9 = vld [vmem:[#allocation9 + $0xc4] sm:$0xf]  ;;  %v3825_v12 = vor.u32 %v4796_v4, %v3824_v3  ;;  %v3752_v13 = vld [vmem:[#allocation9 + $0x20] sm:$0xf] }
  0xbf   : > { %3732 = vmatmul.msk.bf16.vlgmr.msra.gmra.mxu0 %vm1096_vm0, %v1041_v45  ;;  %v3834_v11 = vld [vmem:[#allocation9 + $0xc8] sm:$0xf0]  ;;  %v4778_v14 = vld [vmem:[#allocation9 + $0x24] sm:$0xf0]  ;;  %v3816_v15 = vld [vmem:[#allocation9 + $0xa0] sm:$0xf]  ;;  %v3773_v17 = vor.u32 %v4781_v7, %v3770_v8 }
  0xc0   : > { %1354 = vmatpush.bf16.msrb.mxu0 %v3797_v42  ;;  %3733 = vmatmul.msk.bf16.vlgmr.msra.gmra.mxu1 %vm1096_vm0, %v1041_v45  ;;  %v4794_v16 = vld [vmem:[#allocation9 + $0xa4] sm:$0xf0]  ;;  %v3837_v18 = vor.u32 %v4797_v9, %v3834_v11  ;;  %v4779_v19 = vld [vmem:[#allocation9 + $0x34] sm:$0xf]  ;;  %v3762_v20 = vld [vmem:[#allocation9 + $0x38] sm:$0xf0]  ;;  %v3753_v21 = vor.u32 %v4778_v14, %v3752_v13 }
  0xc1   : > { %1367 = vmatpush.bf16.msrb.mxu1 %v3861_v46  ;;  %1331 = vmatpush.bf16.msra.mxu2 %v3769_v62  ;;  %v4795_v22 = vld [vmem:[#allocation9 + $0xb4] sm:$0xf]  ;;  %v3826_v23 = vld [vmem:[#allocation9 + $0xb8] sm:$0xf0]  ;;  %v3817_v24 = vor.u32 %v4794_v16, %v3816_v15  ;;  %v3765_v25 = vor.u32 %v4779_v19, %v3762_v20  ;;  %v4777_v27 = vld [vmem:[#allocation9 + $0x24] sm:$0xf] }
  0xc2   : > { %1344 = vmatpush.bf16.msra.mxu3 %v3833_v0  ;;  %v3829_v26 = vor.u32 %v4795_v22, %v3826_v23  ;;  %v3754_v28 = vld [vmem:[#allocation9 + $0x28] sm:$0xf0]  ;;  %v4793_v29 = vld [vmem:[#allocation9 + $0xa4] sm:$0xf]  ;;  %v3744_v33 = vld [vmem:[#allocation9 + $0x10] sm:$0xf] }
  0xc3   : > { %v3818_v30 = vld [vmem:[#allocation9 + $0xa8] sm:$0xf0]  ;;  %v3757_v31 = vor.u32 %v4777_v27, %v3754_v28  ;;  %v4776_v34 = vld [vmem:[#allocation9 + $0x14] sm:$0xf0]  ;;  %v3808_v35 = vld [vmem:[#allocation9 + $0x90] sm:$0xf] }
  0xc4   : > { %1355 = vmatpush.bf16.msrb.mxu0 %v3789_v57  ;;  %v3821_v32 = vor.u32 %v4793_v29, %v3818_v30  ;;  %v3745_v36 = vor.u32 %v4776_v34, %v3744_v33  ;;  %v4792_v37 = vld [vmem:[#allocation9 + $0x94] sm:$0xf0]  ;;  %v4775_v38 = vld [vmem:[#allocation9 + $0x14] sm:$0xf]  ;;  %v3746_v39 = vld [vmem:[#allocation9 + $0x18] sm:$0xf0] }
  0xc5   : > { %1368 = vmatpush.bf16.msrb.mxu1 %v3853_v58  ;;  %1332 = vmatpush.bf16.msra.mxu2 %v3761_v10  ;;  %v3809_v40 = vor.u32 %v4792_v37, %v3808_v35  ;;  %v3749_v41 = vor.u32 %v4775_v38, %v3746_v39  ;;  %v4791_v42 = vld [vmem:[#allocation9 + $0x94] sm:$0xf]  ;;  %v3810_v43 = vld [vmem:[#allocation9 + $0x98] sm:$0xf0]  ;;  %v3736_v45 = vld [vmem:[#allocation9] sm:$0xf] }
  0xc6   : > { %1345 = vmatpush.bf16.msra.mxu3 %v3825_v12  ;;  %v3813_v44 = vor.u32 %v4791_v42, %v3810_v43  ;;  %v4774_v46 = vld [vmem:[#allocation9 + $0x4] sm:$0xf0]  ;;  %v3800_v47 = vld [vmem:[#allocation9 + $0x80] sm:$0xf]  ;;  %v4773_v50 = vld [vmem:[#allocation9 + $0x4] sm:$0xf] }
  0xc7   : > { %v3737_v48 = vor.u32 %v4774_v46, %v3736_v45  ;;  %v4790_v49 = vld [vmem:[#allocation9 + $0x84] sm:$0xf0]  ;;  %v3738_v51 = vld [vmem:[#allocation9 + $0x8] sm:$0xf0]  ;;  %v4789_v54 = vld [vmem:[#allocation9 + $0x84] sm:$0xf] }
  0xc8   : > { %1356 = vmatpush.bf16.msrb.mxu0 %v3781_v5  ;;  %v3801_v52 = vor.u32 %v4790_v49, %v3800_v47  ;;  %v3741_v53 = vor.u32 %v4773_v50, %v3738_v51  ;;  %v3802_v55 = vld [vmem:[#allocation9 + $0x88] sm:$0xf0]  ;;  %v1050_v57 = vld [vmem:[#allocation8] sm:$0x3]  ;;  %v6114_v22 = vmov 256.0  }
  0xc9   : > { %1369 = vmatpush.bf16.msrb.mxu1 %v3845_v6  ;;  %1333 = vmatpush.bf16.msra.mxu2 %v3753_v21  ;;  %v3805_v56 = vor.u32 %v4789_v54, %v3802_v55  ;;  %v1052_v58 = vperm.slane %v1050_v57, 0  ;;  %v1053_v59 = vperm.slane %v1050_v57, 1  ;;  %v1162_v6 = vld [vmem:[#allocation11] sm:$0x3]  ;;  %5310 = vrcp.f32 %v6114_v22  ;;  %v3984_v38 = vld [vmem:[#allocation15 + $0xf0] sm:$0xf] }
  0xca   : > { %1346 = vmatpush.bf16.msra.mxu3 %v3817_v24  ;;  %v1165_v8 = vperm.slane %v1162_v6, 1  ;;  %v1164_v10 = vperm.slane %v1162_v6, 0  ;;  %v4820_v37 = vld [vmem:[#allocation15 + $0x74] sm:$0xf0]  ;;  %v3922_v42 = vld [vmem:[#allocation15 + $0x78] sm:$0xf0] }
  0xcb   : > { %v4835_v45 = vld [vmem:[#allocation15 + $0xf4] sm:$0xf]  ;;  %v3986_v46 = vld [vmem:[#allocation15 + $0xf8] sm:$0xf0]  ;;  %v4818_v49 = vld [vmem:[#allocation15 + $0x64] sm:$0xf0] }
  0xcc   : > { %1357 = vmatpush.bf16.msrb.mxu0 %v3773_v17  ;;  %v3989_v47 = vor.u32 %v4835_v45, %v3986_v46  ;;  %v3976_v50 = vld [vmem:[#allocation15 + $0xe0] sm:$0xf]  ;;  %v3914_v54 = vld [vmem:[#allocation15 + $0x68] sm:$0xf0]  ;;  %v4833_v57 = vld [vmem:[#allocation15 + $0xe4] sm:$0xf] }
  0xcd   : > { %1370 = vmatpush.bf16.msrb.mxu1 %v3837_v18  ;;  %1334 = vmatpush.bf16.msra.mxu2 %v3745_v36  ;;  %v3920_v36 = vld [vmem:[#allocation15 + $0x70] sm:$0xf]  ;;  %v4825_v46 = vld [vmem:[#allocation15 + $0xa4] sm:$0xf] }
  0xce   : > { %1347 = vmatpush.bf16.msra.mxu3 %v3809_v40  ;;  %v3921_v39 = vor.u32 %v4820_v37, %v3920_v36  ;;  %v4836_v40 = vld [vmem:[#allocation15 + $0xf4] sm:$0xf0]  ;;  %v3888_v22 = vld [vmem:[#allocation15 + $0x30] sm:$0xf]  ;;  %v3880_v37 = vld [vmem:[#allocation15 + $0x20] sm:$0xf] }
  0xcf   : > { %v5311_v23 = vpop.eup %5310  ;;  %v3985_v43 = vor.u32 %v4836_v40, %v3984_v38  ;;  %v4810_v38 = vld [vmem:[#allocation15 + $0x24] sm:$0xf0] }
  0xd0   : > { %1358 = vmatpush.bf16.msrb.mxu0 %v3765_v25  ;;  %v1384_v24 = vmul.f32 256.0, %v5311_v23  ;;  %vm1388_vm1 = vweird.f32 %v5311_v23  ;;  %v3881_v40 = vor.u32 %v4810_v38, %v3880_v37 }
  0xd1   : > { %1371 = vmatpush.bf16.msrb.mxu1 %v3829_v26  ;;  %1335 = vmatpush.bf16.msra.mxu2 %v3737_v48  ;;  %v3912_v48 = vld [vmem:[#allocation15 + $0x60] sm:$0xf] }
  0xd2   : > { %1348 = vmatpush.bf16.msra.mxu3 %v3801_v52  ;;  %v1385_v25 = vsub.f32 1.0, %v1384_v24  ;;  %v3913_v51 = vor.u32 %v4818_v49, %v3912_v48  ;;  %v4834_v52 = vld [vmem:[#allocation15 + $0xe4] sm:$0xf0]  ;;  %v3952_v24 = vld [vmem:[#allocation15 + $0xb0] sm:$0xf] }
  0xd3   : > { %v3977_v55 = vor.u32 %v4834_v52, %v3976_v50  ;;  %v3872_v48 = vld [vmem:[#allocation15 + $0x10] sm:$0xf]  ;;  %v4808_v50 = vld [vmem:[#allocation15 + $0x14] sm:$0xf0] }
  0xd4   : > { %1359 = vmatpush.bf16.msrb.mxu0 %v3757_v31  ;;  %v1386_v26 = vmul.f32 %v5311_v23, %v1385_v25  ;;  %v4824_v52 = vld [vmem:[#allocation15 + $0x94] sm:$0xf0] }
  0xd5   : > { %1372 = vmatpush.bf16.msrb.mxu1 %v3821_v32  ;;  %1630 = vmatpush.bf16.msrb.mxu2 %v3921_v39  ;;  %v3944_v39 = vld [vmem:[#allocation15 + $0xa0] sm:$0xf] }
  0xd6   : > { %v1387_v27 = vadd.f32 %v5311_v23, %v1386_v26  ;;  %1643 = vmatpush.bf16.msrb.mxu3 %v3985_v43  ;;  %v4828_v26 = vld [vmem:[#allocation15 + $0xb4] sm:$0xf0]  ;;  %v3882_v43 = vld [vmem:[#allocation15 + $0x28] sm:$0xf0] }
  0xd8   : > { %1360 = vmatpush.bf16.msrb.mxu0 %v3749_v41  ;;  %v6537_v28 = vsel %vm1388_vm1, %v5311_v23, %v1387_v27  ;;  %v4819_v41 = vld [vmem:[#allocation15 + $0x74] sm:$0xf]  ;;  %v4812_v23 = vld [vmem:[#allocation15 + $0x34] sm:$0xf0] }
  0xd9   : > { %1373 = vmatpush.bf16.msrb.mxu1 %v3813_v44  ;;  %v3925_v44 = vor.u32 %v4819_v41, %v3922_v42  ;;  %1631 = vmatpush.bf16.msrb.mxu2 %v3913_v51  ;;  %v3889_v25 = vor.u32 %v4812_v23, %v3888_v22  ;;  %v4811_v27 = vld [vmem:[#allocation15 + $0x34] sm:$0xf]  ;;  %v4826_v41 = vld [vmem:[#allocation15 + $0xa4] sm:$0xf0]  ;;  %v4809_v42 = vld [vmem:[#allocation15 + $0x24] sm:$0xf] }
  0xda   : > { %1644 = vmatpush.bf16.msrb.mxu3 %v3977_v55  ;;  %v3885_v45 = vor.u32 %v4809_v42, %v3882_v43  ;;  %v3936_v51 = vld [vmem:[#allocation15 + $0x90] sm:$0xf]  ;;  %v4807_v55 = vld [vmem:[#allocation15 + $0x14] sm:$0xf] }
  0xdc   : > { %1361 = vmatpush.bf16.msrb.mxu0 %v3741_v53  ;;  %v4817_v53 = vld [vmem:[#allocation15 + $0x64] sm:$0xf] }
  0xdd   : > { %1374 = vmatpush.bf16.msrb.mxu1 %v3805_v56  ;;  %v3917_v56 = vor.u32 %v4817_v53, %v3914_v54  ;;  %v3873_v53 = vor.u32 %v4808_v50, %v3872_v48  ;;  %v3937_v54 = vor.u32 %v4824_v52, %v3936_v51 }
  0xe0   : > { %1656 = vmatpush.bf16.msra.mxu0 %v3925_v44  ;;  %v3945_v44 = vor.u32 %v4826_v41, %v3944_v39 }
  0xe1   : > { %1669 = vmatpush.bf16.msra.mxu1 %v3989_v47  ;;  %v3946_v47 = vld [vmem:[#allocation15 + $0xa8] sm:$0xf0] }
  0xe2   : > { %v3949_v49 = vor.u32 %v4825_v46, %v3946_v47 }
  0xe4   : > { %1657 = vmatpush.bf16.msra.mxu0 %v3917_v56  ;;  %v3874_v56 = vld [vmem:[#allocation15 + $0x18] sm:$0xf0] }
 0x13c   : > { %v1109_v60 = vpop.f32.mrf.mxu0 }
 0x13d   : > { %v1110_v61 = vadd.f32 %v1109_v60, %v1052_v58  ;;  %v1122_v62 = vpop.f32.mrf.mxu1  ;;  %v3978_v58 = vld [vmem:[#allocation15 + $0xe8] sm:$0xf0]  ;;  %v3904_v60 = vld [vmem:[#allocation15 + $0x50] sm:$0xf] }
 0x13e   : > { %v1123_v63 = vadd.f32 %v1122_v62, %v1053_v59  ;;  %v3981_v59 = vor.u32 %v4833_v57, %v3978_v58  ;;  %v3968_v62 = vld [vmem:[#allocation15 + $0xd0] sm:$0xf]  ;;  %v4823_v57 = vld [vmem:[#allocation15 + $0x94] sm:$0xf]  ;;  %v3877_v58 = vor.u32 %v4807_v55, %v3874_v56 }
 0x13f   : > { %v6529_v0 = vmax.f32 %v1110_v61, 0.0  ;;  %v4816_v61 = vld [vmem:[#allocation15 + $0x54] sm:$0xf0] }
 0x140   : > { %v6531_v1 = vmax.f32 %v1123_v63, 0.0  ;;  %1670 = vmatpush.bf16.msra.mxu1 %v3981_v59  ;;  %v3905_v63 = vor.u32 %v4816_v61, %v3904_v60  ;;  %v3938_v59 = vld [vmem:[#allocation15 + $0x98] sm:$0xf0]  ;;  %v3864_v60 = vld [vmem:[#allocation15] sm:$0xf] }
 0x141   : > { %v1128_v2 = vpack.c.bf16 %v6529_v0, %v6529_v0  ;;  %v4806_v61 = vld [vmem:[#allocation15 + $0x4] sm:$0xf0] }
 0x142   : > { %v1129_v3 = vpack.c.bf16 %v6531_v1, %v6531_v1  ;;  %1632 = vmatpush.bf16.msrb.mxu2 %v3905_v63  ;;  %v3928_v63 = vld [vmem:[#allocation15 + $0x80] sm:$0xf] }
 0x143   : > { %1336 = vmatmul.bf16.vlgmr.msra.gmra.mxu2 %v1128_v2  ;;  %1362 = vmatmul.bf16.vlgmr.msrb.gmra.mxu0 %v1128_v2  ;;  %v4832_v2 = vld [vmem:[#allocation15 + $0xd4] sm:$0xf0] }
 0x144   : > { %1349 = vmatmul.bf16.vlgmr.msra.gmra.mxu3 %v1129_v3  ;;  %1375 = vmatmul.bf16.vlgmr.msrb.gmra.mxu1 %v1129_v3  ;;  %v1111_v4 = vpop.f32.mrf.mxu0  ;;  %v4815_v3 = vld [vmem:[#allocation15 + $0x54] sm:$0xf] }
 0x145   : > { %v1124_v5 = vpop.f32.mrf.mxu1  ;;  %v3906_v4 = vld [vmem:[#allocation15 + $0x58] sm:$0xf0] }
 0x146   : > { %v3969_v5 = vor.u32 %v4832_v2, %v3968_v62  ;;  %v3909_v6 = vor.u32 %v4815_v3, %v3906_v4  ;;  %v3941_v62 = vor.u32 %v4823_v57, %v3938_v59  ;;  %v4822_v2 = vld [vmem:[#allocation15 + $0x84] sm:$0xf0]  ;;  %v4805_v3 = vld [vmem:[#allocation15 + $0x4] sm:$0xf]  ;;  %v3865_v4 = vor.u32 %v4806_v61, %v3864_v60  ;;  %v4048_v61 = vld [vmem:[#allocation21 + $0x70] sm:$0xf] }
 0x148   : > { %1645 = vmatpush.bf16.msrb.mxu3 %v3969_v5  ;;  %1658 = vmatpush.bf16.msra.mxu0 %v3909_v6  ;;  %v3866_v5 = vld [vmem:[#allocation15 + $0x8] sm:$0xf0]  ;;  %v4821_v6 = vld [vmem:[#allocation15 + $0x84] sm:$0xf] }
 0x1c0   : > { %v1363_v7 = vpop.f32.mrf.mxu0 }
 0x1c1   : > { %v1376_v9 = vpop.f32.mrf.mxu1  ;;  %v1364_v11 = vadd.f32 %v1363_v7, %v1165_v8  ;;  %v4831_v7 = vld [vmem:[#allocation15 + $0xd4] sm:$0xf]  ;;  %v3970_v8 = vld [vmem:[#allocation15 + $0xd8] sm:$0xf0] }
 0x1c3   : > { %v1377_v16 = vadd.f32 %v1376_v9, %v1364_v11  ;;  %v3973_v9 = vor.u32 %v4831_v7, %v3970_v8  ;;  %v4814_v11 = vld [vmem:[#allocation15 + $0x44] sm:$0xf0]  ;;  %v3930_v7 = vld [vmem:[#allocation15 + $0x88] sm:$0xf0]  ;;  %v3929_v8 = vor.u32 %v4822_v2, %v3928_v63  ;;  %v4112_v63 = vld [vmem:[#allocation21 + $0xf0] sm:$0xf] }
 0x1c5   : > { %1671 = vmatpush.bf16.msra.mxu1 %v3973_v9  ;;  %v3869_v9 = vor.u32 %v4805_v3, %v3866_v5  ;;  %v4868_v3 = vld [vmem:[#allocation21 + $0xf4] sm:$0xf0]  ;;  %v4050_v5 = vld [vmem:[#allocation21 + $0x78] sm:$0xf0] }
 0x1c6   : > { %v1337_v12 = vpop.f32.mrf.mxu2 }
 0x1c7   : > { %v1338_v13 = vadd.f32 %v1337_v12, %v1164_v10  ;;  %v1350_v14 = vpop.f32.mrf.mxu3  ;;  %v3896_v10 = vld [vmem:[#allocation15 + $0x40] sm:$0xf] }
 0x1c8   : > { %v1365_v15 = vpop.f32.mrf.mxu0  ;;  %v3960_v12 = vld [vmem:[#allocation15 + $0xc0] sm:$0xf] }
 0x1c9   : > { %v1351_v17 = vadd.f32 %v1350_v14, %v1338_v13  ;;  %v1378_v18 = vpop.f32.mrf.mxu1  ;;  %v3897_v13 = vor.u32 %v4814_v11, %v3896_v10  ;;  %v4830_v14 = vld [vmem:[#allocation15 + $0xc4] sm:$0xf0]  ;;  %v4813_v15 = vld [vmem:[#allocation15 + $0x44] sm:$0xf]  ;;  %v3933_v10 = vor.u32 %v4821_v6, %v3930_v7  ;;  %v4113_v6 = vor.u32 %v4868_v3, %v4112_v63  ;;  %v4842_v63 = vld [vmem:[#allocation21 + $0x24] sm:$0xf0] }
 0x1cb   : > { %v1380_v19 = vadd.f32 %v1377_v16, %v1351_v17  ;;  %1633 = vmatpush.bf16.msrb.mxu2 %v3897_v13 }
 0x1cd   : > { %1381 = vadd.xlane.f32.xlu0 %v1380_v19  ;;  %v4829_v19 = vld [vmem:[#allocation15 + $0xc4] sm:$0xf] }
 0x1ce   : > { %v1339_v20 = vpop.f32.mrf.mxu2 }
 0x1cf   : > { %v1352_v21 = vpop.f32.mrf.mxu3  ;;  %v3962_v20 = vld [vmem:[#allocation15 + $0xc8] sm:$0xf0]  ;;  %1634 = vmatpush.bf16.msrb.mxu2 %v3889_v25 }
 0x1d0   : > { %v3965_v21 = vor.u32 %v4829_v19, %v3962_v20  ;;  %v1412_v19 = vld [vmem:[#allocation12] sm:$0x3] }
 0x1d1   : > { %v1414_v22 = vperm.slane %v1412_v19, 0  ;;  %v1415_v23 = vperm.slane %v1412_v19, 1 }
 0x1d2   : > { %1672 = vmatpush.bf16.msra.mxu1 %v3965_v21  ;;  %v1420_v21 = vld [vmem:[#allocation14] sm:$0x3] }
 0x1d3   : > { %1635 = vmatpush.bf16.msrb.mxu2 %v3881_v40  ;;  %v1464_v40 = vld [vmem:[#allocation17] sm:$0x3] }
 0x1d4   : > { %v1467_v41 = vperm.slane %v1464_v40, 1  ;;  %v1466_v43 = vperm.slane %v1464_v40, 0  ;;  %v4088_v40 = vld [vmem:[#allocation21 + $0xc0] sm:$0xf] }
 0x1d7   : > { %1636 = vmatpush.bf16.msrb.mxu2 %v3873_v53 }
 0x1db   : > { %1637 = vmatpush.bf16.msrb.mxu2 %v3865_v4  ;;  %v4851_v4 = vld [vmem:[#allocation21 + $0x74] sm:$0xf] }
 0x1dc   : > { %v4053_v7 = vor.u32 %v4851_v4, %v4050_v5  ;;  %v4858_v4 = vld [vmem:[#allocation21 + $0xa4] sm:$0xf0]  ;;  %v4841_v5 = vld [vmem:[#allocation21 + $0x24] sm:$0xf] }
 0x240   : > { %v1382_v29 = vpop.xlane.xlu0 %1381 }
 0x241   : > { %v1390_v30 = vmul.f32 %v6537_v28, %v1382_v29  ;;  %v3890_v29 = vld [vmem:[#allocation15 + $0x38] sm:$0xf0] }
 0x243   : > { %v6540_v31 = vsub.f32 %v1351_v17, %v1390_v30  ;;  %v6542_v32 = vsub.f32 %v1377_v16, %v1390_v30  ;;  %v3898_v16 = vld [vmem:[#allocation15 + $0x48] sm:$0xf0]  ;;  %v3961_v17 = vor.u32 %v4830_v14, %v3960_v12  ;;  %v3953_v30 = vor.u32 %v4828_v26, %v3952_v24 }
 0x244   : > { %v3901_v18 = vor.u32 %v4813_v15, %v3898_v16  ;;  %v1422_v26 = vperm.slane %v1420_v21, 0 }
 0x245   : > { %v1393_v33 = vmul.f32 %v6540_v31, %v6540_v31  ;;  %v1394_v34 = vmul.f32 %v6542_v32, %v6542_v32  ;;  %1646 = vmatpush.bf16.msrb.mxu3 %v3961_v17 }
 0x246   : > { %1659 = vmatpush.bf16.msra.mxu0 %v3901_v18 }
 0x247   : > { %v1395_v35 = vadd.f32 %v1394_v34, %v1393_v33  ;;  %v3893_v33 = vor.u32 %v4811_v27, %v3890_v29  ;;  %v4827_v34 = vld [vmem:[#allocation15 + $0xb4] sm:$0xf]  ;;  %v1423_v29 = vperm.slane %v1420_v21, 1 }
 0x248   : > { %v4106_v21 = vld [vmem:[#allocation21 + $0xe8] sm:$0xf0] }
 0x249   : > { %1396 = vadd.xlane.f32.xlu0 %v1395_v35  ;;  %v3954_v35 = vld [vmem:[#allocation15 + $0xb8] sm:$0xf0]  ;;  %1647 = vmatpush.bf16.msrb.mxu3 %v3953_v30 }
 0x24a   : > { %v3957_v36 = vor.u32 %v4827_v34, %v3954_v35  ;;  %1660 = vmatpush.bf16.msra.mxu0 %v3893_v33 }
 0x24c   : > { %1673 = vmatpush.bf16.msra.mxu1 %v3957_v36 }
 0x24d   : > { %1648 = vmatpush.bf16.msrb.mxu3 %v3945_v44 }
 0x24e   : > { %1661 = vmatpush.bf16.msra.mxu0 %v3885_v45 }
 0x250   : > { %1674 = vmatpush.bf16.msra.mxu1 %v3949_v49 }
 0x251   : > { %1649 = vmatpush.bf16.msrb.mxu3 %v3937_v54 }
 0x252   : > { %1662 = vmatpush.bf16.msra.mxu0 %v3877_v58 }
 0x254   : > { %1675 = vmatpush.bf16.msra.mxu1 %v3941_v62  ;;  %v4852_v62 = vld [vmem:[#allocation21 + $0x74] sm:$0xf0] }
 0x255   : > { %1650 = vmatpush.bf16.msrb.mxu3 %v3929_v8  ;;  %v4049_v2 = vor.u32 %v4852_v62, %v4048_v61  ;;  %v4867_v8 = vld [vmem:[#allocation21 + $0xf4] sm:$0xf]  ;;  %v4008_v62 = vld [vmem:[#allocation21 + $0x20] sm:$0xf] }
 0x256   : > { %1663 = vmatpush.bf16.msra.mxu0 %v3869_v9  ;;  %v4114_v9 = vld [vmem:[#allocation21 + $0xf8] sm:$0xf0]  ;;  %v4009_v3 = vor.u32 %v4842_v63, %v4008_v62 }
 0x257   : > { %1927 = vmatpush.bf16.msra.mxu2 %v4049_v2  ;;  %v4072_v2 = vld [vmem:[#allocation21 + $0xa0] sm:$0xf] }
 0x258   : > { %1676 = vmatpush.bf16.msra.mxu1 %v3933_v10  ;;  %v4117_v10 = vor.u32 %v4867_v8, %v4114_v9  ;;  %v4857_v9 = vld [vmem:[#allocation21 + $0xa4] sm:$0xf] }
 0x259   : > { %1940 = vmatpush.bf16.msra.mxu3 %v4113_v6  ;;  %v4010_v6 = vld [vmem:[#allocation21 + $0x28] sm:$0xf0] }
 0x25a   : > { %1953 = vmatpush.bf16.msrb.mxu0 %v4053_v7  ;;  %v4073_v7 = vor.u32 %v4858_v4, %v4072_v2  ;;  %v4013_v8 = vor.u32 %v4841_v5, %v4010_v6 }
 0x25c   : > { %1966 = vmatpush.bf16.msrb.mxu1 %v4117_v10  ;;  %v4074_v10 = vld [vmem:[#allocation21 + $0xa8] sm:$0xf0] }
 0x2bc   : > { %v1397_v11 = vpop.xlane.xlu0 %1396 }
 0x2bd   : > { %v1398_v12 = vmul.f32 %v1397_v11, %v6537_v28  ;;  %v4040_v11 = vld [vmem:[#allocation21 + $0x60] sm:$0xf] }
 0x2bf   : > { %v1399_v13 = vadd.f32 1e-05, %v1398_v12  ;;  %v4850_v12 = vld [vmem:[#allocation21 + $0x64] sm:$0xf0] }
 0x2c1   : > { %5312 = vrsqrt.f32 %v1399_v13  ;;  %vm1406_vm3 = vweird.f32 %v1399_v13 }
 0x2c7   : > { %v5313_v14 = vpop.eup %5312 }
 0x2c8   : > { %v1401_v15 = vmul.f32 %v5313_v14, %v1399_v13  ;;  %vm1407_vm2 = vweird.f32 %v5313_v14  ;;  %v4104_v13 = vld [vmem:[#allocation21 + $0xe0] sm:$0xf] }
 0x2c9   : > { %vm1408_vm4 = vmor %vm1406_vm3, %vm1407_vm2 }
 0x2ca   : > { %v1402_v16 = vmul.f32 %v5313_v14, %v1401_v15  ;;  %v4866_v15 = vld [vmem:[#allocation21 + $0xe4] sm:$0xf0] }
 0x2cc   : > { %v1403_v17 = vmul.f32 0.5, %v1402_v16  ;;  %v4849_v16 = vld [vmem:[#allocation21 + $0x64] sm:$0xf] }
 0x2ce   : > { %v1404_v18 = vsub.f32 1.5, %v1403_v17  ;;  %v4042_v17 = vld [vmem:[#allocation21 + $0x68] sm:$0xf0] }
 0x2cf   : > { %v4045_v19 = vor.u32 %v4849_v16, %v4042_v17  ;;  %v4856_v16 = vld [vmem:[#allocation21 + $0x94] sm:$0xf0]  ;;  %v4839_v17 = vld [vmem:[#allocation21 + $0x14] sm:$0xf] }
 0x2d0   : > { %v1405_v20 = vmul.f32 %v5313_v14, %v1404_v18  ;;  %v4105_v18 = vor.u32 %v4866_v15, %v4104_v13  ;;  %v4840_v13 = vld [vmem:[#allocation21 + $0x14] sm:$0xf0] }
 0x2d1   : > { %1954 = vmatpush.bf16.msrb.mxu0 %v4045_v19 }
 0x2d2   : > { %v1409_v24 = vsel %vm1408_vm4, %v5313_v14, %v1405_v20  ;;  %v4041_v14 = vor.u32 %v4850_v12, %v4040_v11  ;;  %v4865_v20 = vld [vmem:[#allocation21 + $0xe4] sm:$0xf]  ;;  %1941 = vmatpush.bf16.msra.mxu3 %v4105_v18  ;;  %v4077_v11 = vor.u32 %v4857_v9, %v4074_v10  ;;  %v4000_v12 = vld [vmem:[#allocation21 + $0x10] sm:$0xf]  ;;  %v4002_v18 = vld [vmem:[#allocation21 + $0x18] sm:$0xf0] }
 0x2d3   : > { %v1410_v25 = vmul.f32 %v1409_v24, %v6540_v31  ;;  %v1411_v27 = vmul.f32 %v1409_v24, %v6542_v32  ;;  %v4848_v24 = vld [vmem:[#allocation21 + $0x54] sm:$0xf0]  ;;  %v4001_v15 = vor.u32 %v4840_v13, %v4000_v12 }
 0x2d4   : > { %1928 = vmatpush.bf16.msra.mxu2 %v4041_v14  ;;  %v4064_v14 = vld [vmem:[#allocation21 + $0x90] sm:$0xf] }
 0x2d5   : > { %v1418_v30 = vmul.f32 %v1414_v22, %v1410_v25  ;;  %v1419_v33 = vmul.f32 %v1415_v23, %v1411_v27  ;;  %v4109_v22 = vor.u32 %v4865_v20, %v4106_v21  ;;  %v4032_v23 = vld [vmem:[#allocation21 + $0x50] sm:$0xf]  ;;  %v4864_v27 = vld [vmem:[#allocation21 + $0xd4] sm:$0xf0]  ;;  %v4065_v19 = vor.u32 %v4856_v16, %v4064_v14  ;;  %v4855_v21 = vld [vmem:[#allocation21 + $0x94] sm:$0xf] }
 0x2d6   : > { %v4096_v25 = vld [vmem:[#allocation21 + $0xd0] sm:$0xf]  ;;  %v4005_v20 = vor.u32 %v4839_v17, %v4002_v18 }
 0x2d7   : > { %v1426_v34 = vadd.f32 %v1422_v26, %v1418_v30  ;;  %v1427_v35 = vadd.f32 %v1423_v29, %v1419_v33  ;;  %1967 = vmatpush.bf16.msrb.mxu1 %v4109_v22  ;;  %v4033_v26 = vor.u32 %v4848_v24, %v4032_v23  ;;  %v4847_v29 = vld [vmem:[#allocation21 + $0x54] sm:$0xf]  ;;  %v4034_v30 = vld [vmem:[#allocation21 + $0x58] sm:$0xf0]  ;;  %v4097_v33 = vor.u32 %v4864_v27, %v4096_v25  ;;  %v3992_v23 = vld [vmem:[#allocation21] sm:$0xf] }
 0x2d8   : > { %v4066_v22 = vld [vmem:[#allocation21 + $0x98] sm:$0xf0]  ;;  %v4838_v25 = vld [vmem:[#allocation21 + $0x4] sm:$0xf0] }
 0x2d9   : > { %v1428_v36 = vmax.f32 %v1426_v34, 0.0  ;;  %v1429_v37 = vmax.f32 %v1427_v35, 0.0  ;;  %v4037_v34 = vor.u32 %v4847_v29, %v4034_v30  ;;  %v4863_v35 = vld [vmem:[#allocation21 + $0xd4] sm:$0xf]  ;;  %1929 = vmatpush.bf16.msra.mxu2 %v4033_v26  ;;  %1942 = vmatpush.bf16.msra.mxu3 %v4097_v33  ;;  %v4069_v24 = vor.u32 %v4855_v21, %v4066_v22  ;;  %v4056_v26 = vld [vmem:[#allocation21 + $0x80] sm:$0xf] }
 0x2da   : > { %v4854_v27 = vld [vmem:[#allocation21 + $0x84] sm:$0xf0]  ;;  %v3993_v29 = vor.u32 %v4838_v25, %v3992_v23  ;;  %v4837_v30 = vld [vmem:[#allocation21 + $0x4] sm:$0xf]  ;;  %v3994_v33 = vld [vmem:[#allocation21 + $0x8] sm:$0xf0] }
 0x2db   : > { %v1430_v38 = vpack.c.bf16 %v1428_v36, %v1428_v36  ;;  %v1431_v39 = vpack.c.bf16 %v1429_v37, %v1429_v37  ;;  %v4098_v36 = vld [vmem:[#allocation21 + $0xd8] sm:$0xf0]  ;;  %1955 = vmatpush.bf16.msrb.mxu0 %v4037_v34  ;;  %v4853_v34 = vld [vmem:[#allocation21 + $0x84] sm:$0xf] }
 0x2dc   : > { %v4101_v37 = vor.u32 %v4863_v35, %v4098_v36  ;;  %v4057_v35 = vor.u32 %v4854_v27, %v4056_v26  ;;  %v3997_v36 = vor.u32 %v4837_v30, %v3994_v33  ;;  %v4884_v25 = vld [vmem:[#allocation27 + $0x74] sm:$0xf0]  ;;  %v4240_v26 = vld [vmem:[#allocation27 + $0xf0] sm:$0xf]  ;;  %v4883_v30 = vld [vmem:[#allocation27 + $0x74] sm:$0xf] }
 0x2dd   : > { %1638 = vmatmul.bf16.vlgmr.msrb.gmra.mxu2 %v1430_v38  ;;  %1651 = vmatmul.bf16.vlgmr.msrb.gmra.mxu3 %v1431_v39  ;;  %v4178_v33 = vld [vmem:[#allocation27 + $0x78] sm:$0xf0] }
 0x2de   : > { %1664 = vmatmul.bf16.vlgmr.msra.gmra.mxu0 %v1430_v38  ;;  %1677 = vmatmul.bf16.vlgmr.msra.gmra.mxu1 %v1431_v39  ;;  %v4024_v38 = vld [vmem:[#allocation21 + $0x40] sm:$0xf]  ;;  %v4846_v39 = vld [vmem:[#allocation21 + $0x44] sm:$0xf0] }
 0x2df   : > { %1968 = vmatpush.bf16.msrb.mxu1 %v4101_v37  ;;  %v4058_v37 = vld [vmem:[#allocation21 + $0x88] sm:$0xf0] }
 0x35b   : > { %v1665_v42 = vpop.f32.mrf.mxu0  ;;  %v1678_v31 = vpop.f32.mrf.mxu1 }
 0x35c   : > { %v1666_v44 = vadd.f32 %v1665_v42, %v1467_v41  ;;  %v4025_v41 = vor.u32 %v4846_v39, %v4024_v38  ;;  %v4862_v42 = vld [vmem:[#allocation21 + $0xc4] sm:$0xf0]  ;;  %v4061_v38 = vor.u32 %v4853_v34, %v4058_v37  ;;  %v4242_v37 = vld [vmem:[#allocation27 + $0xf8] sm:$0xf0] }
 0x35e   : > { %v1679_v47 = vadd.f32 %v1678_v31, %v1666_v44  ;;  %v4845_v31 = vld [vmem:[#allocation21 + $0x44] sm:$0xf]  ;;  %v4089_v44 = vor.u32 %v4862_v42, %v4088_v40  ;;  %1930 = vmatpush.bf16.msra.mxu2 %v4025_v41 }
 0x360   : > { %v1639_v32 = vpop.f32.mrf.mxu2  ;;  %v1652_v45 = vpop.f32.mrf.mxu3  ;;  %1943 = vmatpush.bf16.msra.mxu3 %v4089_v44 }
 0x361   : > { %v1640_v46 = vadd.f32 %v1639_v32, %v1466_v43  ;;  %v4026_v43 = vld [vmem:[#allocation21 + $0x48] sm:$0xf0] }
 0x362   : > { %v4029_v32 = vor.u32 %v4845_v31, %v4026_v43 }
 0x363   : > { %v1653_v48 = vadd.f32 %v1652_v45, %v1640_v46  ;;  %v1667_v49 = vpop.f32.mrf.mxu0  ;;  %v1680_v50 = vpop.f32.mrf.mxu1  ;;  %v4861_v45 = vld [vmem:[#allocation21 + $0xc4] sm:$0xf]  ;;  %v4090_v46 = vld [vmem:[#allocation21 + $0xc8] sm:$0xf0] }
 0x364   : > { %1956 = vmatpush.bf16.msrb.mxu0 %v4029_v32  ;;  %v4844_v49 = vld [vmem:[#allocation21 + $0x34] sm:$0xf0]  ;;  %v4080_v50 = vld [vmem:[#allocation21 + $0xb0] sm:$0xf]  ;;  %v1707_v32 = vld [vmem:[#allocation18] sm:$0x3] }
 0x365   : > { %v1682_v51 = vadd.f32 %v1679_v47, %v1653_v48 }
 0x367   : > { %1683 = vadd.xlane.f32.xlu1 %v1682_v51 }
 0x368   : > { %v1641_v52 = vpop.f32.mrf.mxu2  ;;  %v1654_v53 = vpop.f32.mrf.mxu3 }
 0x369   : > { %v4860_v52 = vld [vmem:[#allocation21 + $0xb4] sm:$0xf0]  ;;  %v4843_v53 = vld [vmem:[#allocation21 + $0x34] sm:$0xf] }
 0x3da   : > { %v1684_v54 = vpop.xlane.xlu1 %1683 }
 0x3db   : > { %v1685_v55 = vmul.f32 %v1684_v54, %v6537_v28  ;;  %v4018_v54 = vld [vmem:[#allocation21 + $0x38] sm:$0xf0] }
 0x3dd   : > { %v6552_v56 = vsub.f32 %v1653_v48, %v1685_v55  ;;  %v6554_v57 = vsub.f32 %v1679_v47, %v1685_v55  ;;  %v4093_v47 = vor.u32 %v4861_v45, %v4090_v46  ;;  %v4016_v48 = vld [vmem:[#allocation21 + $0x30] sm:$0xf]  ;;  %v4081_v55 = vor.u32 %v4860_v52, %v4080_v50 }
 0x3de   : > { %v4017_v51 = vor.u32 %v4844_v49, %v4016_v48  ;;  %v1709_v48 = vperm.slane %v1707_v32, 0  ;;  %v1710_v49 = vperm.slane %v1707_v32, 1 }
 0x3df   : > { %v1688_v58 = vmul.f32 %v6552_v56, %v6552_v56  ;;  %v1689_v59 = vmul.f32 %v6554_v57, %v6554_v57  ;;  %1969 = vmatpush.bf16.msrb.mxu1 %v4093_v47  ;;  %1944 = vmatpush.bf16.msra.mxu3 %v4081_v55  ;;  %v1715_v47 = vld [vmem:[#allocation20] sm:$0x3] }
 0x3e0   : > { %1931 = vmatpush.bf16.msra.mxu2 %v4017_v51 }
 0x3e1   : > { %v1690_v60 = vadd.f32 %v1689_v59, %v1688_v58  ;;  %v4021_v58 = vor.u32 %v4843_v53, %v4018_v54  ;;  %v4859_v59 = vld [vmem:[#allocation21 + $0xb4] sm:$0xf]  ;;  %v1717_v53 = vperm.slane %v1715_v47, 0  ;;  %v1718_v54 = vperm.slane %v1715_v47, 1 }
 0x3e2   : > { %v4234_v47 = vld [vmem:[#allocation27 + $0xe8] sm:$0xf0] }
 0x3e3   : > { %1691 = vadd.xlane.f32.xlu1 %v1690_v60  ;;  %v4082_v60 = vld [vmem:[#allocation21 + $0xb8] sm:$0xf0]  ;;  %1957 = vmatpush.bf16.msrb.mxu0 %v4021_v58 }
 0x3e4   : > { %v4085_v61 = vor.u32 %v4859_v59, %v4082_v60  ;;  %1932 = vmatpush.bf16.msra.mxu2 %v4009_v3  ;;  %1945 = vmatpush.bf16.msra.mxu3 %v4073_v7 }
 0x3e6   : > { %1970 = vmatpush.bf16.msrb.mxu1 %v4085_v61 }
 0x3e7   : > { %1958 = vmatpush.bf16.msrb.mxu0 %v4013_v8 }
 0x3e8   : > { %1933 = vmatpush.bf16.msra.mxu2 %v4001_v15  ;;  %1946 = vmatpush.bf16.msra.mxu3 %v4065_v19 }
 0x3ea   : > { %1971 = vmatpush.bf16.msrb.mxu1 %v4077_v11 }
 0x3eb   : > { %1959 = vmatpush.bf16.msrb.mxu0 %v4005_v20 }
 0x3ec   : > { %1934 = vmatpush.bf16.msra.mxu2 %v3993_v29  ;;  %1947 = vmatpush.bf16.msra.mxu3 %v4057_v35  ;;  %v4900_v29 = vld [vmem:[#allocation27 + $0xf4] sm:$0xf0]  ;;  %v4181_v35 = vor.u32 %v4883_v30, %v4178_v33  ;;  %v4890_v30 = vld [vmem:[#allocation27 + $0xa4] sm:$0xf0]  ;;  %v4873_v33 = vld [vmem:[#allocation27 + $0x24] sm:$0xf] }
 0x3ed   : > { %v4241_v34 = vor.u32 %v4900_v29, %v4240_v26  ;;  %v4874_v26 = vld [vmem:[#allocation27 + $0x24] sm:$0xf0] }
 0x3ee   : > { %1972 = vmatpush.bf16.msrb.mxu1 %v4069_v24  ;;  %v4176_v24 = vld [vmem:[#allocation27 + $0x70] sm:$0xf] }
 0x3ef   : > { %1960 = vmatpush.bf16.msrb.mxu0 %v3997_v36  ;;  %v4177_v27 = vor.u32 %v4884_v25, %v4176_v24  ;;  %v4899_v36 = vld [vmem:[#allocation27 + $0xf4] sm:$0xf]  ;;  %v4136_v25 = vld [vmem:[#allocation27 + $0x20] sm:$0xf] }
 0x3f0   : > { %2235 = vmatpush.bf16.msrb.mxu3 %v4241_v34  ;;  %v4137_v29 = vor.u32 %v4874_v26, %v4136_v25  ;;  %v4138_v34 = vld [vmem:[#allocation27 + $0x28] sm:$0xf0] }
 0x3f1   : > { %2222 = vmatpush.bf16.msrb.mxu2 %v4177_v27  ;;  %v4200_v27 = vld [vmem:[#allocation27 + $0xa0] sm:$0xf] }
 0x3f2   : > { %1973 = vmatpush.bf16.msrb.mxu1 %v4061_v38  ;;  %v4245_v38 = vor.u32 %v4899_v36, %v4242_v37  ;;  %v4141_v36 = vor.u32 %v4873_v33, %v4138_v34  ;;  %v4889_v37 = vld [vmem:[#allocation27 + $0xa4] sm:$0xf] }
 0x3f3   : > { %2248 = vmatpush.bf16.msra.mxu0 %v4181_v35  ;;  %v4201_v35 = vor.u32 %v4890_v30, %v4200_v27 }
 0x3f6   : > { %2261 = vmatpush.bf16.msra.mxu1 %v4245_v38  ;;  %v4202_v38 = vld [vmem:[#allocation27 + $0xa8] sm:$0xf0] }
 0x456   : > { %v1692_v39 = vpop.xlane.xlu1 %1691 }
 0x457   : > { %v1693_v40 = vmul.f32 %v1692_v39, %v6537_v28  ;;  %v4168_v39 = vld [vmem:[#allocation27 + $0x60] sm:$0xf] }
 0x459   : > { %v1694_v41 = vadd.f32 1e-05, %v1693_v40  ;;  %v4882_v40 = vld [vmem:[#allocation27 + $0x64] sm:$0xf0] }
 0x45b   : > { %5314 = vrsqrt.f32 %v1694_v41  ;;  %vm1701_vm6 = vweird.f32 %v1694_v41 }
 0x461   : > { %v5315_v42 = vpop.eup %5314 }
 0x462   : > { %v1696_v31 = vmul.f32 %v5315_v42, %v1694_v41  ;;  %vm1702_vm5 = vweird.f32 %v5315_v42  ;;  %v4232_v41 = vld [vmem:[#allocation27 + $0xe0] sm:$0xf] }
 0x463   : > { %vm1703_vm7 = vmor %vm1701_vm6, %vm1702_vm5 }
 0x464   : > { %v1697_v43 = vmul.f32 %v5315_v42, %v1696_v31  ;;  %v4898_v31 = vld [vmem:[#allocation27 + $0xe4] sm:$0xf0] }
 0x465   : > { %v4233_v32 = vor.u32 %v4898_v31, %v4232_v41  ;;  %v4872_v41 = vld [vmem:[#allocation27 + $0x14] sm:$0xf0] }
 0x466   : > { %v1698_v44 = vmul.f32 0.5, %v1697_v43  ;;  %v4881_v43 = vld [vmem:[#allocation27 + $0x64] sm:$0xf] }
 0x467   : > { %2236 = vmatpush.bf16.msrb.mxu3 %v4233_v32  ;;  %v4130_v32 = vld [vmem:[#allocation27 + $0x18] sm:$0xf0] }
 0x468   : > { %v1699_v45 = vsub.f32 1.5, %v1698_v44  ;;  %v4170_v44 = vld [vmem:[#allocation27 + $0x68] sm:$0xf0] }
 0x46a   : > { %v1700_v46 = vmul.f32 %v5315_v42, %v1699_v45  ;;  %v4173_v45 = vor.u32 %v4881_v43, %v4170_v44  ;;  %v4888_v43 = vld [vmem:[#allocation27 + $0x94] sm:$0xf0]  ;;  %v4871_v44 = vld [vmem:[#allocation27 + $0x14] sm:$0xf] }
 0x46c   : > { %v1704_v50 = vsel %vm1703_vm7, %v5315_v42, %v1700_v46  ;;  %v4169_v42 = vor.u32 %v4882_v40, %v4168_v39  ;;  %v4897_v46 = vld [vmem:[#allocation27 + $0xe4] sm:$0xf]  ;;  %2249 = vmatpush.bf16.msra.mxu0 %v4173_v45  ;;  %v4205_v39 = vor.u32 %v4889_v37, %v4202_v38  ;;  %v4128_v40 = vld [vmem:[#allocation27 + $0x10] sm:$0xf] }
 0x46d   : > { %v1705_v51 = vmul.f32 %v1704_v50, %v6552_v56  ;;  %v1706_v52 = vmul.f32 %v1704_v50, %v6554_v57  ;;  %v1761_v57 = vld [vmem:[#allocation23] sm:$0x3]  ;;  %v4129_v31 = vor.u32 %v4872_v41, %v4128_v40 }
 0x46e   : > { %v1764_v4 = vperm.slane %v1761_v57, 1  ;;  %v1763_v6 = vperm.slane %v1761_v57, 0  ;;  %2223 = vmatpush.bf16.msrb.mxu2 %v4169_v42  ;;  %v4880_v50 = vld [vmem:[#allocation27 + $0x54] sm:$0xf0]  ;;  %v4216_v57 = vld [vmem:[#allocation27 + $0xc0] sm:$0xf] }
 0x46f   : > { %v1713_v55 = vmul.f32 %v1709_v48, %v1705_v51  ;;  %v1714_v58 = vmul.f32 %v1710_v49, %v1706_v52  ;;  %v4237_v48 = vor.u32 %v4897_v46, %v4234_v47  ;;  %v4160_v49 = vld [vmem:[#allocation27 + $0x50] sm:$0xf]  ;;  %v4133_v46 = vor.u32 %v4871_v44, %v4130_v32  ;;  %v4887_v47 = vld [vmem:[#allocation27 + $0x94] sm:$0xf] }
 0x470   : > { %v4224_v51 = vld [vmem:[#allocation27 + $0xd0] sm:$0xf]  ;;  %v4161_v52 = vor.u32 %v4880_v50, %v4160_v49  ;;  %v4120_v49 = vld [vmem:[#allocation27] sm:$0xf] }
 0x471   : > { %v1721_v59 = vadd.f32 %v1717_v53, %v1713_v55  ;;  %v1722_v60 = vadd.f32 %v1718_v54, %v1714_v58  ;;  %2262 = vmatpush.bf16.msra.mxu1 %v4237_v48  ;;  %v4896_v53 = vld [vmem:[#allocation27 + $0xd4] sm:$0xf0]  ;;  %v4879_v54 = vld [vmem:[#allocation27 + $0x54] sm:$0xf]  ;;  %v4162_v55 = vld [vmem:[#allocation27 + $0x58] sm:$0xf0] }
 0x472   : > { %v4225_v58 = vor.u32 %v4896_v53, %v4224_v51  ;;  %2224 = vmatpush.bf16.msrb.mxu2 %v4161_v52  ;;  %v4192_v42 = vld [vmem:[#allocation27 + $0x90] sm:$0xf]  ;;  %v4194_v48 = vld [vmem:[#allocation27 + $0x98] sm:$0xf0]  ;;  %v4870_v51 = vld [vmem:[#allocation27 + $0x4] sm:$0xf0] }
 0x473   : > { %v1723_v61 = vadd.f32 %v1721_v59, %v6529_v0  ;;  %v1724_v62 = vadd.f32 %v1722_v60, %v6531_v1  ;;  %v4165_v59 = vor.u32 %v4879_v54, %v4162_v55  ;;  %v4895_v60 = vld [vmem:[#allocation27 + $0xd4] sm:$0xf]  ;;  %v4193_v45 = vor.u32 %v4888_v43, %v4192_v42  ;;  %v4184_v52 = vld [vmem:[#allocation27 + $0x80] sm:$0xf]  ;;  %v4886_v53 = vld [vmem:[#allocation27 + $0x84] sm:$0xf0] }
 0x474   : > { %2237 = vmatpush.bf16.msrb.mxu3 %v4225_v58  ;;  %v4197_v50 = vor.u32 %v4887_v47, %v4194_v48  ;;  %v4121_v54 = vor.u32 %v4870_v51, %v4120_v49  ;;  %v4869_v55 = vld [vmem:[#allocation27 + $0x4] sm:$0xf]  ;;  %v4122_v58 = vld [vmem:[#allocation27 + $0x8] sm:$0xf0] }
 0x475   : > { %v6565_v63 = vmax.f32 %v1723_v61, 0.0  ;;  %v6567_v2 = vmax.f32 %v1724_v62, 0.0  ;;  %v4226_v61 = vld [vmem:[#allocation27 + $0xd8] sm:$0xf0]  ;;  %2250 = vmatpush.bf16.msra.mxu0 %v4165_v59  ;;  %v4885_v59 = vld [vmem:[#allocation27 + $0x84] sm:$0xf] }
 0x476   : > { %v4229_v62 = vor.u32 %v4895_v60, %v4226_v61  ;;  %v4185_v60 = vor.u32 %v4886_v53, %v4184_v52  ;;  %v4125_v61 = vor.u32 %v4869_v55, %v4122_v58 }
 0x477   : > { %v1727_v3 = vpack.c.bf16 %v6565_v63, %v6565_v63  ;;  %v1728_v56 = vpack.c.bf16 %v6567_v2, %v6567_v2 }
 0x478   : > { %2263 = vmatpush.bf16.msra.mxu1 %v4229_v62  ;;  %v4186_v62 = vld [vmem:[#allocation27 + $0x88] sm:$0xf0] }
 0x479   : > { %1935 = vmatmul.bf16.vlgmr.msra.gmra.mxu2 %v1727_v3  ;;  %1948 = vmatmul.bf16.vlgmr.msra.gmra.mxu3 %v1728_v56 }
 0x47a   : > { %1961 = vmatmul.bf16.vlgmr.msrb.gmra.mxu0 %v1727_v3  ;;  %1974 = vmatmul.bf16.vlgmr.msrb.gmra.mxu1 %v1728_v56  ;;  %v4152_v3 = vld [vmem:[#allocation27 + $0x40] sm:$0xf]  ;;  %v4878_v56 = vld [vmem:[#allocation27 + $0x44] sm:$0xf0] }
 0x4f7   : > { %v1962_v5 = vpop.f32.mrf.mxu0  ;;  %v1975_v0 = vpop.f32.mrf.mxu1 }
 0x4f8   : > { %v1963_v1 = vadd.f32 %v1962_v5, %v1764_v4  ;;  %v4153_v4 = vor.u32 %v4878_v56, %v4152_v3  ;;  %v4894_v5 = vld [vmem:[#allocation27 + $0xc4] sm:$0xf0]  ;;  %v4189_v3 = vor.u32 %v4885_v59, %v4186_v62  ;;  %v2299_v59 = vld [vmem:[#allocation30] sm:$0x3] }
 0x4fa   : > { %v1976_v10 = vadd.f32 %v1975_v0, %v1963_v1  ;;  %v4877_v0 = vld [vmem:[#allocation27 + $0x44] sm:$0xf]  ;;  %v4217_v1 = vor.u32 %v4894_v5, %v4216_v57  ;;  %2225 = vmatpush.bf16.msrb.mxu2 %v4153_v4 }
 0x4fc   : > { %v1936_v7 = vpop.f32.mrf.mxu2  ;;  %v1949_v8 = vpop.f32.mrf.mxu3  ;;  %2238 = vmatpush.bf16.msrb.mxu3 %v4217_v1 }
 0x4fd   : > { %v1937_v9 = vadd.f32 %v1936_v7, %v1763_v6  ;;  %v4154_v6 = vld [vmem:[#allocation27 + $0x48] sm:$0xf0] }
 0x4fe   : > { %v4157_v7 = vor.u32 %v4877_v0, %v4154_v6 }
 0x4ff   : > { %v1950_v11 = vadd.f32 %v1949_v8, %v1937_v9  ;;  %v1964_v12 = vpop.f32.mrf.mxu0  ;;  %v1977_v13 = vpop.f32.mrf.mxu1  ;;  %v4893_v8 = vld [vmem:[#allocation27 + $0xc4] sm:$0xf]  ;;  %v4218_v9 = vld [vmem:[#allocation27 + $0xc8] sm:$0xf0] }
 0x500   : > { %2251 = vmatpush.bf16.msra.mxu0 %v4157_v7  ;;  %v4876_v12 = vld [vmem:[#allocation27 + $0x34] sm:$0xf0]  ;;  %v4208_v13 = vld [vmem:[#allocation27 + $0xb0] sm:$0xf] }
 0x501   : > { %v1979_v14 = vadd.f32 %v1976_v10, %v1950_v11 }
 0x503   : > { %1980 = vadd.xlane.f32.xlu2 %v1979_v14 }
 0x504   : > { %v1938_v15 = vpop.f32.mrf.mxu2  ;;  %v1951_v16 = vpop.f32.mrf.mxu3 }
 0x505   : > { %v4892_v15 = vld [vmem:[#allocation27 + $0xb4] sm:$0xf0]  ;;  %v4875_v16 = vld [vmem:[#allocation27 + $0x34] sm:$0xf] }
 0x576   : > { %v1981_v17 = vpop.xlane.xlu2 %1980 }
 0x577   : > { %v1982_v18 = vmul.f32 %v1981_v17, %v6537_v28  ;;  %v4146_v17 = vld [vmem:[#allocation27 + $0x38] sm:$0xf0] }
 0x579   : > { %v6574_v19 = vsub.f32 %v1950_v11, %v1982_v18  ;;  %v6576_v20 = vsub.f32 %v1976_v10, %v1982_v18  ;;  %v4221_v10 = vor.u32 %v4893_v8, %v4218_v9  ;;  %v4144_v11 = vld [vmem:[#allocation27 + $0x30] sm:$0xf]  ;;  %v4209_v18 = vor.u32 %v4892_v15, %v4208_v13  ;;  %v2004_v8 = vld [vmem:[#allocation24] sm:$0x3] }
 0x57a   : > { %v4145_v14 = vor.u32 %v4876_v12, %v4144_v11  ;;  %v2006_v11 = vperm.slane %v2004_v8, 0  ;;  %v2007_v12 = vperm.slane %v2004_v8, 1 }
 0x57b   : > { %v1985_v21 = vmul.f32 %v6574_v19, %v6574_v19  ;;  %v1986_v22 = vmul.f32 %v6576_v20, %v6576_v20  ;;  %2264 = vmatpush.bf16.msra.mxu1 %v4221_v10  ;;  %2239 = vmatpush.bf16.msrb.mxu3 %v4209_v18  ;;  %v2012_v10 = vld [vmem:[#allocation26] sm:$0x3] }
 0x57c   : > { %2226 = vmatpush.bf16.msrb.mxu2 %v4145_v14 }
 0x57d   : > { %v1987_v23 = vadd.f32 %v1986_v22, %v1985_v21  ;;  %v4149_v21 = vor.u32 %v4875_v16, %v4146_v17  ;;  %v4891_v22 = vld [vmem:[#allocation27 + $0xb4] sm:$0xf]  ;;  %v2014_v16 = vperm.slane %v2012_v10, 0  ;;  %v2015_v17 = vperm.slane %v2012_v10, 1 }
 0x57f   : > { %1988 = vadd.xlane.f32.xlu2 %v1987_v23  ;;  %v4210_v23 = vld [vmem:[#allocation27 + $0xb8] sm:$0xf0]  ;;  %2252 = vmatpush.bf16.msra.mxu0 %v4149_v21 }
 0x580   : > { %v4213_v24 = vor.u32 %v4891_v22, %v4210_v23  ;;  %2227 = vmatpush.bf16.msrb.mxu2 %v4137_v29  ;;  %2240 = vmatpush.bf16.msrb.mxu3 %v4201_v35  ;;  %v2056_v29 = vld [vmem:[#allocation29] sm:$0x3] }
 0x581   : > { %v2059_v30 = vperm.slane %v2056_v29, 1  ;;  %v2058_v34 = vperm.slane %v2056_v29, 0 }
 0x582   : > { %2265 = vmatpush.bf16.msra.mxu1 %v4213_v24 }
 0x583   : > { %2253 = vmatpush.bf16.msra.mxu0 %v4141_v36 }
 0x584   : > { %2228 = vmatpush.bf16.msrb.mxu2 %v4129_v31  ;;  %2241 = vmatpush.bf16.msrb.mxu3 %v4193_v45 }
 0x586   : > { %2266 = vmatpush.bf16.msra.mxu1 %v4205_v39 }
 0x587   : > { %2254 = vmatpush.bf16.msra.mxu0 %v4133_v46 }
 0x588   : > { %2229 = vmatpush.bf16.msrb.mxu2 %v4121_v54  ;;  %2242 = vmatpush.bf16.msrb.mxu3 %v4185_v60 }
 0x58a   : > { %2267 = vmatpush.bf16.msra.mxu1 %v4197_v50 }
 0x58b   : > { %2255 = vmatpush.bf16.msra.mxu0 %v4125_v61  ;;  %v2307_v61 = vld [vmem:[#allocation32] sm:$0x3] }
 0x58e   : > { %2268 = vmatpush.bf16.msra.mxu1 %v4189_v3  ;;  %v2301_v3 = vperm.slane %v2299_v59, 0 }
 0x5f2   : > { %v1989_v56 = vpop.xlane.xlu2 %1988 }
 0x5f3   : > { %v1990_v57 = vmul.f32 %v1989_v56, %v6537_v28  ;;  %v2302_v56 = vperm.slane %v2299_v59, 1 }
 0x5f5   : > { %v1991_v4 = vadd.f32 1e-05, %v1990_v57 }
 0x5f7   : > { %5316 = vrsqrt.f32 %v1991_v4  ;;  %vm1998_vm9 = vweird.f32 %v1991_v4 }
 0x5fd   : > { %v5317_v5 = vpop.eup %5316 }
 0x5fe   : > { %v1993_v0 = vmul.f32 %v5317_v5, %v1991_v4  ;;  %vm1999_vm8 = vweird.f32 %v5317_v5  ;;  %v2309_v4 = vperm.slane %v2307_v61, 0 }
 0x5ff   : > { %vm2000_vm10 = vmor %vm1998_vm9, %vm1999_vm8 }
 0x600   : > { %v1994_v6 = vmul.f32 %v5317_v5, %v1993_v0 }
 0x602   : > { %v1995_v1 = vmul.f32 0.5, %v1994_v6 }
 0x604   : > { %v1996_v7 = vsub.f32 1.5, %v1995_v1 }
 0x606   : > { %v1997_v9 = vmul.f32 %v5317_v5, %v1996_v7 }
 0x608   : > { %v2001_v13 = vsel %vm2000_vm10, %v5317_v5, %v1997_v9  ;;  %v2310_v5 = vperm.slane %v2307_v61, 1 }
 0x609   : > { %v2002_v14 = vmul.f32 %v2001_v13, %v6574_v19  ;;  %v2003_v15 = vmul.f32 %v2001_v13, %v6576_v20 }
 0x60b   : > { %v2010_v18 = vmul.f32 %v2006_v11, %v2002_v14  ;;  %v2011_v21 = vmul.f32 %v2007_v12, %v2003_v15 }
 0x60d   : > { %v2018_v22 = vadd.f32 %v2014_v16, %v2010_v18  ;;  %v2019_v23 = vadd.f32 %v2015_v17, %v2011_v21 }
 0x60f   : > { %v2020_v24 = vmax.f32 %v2018_v22, 0.0  ;;  %v2021_v25 = vmax.f32 %v2019_v23, 0.0 }
 0x611   : > { %v2022_v26 = vpack.c.bf16 %v2020_v24, %v2020_v24  ;;  %v2023_v27 = vpack.c.bf16 %v2021_v25, %v2021_v25 }
 0x613   : > { %2230 = vmatmul.bf16.vlgmr.msrb.gmra.mxu2 %v2022_v26  ;;  %2243 = vmatmul.bf16.vlgmr.msrb.gmra.mxu3 %v2023_v27 }
 0x614   : > { %2256 = vmatmul.bf16.vlgmr.msra.gmra.mxu0 %v2022_v26  ;;  %2269 = vmatmul.bf16.vlgmr.msra.gmra.mxu1 %v2023_v27 }
 0x691   : > { %v2257_v33 = vpop.f32.mrf.mxu0  ;;  %v2270_v19 = vpop.f32.mrf.mxu1 }
 0x692   : > { %v2258_v20 = vadd.f32 %v2257_v33, %v2059_v30 }
 0x694   : > { %v2271_v38 = vadd.f32 %v2270_v19, %v2258_v20 }
 0x696   : > { %v2231_v35 = vpop.f32.mrf.mxu2  ;;  %v2244_v36 = vpop.f32.mrf.mxu3 }
 0x697   : > { %v2232_v37 = vadd.f32 %v2231_v35, %v2058_v34 }
 0x699   : > { %v2245_v39 = vadd.f32 %v2244_v36, %v2232_v37  ;;  %v2259_v40 = vpop.f32.mrf.mxu0  ;;  %v2272_v41 = vpop.f32.mrf.mxu1 }
 0x69b   : > { %v2274_v42 = vadd.f32 %v2271_v38, %v2245_v39 }
 0x69d   : > { %2275 = vadd.xlane.f32.xlu0 %v2274_v42 }
 0x69e   : > { %v2233_v31 = vpop.f32.mrf.mxu2  ;;  %v2246_v43 = vpop.f32.mrf.mxu3 }
 0x710   : > { %v2276_v44 = vpop.xlane.xlu0 %2275 }
 0x711   : > { %v2277_v32 = vmul.f32 %v2276_v44, %v6537_v28 }
 0x713   : > { %v2278_v45 = vsub.f32 %v2245_v39, %v2277_v32  ;;  %v2279_v46 = vsub.f32 %v2271_v38, %v2277_v32 }
 0x715   : > { %v2280_v47 = vmul.f32 %v2278_v45, %v2278_v45  ;;  %v2281_v48 = vmul.f32 %v2279_v46, %v2279_v46 }
 0x717   : > { %v2282_v49 = vadd.f32 %v2281_v48, %v2280_v47 }
 0x719   : > { %2283 = vadd.xlane.f32.xlu1 %v2282_v49 }
 0x78c   : > { %v2284_v50 = vpop.xlane.xlu1 %2283 }
 0x78d   : > { %v2285_v51 = vmul.f32 %v2284_v50, %v6537_v28 }
 0x78f   : > { %v2286_v52 = vadd.f32 1e-05, %v2285_v51 }
 0x791   : > { %5318 = vrsqrt.f32 %v2286_v52  ;;  %vm2293_vm12 = vweird.f32 %v2286_v52 }
 0x797   : > { %v5319_v53 = vpop.eup %5318 }
 0x798   : > { %v2288_v54 = vmul.f32 %v5319_v53, %v2286_v52  ;;  %vm2294_vm11 = vweird.f32 %v5319_v53 }
 0x799   : > { %vm2295_vm13 = vmor %vm2293_vm12, %vm2294_vm11 }
 0x79a   : > { %v2289_v55 = vmul.f32 %v5319_v53, %v2288_v54 }
 0x79c   : > { %v2290_v58 = vmul.f32 0.5, %v2289_v55 }
 0x79e   : > { %v2291_v60 = vsub.f32 1.5, %v2290_v58 }
 0x7a0   : > { %v2292_v62 = vmul.f32 %v5319_v53, %v2291_v60 }
 0x7a2   : > { %v2296_v57 = vsel %vm2295_vm13, %v5319_v53, %v2292_v62 }
 0x7a3   : > { %v2297_v0 = vmul.f32 %v2296_v57, %v2278_v45  ;;  %v2298_v28 = vmul.f32 %v2296_v57, %v2279_v46 }
 0x7a5   : > { %v2305_v6 = vmul.f32 %v2301_v3, %v2297_v0  ;;  %v2306_v1 = vmul.f32 %v2302_v56, %v2298_v28 }
 0x7a7   : > { %v2313_v7 = vadd.f32 %v2309_v4, %v2305_v6  ;;  %v2314_v8 = vadd.f32 %v2310_v5, %v2306_v1 }
 0x7a9   : > { %v2315_v9 = vadd.f32 %v2313_v7, %v6565_v63  ;;  %v2316_v10 = vadd.f32 %v2314_v8, %v6567_v2 }
 0x7ab   : > { %v2317_v11 = vmax.f32 %v2315_v9, 0.0  ;;  %v2318_v12 = vmax.f32 %v2316_v10, 0.0 }
 0x7ad   : > { %v2319_v13 = vpack.c.bf16 %v2318_v12, %v2317_v11 }
 0x7af   : > { %2320 = vst [vmem:[#allocation2] sm:$0xff] %v2319_v13 }
 0x7b0 PF: > { %v4472_v14 = vld [vmem:[%s6514_s14 + $0x1c0] sm:$0xf]  ;;  %v4957_v17 = vld [vmem:[%s6514_s14 + $0x1c4] sm:$0xf]  ;;  %s7017_s12 = sld [smem:[#allocation50_spill]]  ;;  %s3347_s5 = sshll.u32 %s6524_s16, 4  ;;  %s3348_s5 = int_to_ptr.vmem [resolvable:$true] %s3347_s5 }
 0x7b1   : > { %v4961_v63 = vld [vmem:[%s6514_s14 + $0x1dc] sm:$0xf0]  ;;  %v4474_v18 = vld [vmem:[%s6514_s14 + $0x1e0] sm:$0xf0]  ;;  %s7018_s19 = sld [smem:[#allocation49_spill]]  ;;  %s3332_s24 = scalar_lea.sflag [#allocation5], %s6511_s1 }
 0x7b2   : > { %v4728_v2 = vld [vmem:[%s6514_s14 + $0x3c0] sm:$0xf]  ;;  %v4473_v15 = vor.u32 %v4961_v63, %v4472_v14  ;;  %v4477_v22 = vor.u32 %v4957_v17, %v4474_v18  ;;  %v5021_v23 = vld [vmem:[%s6514_s14 + $0x3c4] sm:$0xf]  ;;  %s7019_s7 = sld [smem:[#allocation77_spill]] }
 0x7b3   : > { %v5025_v16 = vld [vmem:[%s6514_s14 + $0x3dc] sm:$0xf0]  ;;  %v4730_v24 = vld [vmem:[%s6514_s14 + $0x3e0] sm:$0xf0] }
 0x7b4   : > { %v4729_v21 = vor.u32 %v5025_v16, %v4728_v2  ;;  %v4440_v25 = vld [vmem:[%s6514_s14 + $0x180] sm:$0xf]  ;;  %3115 = vmatpush.bf16.msra.mxu0 %v4473_v15  ;;  %v4733_v26 = vor.u32 %v5021_v23, %v4730_v24  ;;  %3141 = vmatpush.bf16.msra.mxu2 %v4477_v22  ;;  %v4949_v34 = vld [vmem:[%s6514_s14 + $0x184] sm:$0xf] }
 0x7b5   : > { %v4953_v27 = vld [vmem:[%s6514_s14 + $0x19c] sm:$0xf0]  ;;  %v4442_v20 = vld [vmem:[%s6514_s14 + $0x1a0] sm:$0xf0] }
 0x7b6   : > { %v4696_v29 = vld [vmem:[%s6514_s14 + $0x380] sm:$0xf]  ;;  %3128 = vmatpush.bf16.msra.mxu1 %v4729_v21  ;;  %v4441_v33 = vor.u32 %v4953_v27, %v4440_v25  ;;  %v5013_v35 = vld [vmem:[%s6514_s14 + $0x384] sm:$0xf]  ;;  %3154 = vmatpush.bf16.msra.mxu3 %v4733_v26  ;;  %v4445_v36 = vor.u32 %v4949_v34, %v4442_v20  ;;  %s4759_s29 = sshll.u32 %s7017_s12, 1 }
 0x7b7   : > { %v5017_v30 = vld [vmem:[%s6514_s14 + $0x39c] sm:$0xf0]  ;;  %v4698_v37 = vld [vmem:[%s6514_s14 + $0x3a0] sm:$0xf0]  ;;  %s3340_s8 = sadd.s32 %s7018_s19, %s4759_s29 }
 0x7b8   : > { %v4697_v19 = vor.u32 %v5017_v30, %v4696_v29  ;;  %v4408_v38 = vld [vmem:[%s6514_s14 + $0x140] sm:$0xf]  ;;  %v4701_v40 = vor.u32 %v5013_v35, %v4698_v37  ;;  %v4941_v31 = vld [vmem:[%s6514_s14 + $0x144] sm:$0xf]  ;;  %3116 = vmatpush.bf16.msra.mxu0 %v4441_v33  ;;  %3142 = vmatpush.bf16.msra.mxu2 %v4445_v36  ;;  %s5029_s11 = sshll.u32 %s3340_s8, 6  ;;  %s5970_s18 = scalar_lea.hbm %s7019_s7, 256 }
 0x7b9   : > { %v4945_v39 = vld [vmem:[%s6514_s14 + $0x15c] sm:$0xf0]  ;;  %v4410_v44 = vld [vmem:[%s6514_s14 + $0x160] sm:$0xf0]  ;;  %s3345_s10 = scalar_lea.hbm %s7019_s7, %s5029_s11 }
 0x7ba   : > { %v4664_v41 = vld [vmem:[%s6514_s14 + $0x340] sm:$0xf]  ;;  %v4409_v43 = vor.u32 %v4945_v39, %v4408_v38  ;;  %v5005_v32 = vld [vmem:[%s6514_s14 + $0x344] sm:$0xf]  ;;  %3129 = vmatpush.bf16.msra.mxu1 %v4697_v19  ;;  %v4413_v47 = vor.u32 %v4941_v31, %v4410_v44  ;;  %3155 = vmatpush.bf16.msra.mxu3 %v4701_v40  ;;  %v4480_v31 = vld [vmem:[%s6514_s14 + $0x1c8] sm:$0xf] }
 0x7bb   : > { %v5009_v42 = vld [vmem:[%s6514_s14 + $0x35c] sm:$0xf0]  ;;  %v4666_v45 = vld [vmem:[%s6514_s14 + $0x360] sm:$0xf0]  ;;  %v4736_v44 = vld [vmem:[%s6514_s14 + $0x3c8] sm:$0xf] }
 0x7bc   : > { %v4665_v46 = vor.u32 %v5009_v42, %v4664_v41  ;;  %v4376_v48 = vld [vmem:[%s6514_s14 + $0x100] sm:$0xf]  ;;  %v4669_v51 = vor.u32 %v5005_v32, %v4666_v45  ;;  %v4933_v53 = vld [vmem:[%s6514_s14 + $0x104] sm:$0xf]  ;;  %3117 = vmatpush.bf16.msra.mxu0 %v4409_v43  ;;  %3143 = vmatpush.bf16.msra.mxu2 %v4413_v47  ;;  %v4962_v43 = vld [vmem:[%s6514_s14 + $0x1e4] sm:$0xf0] }
 0x7bd   : > { %v4937_v49 = vld [vmem:[%s6514_s14 + $0x11c] sm:$0xf0]  ;;  %v4378_v54 = vld [vmem:[%s6514_s14 + $0x120] sm:$0xf0]  ;;  %v5026_v45 = vld [vmem:[%s6514_s14 + $0x3e4] sm:$0xf0] }
 0x7be   : > { %v4632_v50 = vld [vmem:[%s6514_s14 + $0x300] sm:$0xf]  ;;  %v4997_v55 = vld [vmem:[%s6514_s14 + $0x304] sm:$0xf]  ;;  %v4377_v59 = vor.u32 %v4937_v49, %v4376_v48  ;;  %3130 = vmatpush.bf16.msra.mxu1 %v4665_v46  ;;  %v4381_v61 = vor.u32 %v4933_v53, %v4378_v54  ;;  %3156 = vmatpush.bf16.msra.mxu3 %v4669_v51  ;;  %v4958_v46 = vld [vmem:[%s6514_s14 + $0x1cc] sm:$0xf]  ;;  %v4481_v53 = vor.u32 %v4962_v43, %v4480_v31 }
 0x7bf   : > { %v5001_v52 = vld [vmem:[%s6514_s14 + $0x31c] sm:$0xf0]  ;;  %v4634_v58 = vld [vmem:[%s6514_s14 + $0x320] sm:$0xf0]  ;;  %v4482_v47 = vld [vmem:[%s6514_s14 + $0x1e8] sm:$0xf0]  ;;  %v4737_v54 = vor.u32 %v5026_v45, %v4736_v44 }
 0x7c0   : > { %v4633_v60 = vor.u32 %v5001_v52, %v4632_v50  ;;  %v4344_v62 = vld [vmem:[%s6514_s14 + $0xc0] sm:$0xf]  ;;  %v4637_v57 = vor.u32 %v4997_v55, %v4634_v58  ;;  %v4925_v5 = vld [vmem:[%s6514_s14 + $0xc4] sm:$0xf]  ;;  %3118 = vmatpush.bf16.msra.mxu0 %v4377_v59  ;;  %3144 = vmatpush.bf16.msra.mxu2 %v4381_v61  ;;  %v5022_v50 = vld [vmem:[%s6514_s14 + $0x3cc] sm:$0xf]  ;;  %v4485_v55 = vor.u32 %v4958_v46, %v4482_v47 }
 0x7c1   : > { %v4929_v3 = vld [vmem:[%s6514_s14 + $0xdc] sm:$0xf0]  ;;  %v4346_v0 = vld [vmem:[%s6514_s14 + $0xe0] sm:$0xf0]  ;;  %v4738_v51 = vld [vmem:[%s6514_s14 + $0x3e8] sm:$0xf0] }
 0x7c2   : > { %v4600_v56 = vld [vmem:[%s6514_s14 + $0x2c0] sm:$0xf]  ;;  %v4989_v28 = vld [vmem:[%s6514_s14 + $0x2c4] sm:$0xf]  ;;  %v4345_v1 = vor.u32 %v4929_v3, %v4344_v62  ;;  %3131 = vmatpush.bf16.msra.mxu1 %v4633_v60  ;;  %v4349_v8 = vor.u32 %v4925_v5, %v4346_v0  ;;  %3157 = vmatpush.bf16.msra.mxu3 %v4637_v57  ;;  %v4448_v58 = vld [vmem:[%s6514_s14 + $0x188] sm:$0xf]  ;;  %v4741_v61 = vor.u32 %v5022_v50, %v4738_v51 }
 0x7c3   : > { %v4993_v4 = vld [vmem:[%s6514_s14 + $0x2dc] sm:$0xf0]  ;;  %v4602_v6 = vld [vmem:[%s6514_s14 + $0x2e0] sm:$0xf0]  ;;  %v4954_v59 = vld [vmem:[%s6514_s14 + $0x1a4] sm:$0xf0] }
 0x7c4   : > { %v4601_v7 = vor.u32 %v4993_v4, %v4600_v56  ;;  %v4312_v9 = vld [vmem:[%s6514_s14 + $0x80] sm:$0xf]  ;;  %v4605_v12 = vor.u32 %v4989_v28, %v4602_v6  ;;  %v4917_v14 = vld [vmem:[%s6514_s14 + $0x84] sm:$0xf]  ;;  %3119 = vmatpush.bf16.msra.mxu0 %v4345_v1  ;;  %3145 = vmatpush.bf16.msra.mxu2 %v4349_v8  ;;  %v4704_v60 = vld [vmem:[%s6514_s14 + $0x388] sm:$0xf]  ;;  %v4449_v5 = vor.u32 %v4954_v59, %v4448_v58 }
 0x7c5   : > { %v4921_v10 = vld [vmem:[%s6514_s14 + $0x9c] sm:$0xf0]  ;;  %v4314_v63 = vld [vmem:[%s6514_s14 + $0xa0] sm:$0xf0]  ;;  %v5018_v62 = vld [vmem:[%s6514_s14 + $0x3a4] sm:$0xf0] }
 0x7c6   : > { %v4568_v11 = vld [vmem:[%s6514_s14 + $0x280] sm:$0xf]  ;;  %v4981_v2 = vld [vmem:[%s6514_s14 + $0x284] sm:$0xf]  ;;  %v4313_v16 = vor.u32 %v4921_v10, %v4312_v9  ;;  %3132 = vmatpush.bf16.msra.mxu1 %v4601_v7  ;;  %v4317_v18 = vor.u32 %v4917_v14, %v4314_v63  ;;  %3158 = vmatpush.bf16.msra.mxu3 %v4605_v12  ;;  %v4950_v3 = vld [vmem:[%s6514_s14 + $0x18c] sm:$0xf]  ;;  %v4705_v0 = vor.u32 %v5018_v62, %v4704_v60 }
 0x7c7   : > { %v4985_v13 = vld [vmem:[%s6514_s14 + $0x29c] sm:$0xf0]  ;;  %v4570_v15 = vld [vmem:[%s6514_s14 + $0x2a0] sm:$0xf0]  ;;  %v4450_v56 = vld [vmem:[%s6514_s14 + $0x1a8] sm:$0xf0] }
 0x7c8   : > { %v4569_v17 = vor.u32 %v4985_v13, %v4568_v11  ;;  %v4280_v21 = vld [vmem:[%s6514_s14 + $0x40] sm:$0xf]  ;;  %v4573_v24 = vor.u32 %v4981_v2, %v4570_v15  ;;  %v4909_v26 = vld [vmem:[%s6514_s14 + $0x44] sm:$0xf]  ;;  %3120 = vmatpush.bf16.msra.mxu0 %v4313_v16  ;;  %3146 = vmatpush.bf16.msra.mxu2 %v4317_v18  ;;  %v5014_v57 = vld [vmem:[%s6514_s14 + $0x38c] sm:$0xf]  ;;  %v4453_v28 = vor.u32 %v4950_v3, %v4450_v56 }
 0x7c9   : > { %v4913_v22 = vld [vmem:[%s6514_s14 + $0x5c] sm:$0xf0]  ;;  %v4282_v27 = vld [vmem:[%s6514_s14 + $0x60] sm:$0xf0]  ;;  %v4706_v4 = vld [vmem:[%s6514_s14 + $0x3a8] sm:$0xf0] }
 0x7ca   : > { %v4536_v23 = vld [vmem:[%s6514_s14 + $0x240] sm:$0xf]  ;;  %v4973_v29 = vld [vmem:[%s6514_s14 + $0x244] sm:$0xf]  ;;  %v4281_v33 = vor.u32 %v4913_v22, %v4280_v21  ;;  %3133 = vmatpush.bf16.msra.mxu1 %v4569_v17  ;;  %v4285_v35 = vor.u32 %v4909_v26, %v4282_v27  ;;  %3159 = vmatpush.bf16.msra.mxu3 %v4573_v24  ;;  %v4416_v6 = vld [vmem:[%s6514_s14 + $0x148] sm:$0xf]  ;;  %v4709_v8 = vor.u32 %v5014_v57, %v4706_v4 }
 0x7cb   : > { %v4977_v25 = vld [vmem:[%s6514_s14 + $0x25c] sm:$0xf0]  ;;  %v4538_v30 = vld [vmem:[%s6514_s14 + $0x260] sm:$0xf0]  ;;  %v4946_v1 = vld [vmem:[%s6514_s14 + $0x164] sm:$0xf0] }
 0x7cc   : > { %v4248_v19 = vld [vmem:[%s6514_s14] sm:$0xf]  ;;  %v4537_v20 = vor.u32 %v4977_v25, %v4536_v23  ;;  %v4901_v38 = vld [vmem:[%s6514_s14 + $0x4] sm:$0xf]  ;;  %v4541_v39 = vor.u32 %v4973_v29, %v4538_v30  ;;  %3121 = vmatpush.bf16.msra.mxu0 %v4281_v33  ;;  %3147 = vmatpush.bf16.msra.mxu2 %v4285_v35  ;;  %v4672_v7 = vld [vmem:[%s6514_s14 + $0x348] sm:$0xf]  ;;  %v4417_v14 = vor.u32 %v4946_v1, %v4416_v6 }
 0x7cd   : > { %v4905_v34 = vld [vmem:[%s6514_s14 + $0x1c] sm:$0xf0]  ;;  %v4250_v40 = vld [vmem:[%s6514_s14 + $0x20] sm:$0xf0]  ;;  %v5010_v9 = vld [vmem:[%s6514_s14 + $0x364] sm:$0xf0] }
 0x7ce   : > { %v4504_v36 = vld [vmem:[%s6514_s14 + $0x200] sm:$0xf]  ;;  %v4965_v41 = vld [vmem:[%s6514_s14 + $0x204] sm:$0xf]  ;;  %v4249_v32 = vor.u32 %v4905_v34, %v4248_v19  ;;  %3134 = vmatpush.bf16.msra.mxu1 %v4537_v20  ;;  %v4253_v49 = vor.u32 %v4901_v38, %v4250_v40  ;;  %3160 = vmatpush.bf16.msra.mxu3 %v4541_v39  ;;  %v4942_v10 = vld [vmem:[%s6514_s14 + $0x14c] sm:$0xf]  ;;  %v4673_v2 = vor.u32 %v5010_v9, %v4672_v7 }
 0x7cf   : > { %v4969_v37 = vld [vmem:[%s6514_s14 + $0x21c] sm:$0xf0]  ;;  %v4506_v42 = vld [vmem:[%s6514_s14 + $0x220] sm:$0xf0]  ;;  %v4418_v11 = vld [vmem:[%s6514_s14 + $0x168] sm:$0xf0] }
 0x7d0   : > { %v4505_v48 = vor.u32 %v4969_v37, %v4504_v36  ;;  %v4509_v52 = vor.u32 %v4965_v41, %v4506_v42  ;;  %3122 = vmatpush.bf16.msra.mxu0 %v4249_v32  ;;  %3148 = vmatpush.bf16.msra.mxu2 %v4253_v49  ;;  %v5006_v12 = vld [vmem:[%s6514_s14 + $0x34c] sm:$0xf]  ;;  %v2321_v63 = vld [vmem:[#allocation2] sm:$0xff]  ;;  %v4421_v15 = vor.u32 %v4942_v10, %v4418_v11  ;;  %v4384_v16 = vld [vmem:[%s6514_s14 + $0x108] sm:$0xf]  ;;  %s3349_s22 = sshll.u32 %s3345_s10, 4  ;;  %s3350_s22 = int_to_ptr.hbm [resolvable:$true] %s3349_s22 }
 0x7d1   : > { %v4674_v13 = vld [vmem:[%s6514_s14 + $0x368] sm:$0xf0]  ;;  %v4938_v17 = vld [vmem:[%s6514_s14 + $0x124] sm:$0xf0]  ;;  %v2469_v21 = vunpack.c.l.b16 %v2321_v63  ;;  %v2470_v22 = vunpack.c.h.b16 %v2321_v63  ;;  %v4488_v63 = vld [vmem:[%s6514_s14 + $0x1d0] sm:$0xf] }
 0x7d2   : > { %3135 = vmatpush.bf16.msra.mxu1 %v4505_v48  ;;  %3161 = vmatpush.bf16.msra.mxu3 %v4509_v52  ;;  %v4640_v18 = vld [vmem:[%s6514_s14 + $0x308] sm:$0xf]  ;;  %v4677_v23 = vor.u32 %v5006_v12, %v4674_v13  ;;  %v4934_v25 = vld [vmem:[%s6514_s14 + $0x10c] sm:$0xf]  ;;  %v4385_v19 = vor.u32 %v4938_v17, %v4384_v16  ;;  %v5027_v17 = vld [vmem:[%s6514_s14 + $0x3ec] sm:$0xf0] }
 0x7d3   : > { %v5002_v24 = vld [vmem:[%s6514_s14 + $0x324] sm:$0xf0]  ;;  %v4386_v26 = vld [vmem:[%s6514_s14 + $0x128] sm:$0xf0]  ;;  %v6685_v30 = vpack.c.b16 %v2469_v21, %v2469_v21  ;;  %v6687_v33 = vpack.c.b16 %v2470_v22, %v2470_v22  ;;  %v4490_v21 = vld [vmem:[%s6514_s14 + $0x1f0] sm:$0xf0] }
 0x7d4   : > { %3167 = vmatpush.bf16.msrb.mxu0 %v4481_v53  ;;  %3193 = vmatpush.bf16.msrb.mxu2 %v4485_v55  ;;  %v4998_v27 = vld [vmem:[%s6514_s14 + $0x30c] sm:$0xf]  ;;  %v4641_v34 = vor.u32 %v5002_v24, %v4640_v18  ;;  %v4389_v20 = vor.u32 %v4934_v25, %v4386_v26  ;;  %v4352_v35 = vld [vmem:[%s6514_s14 + $0xc8] sm:$0xf]  ;;  %v4959_v18 = vld [vmem:[%s6514_s14 + $0x1d4] sm:$0xf] }
 0x7d5   : > { %v4642_v29 = vld [vmem:[%s6514_s14 + $0x328] sm:$0xf0]  ;;  %v4930_v36 = vld [vmem:[%s6514_s14 + $0xe4] sm:$0xf0]  ;;  %3149 = vmatmul.bf16.vlgmr.msra.gmra.mxu2 %v6685_v30  ;;  %3162 = vmatmul.bf16.vlgmr.msra.gmra.mxu3 %v6687_v33  ;;  %v5023_v24 = vld [vmem:[%s6514_s14 + $0x3d4] sm:$0xf] }
 0x7d6   : > { %3180 = vmatpush.bf16.msrb.mxu1 %v4737_v54  ;;  %3206 = vmatpush.bf16.msrb.mxu3 %v4741_v61  ;;  %v4608_v37 = vld [vmem:[%s6514_s14 + $0x2c8] sm:$0xf]  ;;  %v4645_v38 = vor.u32 %v4998_v27, %v4642_v29  ;;  %v4926_v40 = vld [vmem:[%s6514_s14 + $0xcc] sm:$0xf]  ;;  %v4353_v43 = vor.u32 %v4930_v36, %v4352_v35  ;;  %v4746_v25 = vld [vmem:[%s6514_s14 + $0x3f0] sm:$0xf0] }
 0x7d7   : > { %v4994_v39 = vld [vmem:[%s6514_s14 + $0x2e4] sm:$0xf0]  ;;  %v4354_v41 = vld [vmem:[%s6514_s14 + $0xe8] sm:$0xf0]  ;;  %3123 = vmatmul.bf16.vlgmr.msra.gmra.mxu0 %v6685_v30  ;;  %3136 = vmatmul.bf16.vlgmr.msra.gmra.mxu1 %v6687_v33  ;;  %v4712_v35 = vld [vmem:[%s6514_s14 + $0x390] sm:$0xf]  ;;  %v4749_v36 = vor.u32 %v5023_v24, %v4746_v25 }
 0x7d8   : > { %3168 = vmatpush.bf16.msrb.mxu0 %v4449_v5  ;;  %3194 = vmatpush.bf16.msrb.mxu2 %v4453_v28  ;;  %v4990_v42 = vld [vmem:[%s6514_s14 + $0x2cc] sm:$0xf]  ;;  %v4609_v44 = vor.u32 %v4994_v39, %v4608_v37  ;;  %v4357_v32 = vor.u32 %v4926_v40, %v4354_v41  ;;  %v4320_v45 = vld [vmem:[%s6514_s14 + $0x88] sm:$0xf]  ;;  %v5019_v37 = vld [vmem:[%s6514_s14 + $0x3ac] sm:$0xf0] }
 0x7d9   : > { %v4610_v31 = vld [vmem:[%s6514_s14 + $0x2e8] sm:$0xf0]  ;;  %v4922_v46 = vld [vmem:[%s6514_s14 + $0xa4] sm:$0xf0]  ;;  %v4458_v39 = vld [vmem:[%s6514_s14 + $0x1b0] sm:$0xf0] }
 0x7da   : > { %3181 = vmatpush.bf16.msrb.mxu1 %v4705_v0  ;;  %3207 = vmatpush.bf16.msrb.mxu3 %v4709_v8  ;;  %v4576_v47 = vld [vmem:[%s6514_s14 + $0x288] sm:$0xf]  ;;  %v4613_v48 = vor.u32 %v4990_v42, %v4610_v31  ;;  %v4918_v50 = vld [vmem:[%s6514_s14 + $0x8c] sm:$0xf]  ;;  %v4321_v54 = vor.u32 %v4922_v46, %v4320_v45  ;;  %v5015_v40 = vld [vmem:[%s6514_s14 + $0x394] sm:$0xf]  ;;  %v4713_v31 = vor.u32 %v5019_v37, %v4712_v35 }
 0x7db   : > { %v4986_v49 = vld [vmem:[%s6514_s14 + $0x2a4] sm:$0xf0]  ;;  %v4322_v51 = vld [vmem:[%s6514_s14 + $0xa8] sm:$0xf0]  ;;  %v4714_v41 = vld [vmem:[%s6514_s14 + $0x3b0] sm:$0xf0] }
 0x7dc   : > { %3169 = vmatpush.bf16.msrb.mxu0 %v4417_v14  ;;  %3195 = vmatpush.bf16.msrb.mxu2 %v4421_v15  ;;  %v4982_v52 = vld [vmem:[%s6514_s14 + $0x28c] sm:$0xf]  ;;  %v4577_v55 = vor.u32 %v4986_v49, %v4576_v47  ;;  %v4325_v58 = vor.u32 %v4918_v50, %v4322_v51  ;;  %v4288_v59 = vld [vmem:[%s6514_s14 + $0x48] sm:$0xf]  ;;  %v4744_v15 = vld [vmem:[%s6514_s14 + $0x3d0] sm:$0xf]  ;;  %v4717_v46 = vor.u32 %v5015_v40, %v4714_v41 }
 0x7dd   : > { %v4578_v53 = vld [vmem:[%s6514_s14 + $0x2a8] sm:$0xf0]  ;;  %v4914_v60 = vld [vmem:[%s6514_s14 + $0x64] sm:$0xf0]  ;;  %v4745_v29 = vor.u32 %v5027_v17, %v4744_v15  ;;  %v4680_v45 = vld [vmem:[%s6514_s14 + $0x350] sm:$0xf] }
 0x7de   : > { %3182 = vmatpush.bf16.msrb.mxu1 %v4673_v2  ;;  %3208 = vmatpush.bf16.msrb.mxu3 %v4677_v23  ;;  %v4544_v61 = vld [vmem:[%s6514_s14 + $0x248] sm:$0xf]  ;;  %v4581_v62 = vor.u32 %v4982_v52, %v4578_v53  ;;  %v4910_v56 = vld [vmem:[%s6514_s14 + $0x4c] sm:$0xf]  ;;  %v4289_v0 = vor.u32 %v4914_v60, %v4288_v59  ;;  %v4963_v2 = vld [vmem:[%s6514_s14 + $0x1ec] sm:$0xf0] }
 0x7df   : > { %v4978_v3 = vld [vmem:[%s6514_s14 + $0x264] sm:$0xf0]  ;;  %v4290_v57 = vld [vmem:[%s6514_s14 + $0x68] sm:$0xf0]  ;;  %v4489_v27 = vor.u32 %v4963_v2, %v4488_v63  ;;  %v5011_v47 = vld [vmem:[%s6514_s14 + $0x36c] sm:$0xf0] }
 0x7e0   : > { %3170 = vmatpush.bf16.msrb.mxu0 %v4385_v19  ;;  %3196 = vmatpush.bf16.msrb.mxu2 %v4389_v20  ;;  %v4974_v4 = vld [vmem:[%s6514_s14 + $0x24c] sm:$0xf]  ;;  %v4256_v28 = vld [vmem:[%s6514_s14 + $0x8] sm:$0xf]  ;;  %v4545_v1 = vor.u32 %v4978_v3, %v4544_v61  ;;  %v4293_v7 = vor.u32 %v4910_v56, %v4290_v57  ;;  %v4493_v19 = vor.u32 %v4959_v18, %v4490_v21  ;;  %v4955_v20 = vld [vmem:[%s6514_s14 + $0x1ac] sm:$0xf0] }
 0x7e1   : > { %v4546_v5 = vld [vmem:[%s6514_s14 + $0x268] sm:$0xf0]  ;;  %v4906_v6 = vld [vmem:[%s6514_s14 + $0x24] sm:$0xf0]  ;;  %v4426_v49 = vld [vmem:[%s6514_s14 + $0x170] sm:$0xf0]  ;;  %v4681_v53 = vor.u32 %v5011_v47, %v4680_v45 }
 0x7e2   : > { %3183 = vmatpush.bf16.msrb.mxu1 %v4641_v34  ;;  %3209 = vmatpush.bf16.msrb.mxu3 %v4645_v38  ;;  %v4512_v8 = vld [vmem:[%s6514_s14 + $0x208] sm:$0xf]  ;;  %v4902_v10 = vld [vmem:[%s6514_s14 + $0xc] sm:$0xf]  ;;  %v4549_v11 = vor.u32 %v4974_v4, %v4546_v5  ;;  %v4257_v16 = vor.u32 %v4906_v6, %v4256_v28  ;;  %v4456_v34 = vld [vmem:[%s6514_s14 + $0x190] sm:$0xf] }
 0x7e3   : > { %v4970_v9 = vld [vmem:[%s6514_s14 + $0x224] sm:$0xf0]  ;;  %v4258_v12 = vld [vmem:[%s6514_s14 + $0x28] sm:$0xf0]  ;;  %v4951_v38 = vld [vmem:[%s6514_s14 + $0x194] sm:$0xf]  ;;  %v4457_v42 = vor.u32 %v4955_v20, %v4456_v34 }
 0x7e4   : > { %3171 = vmatpush.bf16.msrb.mxu0 %v4353_v43  ;;  %3197 = vmatpush.bf16.msrb.mxu2 %v4357_v32  ;;  %v4966_v13 = vld [vmem:[%s6514_s14 + $0x20c] sm:$0xf]  ;;  %v4513_v22 = vor.u32 %v4970_v9, %v4512_v8  ;;  %v4261_v23 = vor.u32 %v4902_v10, %v4258_v12  ;;  %v4461_v43 = vor.u32 %v4951_v38, %v4458_v39  ;;  %v4947_v32 = vld [vmem:[%s6514_s14 + $0x16c] sm:$0xf0]  ;;  %v5007_v50 = vld [vmem:[%s6514_s14 + $0x354] sm:$0xf] }
 0x7e5   : > { %v4514_v14 = vld [vmem:[%s6514_s14 + $0x228] sm:$0xf0]  ;;  %v4682_v51 = vld [vmem:[%s6514_s14 + $0x370] sm:$0xf0]  ;;  %v4648_v59 = vld [vmem:[%s6514_s14 + $0x310] sm:$0xf] }
 0x7e6   : > { %3184 = vmatpush.bf16.msrb.mxu1 %v4609_v44  ;;  %3210 = vmatpush.bf16.msrb.mxu3 %v4613_v48  ;;  %v4517_v26 = vor.u32 %v4966_v13, %v4514_v14  ;;  %v4424_v44 = vld [vmem:[%s6514_s14 + $0x150] sm:$0xf]  ;;  %v4943_v48 = vld [vmem:[%s6514_s14 + $0x154] sm:$0xf]  ;;  %v4685_v60 = vor.u32 %v5007_v50, %v4682_v51  ;;  %v4496_v50 = vld [vmem:[%s6514_s14 + $0x1d8] sm:$0xf] }
 0x7e7   : > { %v4425_v52 = vor.u32 %v4947_v32, %v4424_v44  ;;  %v5003_v61 = vld [vmem:[%s6514_s14 + $0x32c] sm:$0xf0]  ;;  %v4394_v3 = vld [vmem:[%s6514_s14 + $0x130] sm:$0xf0]  ;;  %v4964_v51 = vld [vmem:[%s6514_s14 + $0x1f4] sm:$0xf0] }
 0x7e8   : > { %3172 = vmatpush.bf16.msrb.mxu0 %v4321_v54  ;;  %3198 = vmatpush.bf16.msrb.mxu2 %v4325_v58  ;;  %v4429_v54 = vor.u32 %v4943_v48, %v4426_v49  ;;  %v4939_v58 = vld [vmem:[%s6514_s14 + $0x12c] sm:$0xf0]  ;;  %v4999_v56 = vld [vmem:[%s6514_s14 + $0x314] sm:$0xf]  ;;  %v4649_v5 = vor.u32 %v5003_v61, %v4648_v59  ;;  %v5024_v61 = vld [vmem:[%s6514_s14 + $0x3dc] sm:$0xf] }
 0x7e9   : > { %v4650_v57 = vld [vmem:[%s6514_s14 + $0x330] sm:$0xf0]  ;;  %v4360_v28 = vld [vmem:[%s6514_s14 + $0xd0] sm:$0xf]  ;;  %s5964_s17 = sshra.s32 %s3350_s22, 4  ;;  %s5965_s17 = int_to_ptr.hbm [resolvable:$true] %s5964_s17 }
 0x7ea   : > { %3185 = vmatpush.bf16.msrb.mxu1 %v4577_v55  ;;  %3211 = vmatpush.bf16.msrb.mxu3 %v4581_v62  ;;  %v4392_v55 = vld [vmem:[%s6514_s14 + $0x110] sm:$0xf]  ;;  %v4935_v62 = vld [vmem:[%s6514_s14 + $0x114] sm:$0xf]  ;;  %s5966_s30 = scalar_lea.hbm %s5965_s17, 64  ;;  %p5971_p10 = scmp.lt.s32.totalorder %s5965_s17, %s7019_s7 }
 0x7eb   : > { %v4393_v4 = vor.u32 %v4939_v58, %v4392_v55  ;;  %v4931_v6 = vld [vmem:[%s6514_s14 + $0xec] sm:$0xf0]  ;;  %v4927_v9 = vld [vmem:[%s6514_s14 + $0xd4] sm:$0xf]  ;;  %v4960_v55 = vld [vmem:[%s6514_s14 + $0x1dc] sm:$0xf]  ;;  %p5967_p3 = scmp.ne.s32.totalorder %s5965_s17, %s5966_s30  ;;  %p5972_p11 = scmp.lt.s32.totalorder %s5970_s18, %s5966_s30 }
 0x7ec   : > { %3173 = vmatpush.bf16.msrb.mxu0 %v4289_v0  ;;  %3199 = vmatpush.bf16.msrb.mxu2 %v4293_v7  ;;  %v4397_v0 = vor.u32 %v4935_v62, %v4394_v3  ;;  %v4653_v7 = vor.u32 %v4999_v56, %v4650_v57  ;;  %v4995_v8 = vld [vmem:[%s6514_s14 + $0x2ec] sm:$0xf0]  ;;  %v4362_v10 = vld [vmem:[%s6514_s14 + $0xf0] sm:$0xf0]  ;;  %v4361_v13 = vor.u32 %v4931_v6, %v4360_v28  ;;  %v4498_v58 = vld [vmem:[%s6514_s14 + $0x1f8] sm:$0xf0] }
 0x7ed   : > { %v4618_v12 = vld [vmem:[%s6514_s14 + $0x2f0] sm:$0xf0]  ;;  %v4365_v63 = vor.u32 %v4927_v9, %v4362_v10  ;;  %v4328_v2 = vld [vmem:[%s6514_s14 + $0x90] sm:$0xf]  ;;  %v4754_v62 = vld [vmem:[%s6514_s14 + $0x3f8] sm:$0xf0]  ;;  %v4497_v56 = vor.u32 %v4964_v51, %v4496_v50  ;;  %p5968_p5 = pnand %p5967_p3, %p6372_p0  ;;  %p5973_p12 = por %p5972_p11, %p5971_p10 }
 0x7ee   : > { %3186 = vmatpush.bf16.msrb.mxu1 %v4545_v1  ;;  %3212 = vmatpush.bf16.msrb.mxu3 %v4549_v11  ;;  %v4616_v1 = vld [vmem:[%s6514_s14 + $0x2d0] sm:$0xf]  ;;  %v4991_v11 = vld [vmem:[%s6514_s14 + $0x2d4] sm:$0xf]  ;;  %v4720_v28 = vld [vmem:[%s6514_s14 + $0x398] sm:$0xf]  ;;  %v4757_v6 = vor.u32 %v5024_v61, %v4754_v62 }
 0x7ef   : > { %v4617_v14 = vor.u32 %v4995_v8, %v4616_v1  ;;  %v4923_v15 = vld [vmem:[%s6514_s14 + $0xac] sm:$0xf0]  ;;  %v4621_v17 = vor.u32 %v4991_v11, %v4618_v12  ;;  %v4919_v21 = vld [vmem:[%s6514_s14 + $0x94] sm:$0xf]  ;;  %v5020_v1 = vld [vmem:[%s6514_s14 + $0x3b4] sm:$0xf0]  ;;  %p5969_p9 = pneg %p5968_p5 }
 0x7f0   : > { %3174 = vmatpush.bf16.msrb.mxu0 %v4257_v16  ;;  %3200 = vmatpush.bf16.msrb.mxu2 %v4261_v23  ;;  %v4584_v16 = vld [vmem:[%s6514_s14 + $0x290] sm:$0xf]  ;;  %v4983_v23 = vld [vmem:[%s6514_s14 + $0x294] sm:$0xf]  ;;  %v4329_v25 = vor.u32 %v4923_v15, %v4328_v2  ;;  %v4466_v8 = vld [vmem:[%s6514_s14 + $0x1b8] sm:$0xf0]  ;;  %v4721_v12 = vor.u32 %v5020_v1, %v4720_v28 }
 0x7f1   : > { %v4987_v18 = vld [vmem:[%s6514_s14 + $0x2ac] sm:$0xf0]  ;;  %v4586_v24 = vld [vmem:[%s6514_s14 + $0x2b0] sm:$0xf0]  ;;  %v5016_v9 = vld [vmem:[%s6514_s14 + $0x39c] sm:$0xf]  ;;  %p5974_p13 = pnand %p5973_p12, %p5969_p9 }
 0x7f2   : > { %3187 = vmatpush.bf16.msrb.mxu1 %v4513_v22  ;;  %3213 = vmatpush.bf16.msrb.mxu3 %v4517_v26  ;;  %v4330_v22 = vld [vmem:[%s6514_s14 + $0xb0] sm:$0xf0]  ;;  %v4585_v26 = vor.u32 %v4987_v18, %v4584_v16  ;;  %v4552_v34 = vld [vmem:[%s6514_s14 + $0x250] sm:$0xf]  ;;  %v4589_v20 = vor.u32 %v4983_v23, %v4586_v24  ;;  %v4722_v10 = vld [vmem:[%s6514_s14 + $0x3b8] sm:$0xf0] }
 0x7f3   : > { %3201 = vmatmul.bf16.vlgmr.msrb.gmra.mxu2 %v6685_v30  ;;  %3175 = vmatmul.bf16.vlgmr.msrb.gmra.mxu0 %v6685_v30  ;;  %v4979_v35 = vld [vmem:[%s6514_s14 + $0x26c] sm:$0xf0]  ;;  %v4298_v37 = vld [vmem:[%s6514_s14 + $0x70] sm:$0xf0]  ;;  %v4688_v2 = vld [vmem:[%s6514_s14 + $0x358] sm:$0xf]  ;;  %v4725_v15 = vor.u32 %v5016_v9, %v4722_v10 }
 0x7f4   : > { %3219 = vmatpush.bf16.msra.mxu0 %v4489_v27  ;;  %3245 = vmatpush.bf16.msra.mxu2 %v4493_v19  ;;  %v4333_v27 = vor.u32 %v4919_v21, %v4330_v22  ;;  %v4915_v19 = vld [vmem:[%s6514_s14 + $0x6c] sm:$0xf0]  ;;  %v4975_v38 = vld [vmem:[%s6514_s14 + $0x254] sm:$0xf]  ;;  %v5012_v16 = vld [vmem:[%s6514_s14 + $0x374] sm:$0xf0] }
 0x7f5   : > { %3214 = vmatmul.bf16.vlgmr.msrb.gmra.mxu3 %v6687_v33  ;;  %3188 = vmatmul.bf16.vlgmr.msrb.gmra.mxu1 %v6687_v33  ;;  %v4554_v39 = vld [vmem:[%s6514_s14 + $0x270] sm:$0xf0]  ;;  %v4264_v41 = vld [vmem:[%s6514_s14 + $0x10] sm:$0xf]  ;;  %v4434_v18 = vld [vmem:[%s6514_s14 + $0x178] sm:$0xf0]  ;;  %v4689_v24 = vor.u32 %v5012_v16, %v4688_v2 }
 0x7f6   : > { %3232 = vmatpush.bf16.msra.mxu1 %v4745_v29  ;;  %3258 = vmatpush.bf16.msra.mxu3 %v4749_v36  ;;  %v4296_v29 = vld [vmem:[%s6514_s14 + $0x50] sm:$0xf]  ;;  %v4911_v36 = vld [vmem:[%s6514_s14 + $0x54] sm:$0xf]  ;;  %v5008_v21 = vld [vmem:[%s6514_s14 + $0x35c] sm:$0xf] }
 0x7f7   : > { %v4297_v40 = vor.u32 %v4915_v19, %v4296_v29  ;;  %v4520_v44 = vld [vmem:[%s6514_s14 + $0x210] sm:$0xf]  ;;  %v4903_v45 = vld [vmem:[%s6514_s14 + $0x14] sm:$0xf]  ;;  %v4690_v22 = vld [vmem:[%s6514_s14 + $0x378] sm:$0xf0] }
 0x7f8   : > { %3220 = vmatpush.bf16.msra.mxu0 %v4457_v42  ;;  %3246 = vmatpush.bf16.msra.mxu2 %v4461_v43  ;;  %v4907_v42 = vld [vmem:[%s6514_s14 + $0x2c] sm:$0xf0]  ;;  %v4301_v43 = vor.u32 %v4911_v36, %v4298_v37  ;;  %v4266_v47 = vld [vmem:[%s6514_s14 + $0x30] sm:$0xf0]  ;;  %v4656_v29 = vld [vmem:[%s6514_s14 + $0x318] sm:$0xf]  ;;  %v4693_v19 = vor.u32 %v5008_v21, %v4690_v22 }
 0x7f9   : > { %v4971_v32 = vld [vmem:[%s6514_s14 + $0x22c] sm:$0xf0]  ;;  %v4967_v48 = vld [vmem:[%s6514_s14 + $0x214] sm:$0xf]  ;;  %v5000_v36 = vld [vmem:[%s6514_s14 + $0x31c] sm:$0xf] }
 0x7fa   : > { %3233 = vmatpush.bf16.msra.mxu1 %v4713_v31  ;;  %3259 = vmatpush.bf16.msra.mxu3 %v4717_v46  ;;  %v4553_v31 = vor.u32 %v4979_v35, %v4552_v34  ;;  %v4557_v46 = vor.u32 %v4975_v38, %v4554_v39  ;;  %v4522_v49 = vld [vmem:[%s6514_s14 + $0x230] sm:$0xf0]  ;;  %v4521_v59 = vor.u32 %v4971_v32, %v4520_v44  ;;  %v5004_v34 = vld [vmem:[%s6514_s14 + $0x334] sm:$0xf0]  ;;  %v4402_v35 = vld [vmem:[%s6514_s14 + $0x138] sm:$0xf0] }
 0x7fb   : > { %v4525_v3 = vor.u32 %v4967_v48, %v4522_v49  ;;  %v4658_v37 = vld [vmem:[%s6514_s14 + $0x338] sm:$0xf0]  ;;  %v4657_v39 = vor.u32 %v5004_v34, %v4656_v29  ;;  %v4996_v44 = vld [vmem:[%s6514_s14 + $0x2f4] sm:$0xf0] }
 0x7fc   : > { %3221 = vmatpush.bf16.msra.mxu0 %v4425_v52  ;;  %3247 = vmatpush.bf16.msra.mxu2 %v4429_v54  ;;  %v4752_v52 = vld [vmem:[%s6514_s14 + $0x3d8] sm:$0xf]  ;;  %v4928_v32 = vld [vmem:[%s6514_s14 + $0xdc] sm:$0xf] }
 0x7fd   : > { %v5028_v54 = vld [vmem:[%s6514_s14 + $0x3f4] sm:$0xf0]  ;;  %v4594_v61 = vld [vmem:[%s6514_s14 + $0x2b8] sm:$0xf0] }
 0x7fe   : > { %3234 = vmatpush.bf16.msra.mxu1 %v4681_v53  ;;  %3260 = vmatpush.bf16.msra.mxu3 %v4685_v60  ;;  %v4265_v53 = vor.u32 %v4907_v42, %v4264_v41  ;;  %v4269_v60 = vor.u32 %v4903_v45, %v4266_v47  ;;  %v4753_v57 = vor.u32 %v5028_v54, %v4752_v52  ;;  %v4368_v41 = vld [vmem:[%s6514_s14 + $0xd8] sm:$0xf]  ;;  %v4370_v45 = vld [vmem:[%s6514_s14 + $0xf8] sm:$0xf0] }
 0x7ff   : > { %v4932_v42 = vld [vmem:[%s6514_s14 + $0xf4] sm:$0xf0]  ;;  %v4626_v47 = vld [vmem:[%s6514_s14 + $0x2f8] sm:$0xf0]  ;;  %v4373_v50 = vor.u32 %v4928_v32, %v4370_v45 }
 0x800   : > { %3222 = vmatpush.bf16.msra.mxu0 %v4393_v4  ;;  %3248 = vmatpush.bf16.msra.mxu2 %v4397_v0  ;;  %v4501_v4 = vor.u32 %v4960_v55, %v4498_v58  ;;  %v4956_v0 = vld [vmem:[%s6514_s14 + $0x1b4] sm:$0xf0]  ;;  %v4369_v48 = vor.u32 %v4932_v42, %v4368_v41  ;;  %v4920_v58 = vld [vmem:[%s6514_s14 + $0x9c] sm:$0xf] }
 0x801   : > { %v4336_v51 = vld [vmem:[%s6514_s14 + $0x98] sm:$0xf]  ;;  %v4306_v1 = vld [vmem:[%s6514_s14 + $0x78] sm:$0xf0] }
 0x802   : > { %3235 = vmatpush.bf16.msra.mxu1 %v4649_v5  ;;  %3261 = vmatpush.bf16.msra.mxu3 %v4653_v7  ;;  %v4464_v5 = vld [vmem:[%s6514_s14 + $0x198] sm:$0xf]  ;;  %v4952_v7 = vld [vmem:[%s6514_s14 + $0x19c] sm:$0xf] }
 0x803   : > { %v4465_v11 = vor.u32 %v4956_v0, %v4464_v5  ;;  %v4924_v52 = vld [vmem:[%s6514_s14 + $0xb4] sm:$0xf0]  ;;  %v4274_v16 = vld [vmem:[%s6514_s14 + $0x38] sm:$0xf0] }
 0x804   : > { %3223 = vmatpush.bf16.msra.mxu0 %v4361_v13  ;;  %3249 = vmatpush.bf16.msra.mxu2 %v4365_v63  ;;  %v4469_v13 = vor.u32 %v4952_v7, %v4466_v8  ;;  %v4948_v63 = vld [vmem:[%s6514_s14 + $0x174] sm:$0xf0]  ;;  %v4337_v62 = vor.u32 %v4924_v52, %v4336_v51  ;;  %v4976_v7 = vld [vmem:[%s6514_s14 + $0x25c] sm:$0xf] }
 0x805   : > { %v4988_v55 = vld [vmem:[%s6514_s14 + $0x2b4] sm:$0xf0]  ;;  %v4562_v8 = vld [vmem:[%s6514_s14 + $0x278] sm:$0xf0] }
 0x806   : > { %3236 = vmatpush.bf16.msra.mxu1 %v4617_v14  ;;  %3262 = vmatpush.bf16.msra.mxu3 %v4621_v17  ;;  %v4432_v14 = vld [vmem:[%s6514_s14 + $0x158] sm:$0xf]  ;;  %v4944_v17 = vld [vmem:[%s6514_s14 + $0x15c] sm:$0xf] }
 0x807   : > { %v4433_v23 = vor.u32 %v4948_v63, %v4432_v14  ;;  %v4560_v5 = vld [vmem:[%s6514_s14 + $0x258] sm:$0xf]  ;;  %v4565_v63 = vor.u32 %v4976_v7, %v4562_v8 }
 0x808   : > { %3224 = vmatpush.bf16.msra.mxu0 %v4329_v25  ;;  %3250 = vmatpush.bf16.msra.mxu2 %v4333_v27  ;;  %v4437_v25 = vor.u32 %v4944_v17, %v4434_v18  ;;  %v4940_v27 = vld [vmem:[%s6514_s14 + $0x134] sm:$0xf0]  ;;  %v4968_v17 = vld [vmem:[%s6514_s14 + $0x21c] sm:$0xf] }
 0x809   : > { %v4980_v28 = vld [vmem:[%s6514_s14 + $0x274] sm:$0xf0]  ;;  %v4530_v18 = vld [vmem:[%s6514_s14 + $0x238] sm:$0xf0] }
 0x80a   : > { %3237 = vmatpush.bf16.msra.mxu1 %v4585_v26  ;;  %3263 = vmatpush.bf16.msra.mxu3 %v4589_v20  ;;  %v4400_v26 = vld [vmem:[%s6514_s14 + $0x118] sm:$0xf]  ;;  %v4936_v20 = vld [vmem:[%s6514_s14 + $0x11c] sm:$0xf]  ;;  %v4561_v10 = vor.u32 %v4980_v28, %v4560_v5 }
 0x80b   : > { %v4401_v38 = vor.u32 %v4940_v27, %v4400_v26  ;;  %v4528_v14 = vld [vmem:[%s6514_s14 + $0x218] sm:$0xf] }
 0x80c   : > { %3225 = vmatpush.bf16.msra.mxu0 %v4297_v40  ;;  %3251 = vmatpush.bf16.msra.mxu2 %v4301_v43  ;;  %v4405_v40 = vor.u32 %v4936_v20, %v4402_v35  ;;  %v4661_v43 = vor.u32 %v5000_v36, %v4658_v37  ;;  %v4972_v2 = vld [vmem:[%s6514_s14 + $0x234] sm:$0xf0] }
 0x80d   : > { %v4529_v22 = vor.u32 %v4972_v2, %v4528_v14 }
 0x80e   : > { %3238 = vmatpush.bf16.msra.mxu1 %v4553_v31  ;;  %3264 = vmatpush.bf16.msra.mxu3 %v4557_v46  ;;  %v4624_v31 = vld [vmem:[%s6514_s14 + $0x2d8] sm:$0xf]  ;;  %v4992_v46 = vld [vmem:[%s6514_s14 + $0x2dc] sm:$0xf] }
 0x80f   : > { %v4625_v49 = vor.u32 %v4996_v44, %v4624_v31  ;;  %v4629_v54 = vor.u32 %v4992_v46, %v4626_v47 }
 0x810   : > { %3226 = vmatpush.bf16.msra.mxu0 %v4265_v53  ;;  %3252 = vmatpush.bf16.msra.mxu2 %v4269_v60  ;;  %v4592_v53 = vld [vmem:[%s6514_s14 + $0x298] sm:$0xf]  ;;  %v4984_v60 = vld [vmem:[%s6514_s14 + $0x29c] sm:$0xf] }
 0x811   : > { %v4597_v0 = vor.u32 %v4984_v60, %v4594_v61 }
 0x812   : > { %3239 = vmatpush.bf16.msra.mxu1 %v4521_v59  ;;  %3265 = vmatpush.bf16.msra.mxu3 %v4525_v3  ;;  %v4338_v59 = vld [vmem:[%s6514_s14 + $0xb8] sm:$0xf0]  ;;  %v4593_v3 = vor.u32 %v4988_v55, %v4592_v53 }
 0x813   : > { %3253 = vmatmul.bf16.vlgmr.msra.gmra.mxu2 %v6685_v30  ;;  %3227 = vmatmul.bf16.vlgmr.msra.gmra.mxu0 %v6685_v30 }
 0x814   : > { %3271 = vmatpush.bf16.msrb.mxu0 %v4497_v56  ;;  %3297 = vmatpush.bf16.msrb.mxu2 %v4501_v4  ;;  %v4341_v56 = vor.u32 %v4920_v58, %v4338_v59  ;;  %v4916_v4 = vld [vmem:[%s6514_s14 + $0x74] sm:$0xf0] }
 0x815   : > { %3266 = vmatmul.bf16.vlgmr.msra.gmra.mxu3 %v6687_v33  ;;  %3240 = vmatmul.bf16.vlgmr.msra.gmra.mxu1 %v6687_v33 }
 0x816   : > { %3284 = vmatpush.bf16.msrb.mxu1 %v4753_v57  ;;  %3310 = vmatpush.bf16.msrb.mxu3 %v4757_v6  ;;  %v4304_v57 = vld [vmem:[%s6514_s14 + $0x58] sm:$0xf]  ;;  %v4912_v6 = vld [vmem:[%s6514_s14 + $0x5c] sm:$0xf] }
 0x817   : > { %v4305_v9 = vor.u32 %v4916_v4, %v4304_v57 }
 0x818   : > { %3272 = vmatpush.bf16.msrb.mxu0 %v4465_v11  ;;  %3298 = vmatpush.bf16.msrb.mxu2 %v4469_v13  ;;  %v4309_v11 = vor.u32 %v4912_v6, %v4306_v1  ;;  %v4908_v13 = vld [vmem:[%s6514_s14 + $0x34] sm:$0xf0] }
 0x81a   : > { %3285 = vmatpush.bf16.msrb.mxu1 %v4721_v12  ;;  %3311 = vmatpush.bf16.msrb.mxu3 %v4725_v15  ;;  %v4272_v12 = vld [vmem:[%s6514_s14 + $0x18] sm:$0xf]  ;;  %v4904_v15 = vld [vmem:[%s6514_s14 + $0x1c] sm:$0xf] }
 0x81b   : > { %v4273_v21 = vor.u32 %v4908_v13, %v4272_v12 }
 0x81c   : > { %3273 = vmatpush.bf16.msrb.mxu0 %v4433_v23  ;;  %3299 = vmatpush.bf16.msrb.mxu2 %v4437_v25  ;;  %v4277_v23 = vor.u32 %v4904_v15, %v4274_v16  ;;  %v6866_v25 = vld [vmem:[%s6522_s28] sm:$0xff] }
 0x81d   : > { %v2452_v26 = vperm.slane %v6866_v25, 0  ;;  %v2453_v34 = vperm.slane %v6866_v25, 1  ;;  %v2454_v41 = vperm.slane %v6866_v25, 2  ;;  %v2455_v44 = vperm.slane %v6866_v25, 3 }
 0x81e   : > { %3286 = vmatpush.bf16.msrb.mxu1 %v4689_v24  ;;  %3312 = vmatpush.bf16.msrb.mxu3 %v4693_v19  ;;  %v4533_v24 = vor.u32 %v4968_v17, %v4530_v18  ;;  %v2456_v53 = vperm.slane %v6866_v25, 4  ;;  %v2457_v59 = vperm.slane %v6866_v25, 5  ;;  %v2458_v28 = vperm.slane %v6866_v25, 6 }
 0x820   : > { %3274 = vmatpush.bf16.msrb.mxu0 %v4401_v38  ;;  %3300 = vmatpush.bf16.msrb.mxu2 %v4405_v40 }
 0x822   : > { %3287 = vmatpush.bf16.msrb.mxu1 %v4657_v39  ;;  %3313 = vmatpush.bf16.msrb.mxu3 %v4661_v43 }
 0x824   : > { %3275 = vmatpush.bf16.msrb.mxu0 %v4369_v48  ;;  %3301 = vmatpush.bf16.msrb.mxu2 %v4373_v50 }
 0x826   : > { %3288 = vmatpush.bf16.msrb.mxu1 %v4625_v49  ;;  %3314 = vmatpush.bf16.msrb.mxu3 %v4629_v54 }
 0x828   : > { %3276 = vmatpush.bf16.msrb.mxu0 %v4337_v62  ;;  %3302 = vmatpush.bf16.msrb.mxu2 %v4341_v56 }
 0x82a   : > { %3289 = vmatpush.bf16.msrb.mxu1 %v4593_v3  ;;  %3315 = vmatpush.bf16.msrb.mxu3 %v4597_v0 }
 0x82c   : > { %3277 = vmatpush.bf16.msrb.mxu0 %v4305_v9  ;;  %3303 = vmatpush.bf16.msrb.mxu2 %v4309_v11  ;;  %v2459_v9 = vperm.slane %v6866_v25, 7 }
 0x82e   : > { %3290 = vmatpush.bf16.msrb.mxu1 %v4561_v10  ;;  %3316 = vmatpush.bf16.msrb.mxu3 %v4565_v63 }
 0x830   : > { %3278 = vmatpush.bf16.msrb.mxu0 %v4273_v21  ;;  %3304 = vmatpush.bf16.msrb.mxu2 %v4277_v23 }
 0x832   : > { %3291 = vmatpush.bf16.msrb.mxu1 %v4529_v22  ;;  %3317 = vmatpush.bf16.msrb.mxu3 %v4533_v24 }
 0x833   : > { %3279 = vmatmul.bf16.vlgmr.msrb.gmra.mxu0 %v6685_v30  ;;  %3305 = vmatmul.bf16.vlgmr.msrb.gmra.mxu2 %v6685_v30 }
 0x835   : > { %3292 = vmatmul.bf16.vlgmr.msrb.gmra.mxu1 %v6687_v33  ;;  %3318 = vmatmul.bf16.vlgmr.msrb.gmra.mxu3 %v6687_v33 }
 0x854   : > { %v3124_v27 = vpop.f32.mrf.mxu0  ;;  %v3137_v19 = vpop.f32.mrf.mxu1 }
 0x855   : > { %v3125_v29 = vadd.f32 %v3124_v27, %v2452_v26 }
 0x857   : > { %v3138_v20 = vadd.f32 %v3137_v19, %v3125_v29 }
 0x858   : > { %v3150_v35 = vpop.f32.mrf.mxu2  ;;  %v3163_v37 = vpop.f32.mrf.mxu3 }
 0x859   : > { %3323 = vst [vmem:[%s6524_s16] sm:$0xff] %v3138_v20  ;;  %v3151_v36 = vadd.f32 %v3150_v35, %v2453_v34 }
 0x85b   : > { %v3164_v38 = vadd.f32 %v3163_v37, %v3151_v36 }
 0x85c   : > { %v3126_v30 = vpop.f32.mrf.mxu0  ;;  %v3139_v39 = vpop.f32.mrf.mxu1 }
 0x85d   : > { %3324 = vst [vmem:[%s6524_s16 + $0x8] sm:$0xff] %v3164_v38 }
 0x860   : > { %v3152_v33 = vpop.f32.mrf.mxu2  ;;  %v3165_v40 = vpop.f32.mrf.mxu3 }
 0x870   : > { %v3176_v42 = vpop.f32.mrf.mxu0 }
 0x871   : > { %v3177_v31 = vadd.f32 %v3176_v42, %v2454_v41 }
 0x872   : > { %v3189_v43 = vpop.f32.mrf.mxu1 }
 0x873   : > { %v3190_v32 = vadd.f32 %v3189_v43, %v3177_v31 }
 0x875   : > { %3325 = vst [vmem:[%s6524_s16 + $0x10] sm:$0xff] %v3190_v32 }
 0x876   : > { %v3202_v45 = vpop.f32.mrf.mxu2 }
 0x877   : > { %v3203_v46 = vadd.f32 %v3202_v45, %v2455_v44 }
 0x878   : > { %v3215_v47 = vpop.f32.mrf.mxu3  ;;  %v3178_v49 = vpop.f32.mrf.mxu0 }
 0x879   : > { %v3216_v48 = vadd.f32 %v3215_v47, %v3203_v46 }
 0x87a   : > { %v3191_v50 = vpop.f32.mrf.mxu1 }
 0x87b   : > { %3326 = vst [vmem:[%s6524_s16 + $0x18] sm:$0xff] %v3216_v48 }
 0x87e   : > { %v3204_v51 = vpop.f32.mrf.mxu2 }
 0x880   : > { %v3217_v52 = vpop.f32.mrf.mxu3 }
 0x890   : > { %v3228_v54 = vpop.f32.mrf.mxu0 }
 0x891   : > { %v3229_v55 = vadd.f32 %v3228_v54, %v2456_v53 }
 0x892   : > { %v3241_v58 = vpop.f32.mrf.mxu1 }
 0x893   : > { %v3242_v60 = vadd.f32 %v3241_v58, %v3229_v55 }
 0x895   : > { %3327 = vst [vmem:[%s6524_s16 + $0x20] sm:$0xff] %v3242_v60 }
 0x896   : > { %v3254_v61 = vpop.f32.mrf.mxu2 }
 0x897   : > { %v3255_v62 = vadd.f32 %v3254_v61, %v2457_v59 }
 0x898   : > { %v3267_v3 = vpop.f32.mrf.mxu3  ;;  %v3230_v57 = vpop.f32.mrf.mxu0 }
 0x899   : > { %v3268_v56 = vadd.f32 %v3267_v3, %v3255_v62 }
 0x89a   : > { %v3243_v4 = vpop.f32.mrf.mxu1 }
 0x89b   : > { %3328 = vst [vmem:[%s6524_s16 + $0x28] sm:$0xff] %v3268_v56 }
 0x89e   : > { %v3256_v5 = vpop.f32.mrf.mxu2 }
 0x8a0   : > { %v3269_v0 = vpop.f32.mrf.mxu3 }
 0x8b0   : > { %v3280_v6 = vpop.f32.mrf.mxu0 }
 0x8b1   : > { %v3281_v1 = vadd.f32 %v3280_v6, %v2458_v28 }
 0x8b2   : > { %v3293_v7 = vpop.f32.mrf.mxu1 }
 0x8b3   : > { %v3294_v8 = vadd.f32 %v3293_v7, %v3281_v1 }
 0x8b5   : > { %3329 = vst [vmem:[%s6524_s16 + $0x30] sm:$0xff] %v3294_v8 }
 0x8b6   : > { %v3306_v10 = vpop.f32.mrf.mxu2 }
 0x8b7   : > { %v3307_v11 = vadd.f32 %v3306_v10, %v2459_v9 }
 0x8b8   : > { %v3319_v12 = vpop.f32.mrf.mxu3  ;;  %v3282_v13 = vpop.f32.mrf.mxu0 }
 0x8b9   : > { %v3320_v63 = vadd.f32 %v3319_v12, %v3307_v11 }
 0x8ba   : > { %v3295_v14 = vpop.f32.mrf.mxu1 }
 0x8bb   : > { %3330 = vst [vmem:[%s6524_s16 + $0x38] sm:$0xff] %v3320_v63 }
 0x8bc   : > { %5977 = shalt.err (!%p5974_p13)
}
 0x8bd   : > { %5110 = dma.vmem_to_hbm [thread:$0]  (%p6372_p0), %s3348_s5, 1024, %s3350_s22, %s3332_s24  }
 0x8be   : > { %v3308_v2 = vpop.f32.mrf.mxu2 }
 0x8c0   : > { %v3321_v15 = vpop.f32.mrf.mxu3 }
 0x8c1 PF: > { %p5220_p2 = scmp.ge.s32.totalorder %s6088_s0, 2  ;;  %s3361_s1 = sand.u32 1, %s6060_s2  }
 0x8c2   : > { %s3362_s21 = scalar_lea.sflag [#allocation5], %s3361_s1 }
 0x8c3   : > { %p5178_p4 = pnand %p5220_p2, %p6380_p6 }
 0x8c5   : > { %p5179_p8 = pneg %p5178_p4 }
 0x8c7   : > { %6055 = dma.done.wait (%p5179_p8), %s3362_s21, 1024  }
 0x8c8   : > { %6057 = vsyncadd (%p5179_p8), %s3362_s21, 4294966272  ;;  %s47_s0 = sadd.s32 1, %s6088_s0   ;;  %s7020_s3 = sld [smem:[#allocation56_spill]] }
 0x8c9   : > { %p44_p7 = scmp.ge.s32.totalorder %s47_s0, 6   ;;  %s7021_s27 = sld [smem:[#allocation51_spill]] }
 0x8ca   : > { %s7022_s28 = sld [smem:[#allocation52_spill]]  ;;  %s7025_s2 = smov %s6064_s25 }
 0x8cb   : > { %s7023_s16 = sld [smem:[#allocation54_spill]]  ;;  %s7026_s25 = smov %s6068_s26 }
 0x8cc   : > { %s7024_s29 = sld [smem:[#allocation55_spill]] }
 0x8cd   :  { %46 = sbr.rel (!%p44_p7) target bundleno = 39 (0x27), region = 241 }
 0x8ce   : > { %s7027_s26 = smov %s7020_s3 }
 0x8d0   : > { %s7028_s3 = smov %s7022_s28 }
 0x8d1   : > { %s7029_s28 = smov %s7023_s16 }
 0x8d2   :  { %3368 = vsyncpa [#allocation4], 1 }
 0x8d3   :  { %3370 = vsyncpa [#allocation4 + $0x1], 1 }
 0x8d4   :  { %3371 = vsyncpa [#allocation7], 1 }
 0x8d5   :  { %3372 = vsyncpa [#allocation10], 1 }
 0x8d6   :  { %3373 = vsyncpa [#allocation13], 1 }
 0x8d7   :  { %3374 = vsyncpa [#allocation16], 1 }
 0x8d8   :  { %3375 = vsyncpa [#allocation19], 1 }
 0x8d9   :  { %3376 = vsyncpa [#allocation22], 1 }
 0x8da   :  { %3377 = vsyncpa [#allocation25], 1 }
 0x8db   :  { %3378 = vsyncpa [#allocation28], 1 }
 0x8dc   :  { %3379 = vsyncpa [#allocation31], 1 }
 0x8dd   :  { %3380 = vsyncpa [#allocation34], 1 }
 0x8de   :  { %3382 = vsyncpa [#allocation34 + $0x1], 1 }
 0x8df   :  { %3383 = vsyncpa [#allocation5], 1 }
 0x8e0   :  { %3385 = vsyncpa [#allocation5 + $0x1], 1 }

</bundles_post_ra>
